<compile_context>
chip_gen: v7x
topology: tpu7x:2x2x1
jax: 0.10.0
libtpu: 0.0.40
codegen_flags: <defaults>
</compile_context>

<pallas_src>
import functools

import jax
import jax.numpy as jnp
from jax import lax
from jax.experimental import pallas as pl
from jax.experimental.pallas import tpu as pltpu

LANES = 128                       # lane-dense padded channel width
VMEM_LIMIT = 32 * 1024 * 1024     # safe on v5e/v6e (128 MiB) and v7x (64 MiB)


def _compiler_params():
    return pltpu.CompilerParams(dimension_semantics=("parallel",),
                                vmem_limit_bytes=VMEM_LIMIT)


def _pick_tile(m, pref, unit=8):
    # Row tile <= pref, multiple of `unit`, dividing m exactly when possible,
    # preferring an even number of grid steps (v7x megacore load balance).
    if m <= pref:
        if m % (2 * unit) == 0:
            return m // 2                     # exact two-step grid
        return m                              # single full block (always legal)
    cands = [t for t in range(unit, pref + 1, unit) if m % t == 0]
    even = [t for t in cands if (m // t) % 2 == 0]
    if even:
        return max(even)
    if cands:
        return max(cands)
    return pref                               # masked partial last tile (rare)


# ----------------------------- Pallas kernels ------------------------------

def _conv1_pool_kernel(x_ref, w_ref, b_ref, o_ref):
    # x: (tm, 36) bf16   rows = pooled positions (b, pi, pj), cols = 6x6 super-patch
    # w: (36, 512) bf16  block-structured: segment p holds the 5x5 conv weights
    #                    of pooling-window member p (zero elsewhere)
    # b: (1, 512) f32    conv1 bias tiled over the 4 segments
    # o: (tm, 128) bf16  relu(maxpool2x2(conv1(x)))
    acc = jnp.dot(x_ref[...], w_ref[...], preferred_element_type=jnp.float32)
    acc = acc + b_ref[...]
    m = jnp.maximum(jnp.maximum(acc[:, 0 * LANES:1 * LANES],
                                acc[:, 1 * LANES:2 * LANES]),
                    jnp.maximum(acc[:, 2 * LANES:3 * LANES],
                                acc[:, 3 * LANES:4 * LANES]))
    o_ref[...] = jnp.maximum(m, 0.0).astype(o_ref.dtype)


def _conv2_kernel(a_ref, w_ref, b_ref, o_ref, acc_ref, *, bt):
    # Implicit GEMM: a: (bt, 12, 12, 128) bf16, w: (25, 128, 128) bf16,
    # b: (1, 128) f32, o: (bt*64, 128) bf16 (rows = (b, oi, oj), pre-relu/pool),
    # acc: (bt*64, 128) f32 VMEM scratch.  No im2col ever touches HBM.
    acc_ref[...] = jnp.zeros_like(acc_ref)
    for ki in range(5):
        for kj in range(5):
            win = a_ref[:, ki:ki + 8, kj:kj + 8, :]          # (bt, 8, 8, 128)
            xw = win.reshape(bt * 64, LANES)
            acc_ref[...] += jnp.dot(xw, w_ref[ki * 5 + kj],
                                    preferred_element_type=jnp.float32)
    # TODO(synk): Dropout2d after conv2 is identity (eval semantics).
    o_ref[...] = (acc_ref[...] + b_ref[...]).astype(o_ref.dtype)


def _fc_head_kernel(x_ref, w1_ref, b1_ref, w2_ref, b2_ref, o_ref, *, n_valid):
    # x: (tm, 8*8*128) bf16 = flattened conv2 output (bias included), layout (oi, oj, c).
    # Fused: 2x2 max-pool (lane-chunk maxes) -> ReLU -> fc1 -> ReLU -> fc2 -> log_softmax.
    x = x_ref[...]
    chunks = []
    for pi in range(4):
        for pj in range(4):
            def sl(di, dj):
                off = ((2 * pi + di) * 8 + (2 * pj + dj)) * LANES
                return x[:, off:off + LANES]
            chunks.append(jnp.maximum(jnp.maximum(sl(0, 0), sl(0, 1)),
                                      jnp.maximum(sl(1, 0), sl(1, 1))))
    feat = jnp.maximum(jnp.concatenate(chunks, axis=1), 0.0)   # (tm, 2048) bf16
    h = jnp.dot(feat, w1_ref[...], preferred_element_type=jnp.float32)
    h = jnp.maximum(h + b1_ref[...], 0.0)
    # TODO(synk): F.dropout between fc1 and fc2 is identity (eval semantics).
    z = jnp.dot(h.astype(w2_ref.dtype), w2_ref[...],
                preferred_element_type=jnp.float32)
    z = z + b2_ref[...]
    col = lax.broadcasted_iota(jnp.int32, z.shape, 1)
    z = jnp.where(col < n_valid, z, jnp.float32(-1e30))        # mask padded logits
    zmax = jnp.max(z, axis=-1, keepdims=True)
    lse = jnp.log(jnp.sum(jnp.exp(z - zmax), axis=-1, keepdims=True)) + zmax
    o_ref[...] = (z - lse).astype(o_ref.dtype)


# ------------------------------ pallas wrappers -----------------------------

def conv1_pool(p1, w, b, *, tm):
    M, K = p1.shape
    return pl.pallas_call(
        _conv1_pool_kernel,
        out_shape=jax.ShapeDtypeStruct((M, LANES), jnp.bfloat16),
        grid=(pl.cdiv(M, tm),),
        in_specs=[pl.BlockSpec((tm, K), lambda i: (i, 0)),
                  pl.BlockSpec(w.shape, lambda i: (0, 0)),
                  pl.BlockSpec(b.shape, lambda i: (0, 0))],
        out_specs=pl.BlockSpec((tm, LANES), lambda i: (i, 0)),
        compiler_params=_compiler_params(),
    )(p1, w, b)


def conv2_implicit(a1, w, b, *, bt):
    B = a1.shape[0]
    return pl.pallas_call(
        functools.partial(_conv2_kernel, bt=bt),
        out_shape=jax.ShapeDtypeStruct((B * 64, LANES), jnp.bfloat16),
        grid=(pl.cdiv(B, bt),),
        in_specs=[pl.BlockSpec((bt, 12, 12, LANES), lambda i: (i, 0, 0, 0)),
                  pl.BlockSpec(w.shape, lambda i: (0, 0, 0)),
                  pl.BlockSpec(b.shape, lambda i: (0, 0))],
        out_specs=pl.BlockSpec((bt * 64, LANES), lambda i: (i, 0)),
        scratch_shapes=[pltpu.VMEM((bt * 64, LANES), jnp.float32)],
        compiler_params=_compiler_params(),
    )(a1, w, b)


def fc_head(feat, w1, b1, w2, b2, *, n_valid, tm):
    M, K = feat.shape
    N = w2.shape[1]
    out = pl.pallas_call(
        functools.partial(_fc_head_kernel, n_valid=n_valid),
        out_shape=jax.ShapeDtypeStruct((M, N), jnp.float32),
        grid=(pl.cdiv(M, tm),),
        in_specs=[pl.BlockSpec((tm, K), lambda i: (i, 0)),
                  pl.BlockSpec(w1.shape, lambda i: (0, 0)),
                  pl.BlockSpec((1, N), lambda i: (0, 0)),
                  pl.BlockSpec(w2.shape, lambda i: (0, 0)),
                  pl.BlockSpec((1, N), lambda i: (0, 0))],
        out_specs=pl.BlockSpec((tm, N), lambda i: (i, 0)),
        compiler_params=_compiler_params(),
    )(feat, w1, b1, w2, b2)
    return out[:, :n_valid]


# --------------------- one-time weight prep (hoisted) -----------------------

def _prep_conv1_pool(w1, b1):
    # torch conv1 weight (Cout,1,5,5) -> (36, 4*128) block weight for the fused
    # conv1+pool matmul: each pooling-window member (di,dj) gets its own
    # 128-lane output segment fed by its 5x5 sub-window of the 6x6 super-patch.
    cout = w1.shape[0]
    base = jnp.pad(w1[:, 0].transpose(1, 2, 0),                # (5,5,cout)->(ki,kj,co)
                   ((0, 0), (0, 0), (0, LANES - cout)))        # (5,5,128)
    segs = [jnp.pad(base, ((di, 1 - di), (dj, 1 - dj), (0, 0))).reshape(36, LANES)
            for di in range(2) for dj in range(2)]
    wp = jnp.concatenate(segs, axis=1).astype(jnp.bfloat16)    # (36, 512)
    bp = jnp.tile(jnp.pad(b1, (0, LANES - cout)), 4).reshape(1, 4 * LANES)
    return wp, bp.astype(jnp.float32)


def _prep_conv2(w2, b2):
    # torch conv2 weight (Cout,Cin,5,5) -> (25, 128, 128) bf16 tap-major.
    cout, cin = w2.shape[0], w2.shape[1]
    wt = w2.transpose(2, 3, 1, 0)                              # (5,5,cin,cout)
    wt = jnp.pad(wt, ((0, 0), (0, 0), (0, LANES - cin), (0, LANES - cout)))
    wt = wt.reshape(25, LANES, LANES).astype(jnp.bfloat16)
    bp = jnp.pad(b2, (0, LANES - cout)).reshape(1, LANES).astype(jnp.float32)
    return wt, bp


def _prep_fc1(fw1, fb1, ch, hp=4, wp=4):
    # torch flatten order is (c, h, w); our pooled activation is (h, w, c_pad).
    # Fold that permutation and the channel padding into the fc1 weight rows.
    nout = fw1.shape[0]                                        # 50
    wt = fw1.T.reshape(ch, hp, wp, nout).transpose(1, 2, 0, 3)  # (h,w,c,out)
    wt = jnp.pad(wt, ((0, 0), (0, 0), (0, LANES - ch), (0, LANES - nout)))
    wt = wt.reshape(hp * wp * LANES, LANES).astype(jnp.bfloat16)   # (2048, 128)
    bp = jnp.pad(fb1, (0, LANES - nout)).reshape(1, LANES).astype(jnp.float32)
    return wt, bp


def _prep_fc2(fw2, fb2):
    nout, nin = fw2.shape                                      # (10, 50)
    wt = jnp.pad(fw2.T, ((0, LANES - nin), (0, LANES - nout))).astype(jnp.bfloat16)
    bp = jnp.pad(fb2, (0, LANES - nout)).reshape(1, LANES).astype(jnp.float32)
    return wt, bp


def prepare_params(params):
    # One-time prep (transpose / pad / bf16 cast), kept OUT of the jitted forward.
    w1, b1, w2, b2, fw1, fb1, fw2, fb2 = params
    return (*_prep_conv1_pool(w1, b1), *_prep_conv2(w2, b2),
            *_prep_fc1(fw1, fb1, ch=w2.shape[0]), *_prep_fc2(fw2, fb2))


# ------------------------------ glue (im2col) --------------------------------

def _im2col_conv1_pooled(xh):
    # xh: (B, 28, 28, 1) bf16 -> (B*144, 36): one row per POOLED position,
    # columns = the 6x6 super-patch covering its 2x2 window of 5x5 conv patches.
    b = xh.shape[0]
    x2 = xh[..., 0]
    cols = [x2[:, ui:ui + 23:2, uj:uj + 23:2]
            for ui in range(6) for uj in range(6)]             # each (B, 12, 12)
    p = jnp.stack(cols, axis=-1)                               # (B, 12, 12, 36)
    return p.reshape(b * 144, 36)


# ------------------------------ full forward --------------------------------

def custom_net_forward(x, prepped):
    # x: (B, 1, 28, 28) f32 NCHW (PyTorch convention); prepped = prepare_params(params).
    w1p, b1p, w2p, b2p, fw1p, fb1p, fw2p, fb2p = prepped
    B = x.shape[0]

    # conv1 + maxpool2 + relu in ONE kernel (pool = 4-way max over lane segments)
    xh = x.transpose(0, 2, 3, 1).astype(jnp.bfloat16)          # NHWC bf16
    p1 = _im2col_conv1_pooled(xh)                              # (B*144, 36)
    tm1 = _pick_tile(B * 144, 576)
    a1 = conv1_pool(p1, w1p, b1p, tm=tm1)                      # (B*144, 128) bf16
    a1 = a1.reshape(B, 12, 12, LANES)                          # rows were (b, pi, pj)

    # conv2 as implicit GEMM over the 25 taps (no im2col HBM expansion)
    bt = _pick_tile(B, 8, unit=1)
    y2 = conv2_implicit(a1, w2p, b2p, bt=bt)                   # (B*64, 128) bf16
    feat = y2.reshape(B, 64 * LANES)                           # (B, 8192), (oi, oj, c)

    # maxpool2 + relu + fc1 + relu + fc2 + log_softmax in ONE kernel
    tmf = _pick_tile(B, 256)
    return fc_head(feat, fw1p, fb1p, fw2p, fb2p, n_valid=10, tm=tmf)   # (B, 10) f32


# ------------------------------ reference & demo ----------------------------

def reference_forward(x, params):
    # Pure-JAX f32 reference with PyTorch semantics (validation only).
    w1, b1, w2, b2, fw1, fb1, fw2, fb2 = params

    def conv(v, w, b):
        y = lax.conv_general_dilated(v, w, (1, 1), "VALID",
                                     dimension_numbers=("NCHW", "OIHW", "NCHW"))
        return y + b[None, :, None, None]

    def pool_relu(y):
        m = jnp.maximum(jnp.maximum(y[:, :, 0::2, 0::2], y[:, :, 0::2, 1::2]),
                        jnp.maximum(y[:, :, 1::2, 0::2], y[:, :, 1::2, 1::2]))
        return jnp.maximum(m, 0.0)

    y = pool_relu(conv(x, w1, b1))
    y = pool_relu(conv(y, w2, b2))
    y = y.reshape(y.shape[0], -1)                              # (B, 320), NCHW order
    y = jnp.maximum(y @ fw1.T + fb1, 0.0)
    y = y @ fw2.T + fb2
    return jax.nn.log_softmax(y, axis=-1)


def init_params(key):
    ks = jax.random.split(key, 8)
    w1 = 0.1 * jax.random.normal(ks[0], (100, 1, 5, 5), jnp.float32)
    b1 = 0.1 * jax.random.normal(ks[1], (100,), jnp.float32)
    w2 = 0.05 * jax.random.normal(ks[2], (20, 100, 5, 5), jnp.float32)
    b2 = 0.1 * jax.random.normal(ks[3], (20,), jnp.float32)
    fw1 = 0.05 * jax.random.normal(ks[4], (50, 320), jnp.float32)   # torch (out, in)
    fb1 = 0.1 * jax.random.normal(ks[5], (50,), jnp.float32)
    fw2 = 0.1 * jax.random.normal(ks[6], (10, 50), jnp.float32)
    fb2 = 0.1 * jax.random.normal(ks[7], (10,), jnp.float32)
    return (w1, b1, w2, b2, fw1, fb1, fw2, fb2)


if __name__ == "__main__":
    key = jax.random.PRNGKey(0)
    kx, kp = jax.random.split(key)
    # MNIST-shaped input: batch=2, 1 channel, 28x28 (required so flatten -> 320)
    x = jax.random.normal(kx, (2, 1, 28, 28), jnp.float32)
    params = init_params(kp)

    prepped = prepare_params(params)             # one-time weight prep (hoisted)
    fwd = jax.jit(custom_net_forward)
    out = jax.block_until_ready(fwd(x, prepped))

    assert out.shape == (2, 10)
    # log_softmax rows must sum to 1 in prob space
    assert jnp.allclose(jnp.sum(jnp.exp(out), axis=-1), 1.0, atol=1e-4)
    # match the pure-JAX f32 reference (bf16 MXU inputs -> loose tolerance)
    ref = reference_forward(x, params)
    assert jnp.allclose(out, ref, atol=5e-2), float(jnp.max(jnp.abs(out - ref)))
    print("KERNEL_OK")
</pallas_src>

<mosaic_0001>
module attributes {stable_mosaic.version = 11 : i64} {
  func.func @_conv1_pool_kernel(%arg0: i32, %arg1: memref<144x36xbf16, #tpu.memory_space<vmem>>, %arg2: memref<36x512xbf16, #tpu.memory_space<vmem>>, %arg3: memref<1x512xf32, #tpu.memory_space<vmem>>, %arg4: memref<144x128xbf16, #tpu.memory_space<vmem>>) attributes {dimension_semantics = [#tpu.dimension_semantics<parallel>], iteration_bounds = array<i64: 2>, scalar_prefetch = 0 : i64, scratch_operands = 0 : i64, tpu.core_type = #tpu.core_type<tc>, window_params = [{transform_indices = @transform_0, window_bounds = array<i64: 144, 36>}, {pipeline_mode = #tpu.pipeline_mode<synchronous>, transform_indices = @transform_1, window_bounds = array<i64: 36, 512>}, {pipeline_mode = #tpu.pipeline_mode<synchronous>, transform_indices = @transform_2, window_bounds = array<i64: 1, 512>}, {transform_indices = @transform_3, window_bounds = array<i64: 144, 128>}]} {
    %c0 = arith.constant 0 : index
    %c0_0 = arith.constant 0 : index
    %0 = vector.load %arg1[%c0, %c0_0] : memref<144x36xbf16, #tpu.memory_space<vmem>>, vector<144x36xbf16>
    %c0_1 = arith.constant 0 : index
    %c0_2 = arith.constant 0 : index
    %1 = vector.load %arg2[%c0_1, %c0_2] : memref<36x512xbf16, #tpu.memory_space<vmem>>, vector<36x512xbf16>
    %cst = arith.constant dense<0.000000e+00> : vector<144x512xf32>
    %2 = tpu.matmul %0, %1, %cst {dimension_numbers = #tpu.dot_dimension_numbers<[1], [0], [0], [1], [0, 0, 1, 1], [], []>} : vector<144x36xbf16>, vector<36x512xbf16>, vector<144x512xf32> -> vector<144x512xf32>
    %c0_3 = arith.constant 0 : index
    %c0_4 = arith.constant 0 : index
    %3 = vector.load %arg3[%c0_3, %c0_4] : memref<1x512xf32, #tpu.memory_space<vmem>>, vector<1x512xf32>
    %4 = vector.broadcast %3 : vector<1x512xf32> to vector<144x512xf32>
    %5 = arith.addf %2, %4 : vector<144x512xf32>
    %6 = vector.extract_strided_slice %5 {offsets = [0, 0], sizes = [144, 128], strides = [1, 1]} : vector<144x512xf32> to vector<144x128xf32>
    %7 = vector.extract_strided_slice %5 {offsets = [0, 128], sizes = [144, 128], strides = [1, 1]} : vector<144x512xf32> to vector<144x128xf32>
    %8 = arith.maximumf %6, %7 : vector<144x128xf32>
    %9 = vector.extract_strided_slice %5 {offsets = [0, 256], sizes = [144, 128], strides = [1, 1]} : vector<144x512xf32> to vector<144x128xf32>
    %10 = vector.extract_strided_slice %5 {offsets = [0, 384], sizes = [144, 128], strides = [1, 1]} : vector<144x512xf32> to vector<144x128xf32>
    %11 = arith.maximumf %9, %10 : vector<144x128xf32>
    %12 = arith.maximumf %8, %11 : vector<144x128xf32>
    %cst_5 = arith.constant 0.000000e+00 : f32
    %13 = vector.broadcast %cst_5 : f32 to vector<144x128xf32>
    %14 = arith.maximumf %12, %13 : vector<144x128xf32>
    %15 = arith.truncf %14 : vector<144x128xf32> to vector<144x128xbf16>
    %c0_6 = arith.constant 0 : index
    %c0_7 = arith.constant 0 : index
    %16 = vector.load %arg4[%c0_6, %c0_7] : memref<144x128xbf16, #tpu.memory_space<vmem>>, vector<144x128xbf16>
    tpu.vector_store %arg4[%c0_6, %c0_7], %15 {strides = array<i32>} : memref<144x128xbf16, #tpu.memory_space<vmem>>, vector<144x128xbf16>,
    return
  }
  func.func @transform_0(%arg0: i32) -> (i32, i32) {
    %c0_i32 = arith.constant 0 : i32
    %c0_i32_0 = arith.constant 0 : i32
    return %arg0, %c0_i32 : i32, i32
  }
  func.func @transform_1(%arg0: i32) -> (i32, i32) {
    %c0_i32 = arith.constant 0 : i32
    %c0_i32_0 = arith.constant 0 : i32
    %c0_i32_1 = arith.constant 0 : i32
    return %c0_i32, %c0_i32_0 : i32, i32
  }
  func.func @transform_2(%arg0: i32) -> (i32, i32) {
    %c0_i32 = arith.constant 0 : i32
    %c0_i32_0 = arith.constant 0 : i32
    %c0_i32_1 = arith.constant 0 : i32
    return %c0_i32, %c0_i32_0 : i32, i32
  }
  func.func @transform_3(%arg0: i32) -> (i32, i32) {
    %c0_i32 = arith.constant 0 : i32
    %c0_i32_0 = arith.constant 0 : i32
    return %arg0, %c0_i32 : i32, i32
  }
}

module attributes {stable_mosaic.version = 11 : i64} {
  func.func @_conv2_kernel(%arg0: i32, %arg1: memref<1x12x12x128xbf16, #tpu.memory_space<vmem>>, %arg2: memref<25x128x128xbf16, #tpu.memory_space<vmem>>, %arg3: memref<1x128xf32, #tpu.memory_space<vmem>>, %arg4: memref<64x128xbf16, #tpu.memory_space<vmem>>, %arg5: memref<64x128xf32, #tpu.memory_space<vmem>>) attributes {dimension_semantics = [#tpu.dimension_semantics<parallel>], iteration_bounds = array<i64: 2>, scalar_prefetch = 0 : i64, scratch_operands = 1 : i64, tpu.core_type = #tpu.core_type<tc>, window_params = [{transform_indices = @transform_0, window_bounds = array<i64: 1, 12, 12, 128>}, {pipeline_mode = #tpu.pipeline_mode<synchronous>, transform_indices = @transform_1, window_bounds = array<i64: 25, 128, 128>}, {pipeline_mode = #tpu.pipeline_mode<synchronous>, transform_indices = @transform_2, window_bounds = array<i64: 1, 128>}, {transform_indices = @transform_3, window_bounds = array<i64: 64, 128>}]} {
    %cst = arith.constant 0.000000e+00 : f32
    %0 = vector.broadcast %cst : f32 to vector<64x128xf32>
    %c0 = arith.constant 0 : index
    %c0_0 = arith.constant 0 : index
    %1 = vector.load %arg5[%c0, %c0_0] : memref<64x128xf32, #tpu.memory_space<vmem>>, vector<64x128xf32>
    tpu.vector_store %arg5[%c0, %c0_0], %0 {strides = array<i32>} : memref<64x128xf32, #tpu.memory_space<vmem>>, vector<64x128xf32>,
    %c0_1 = arith.constant 0 : index
    %c0_2 = arith.constant 0 : index
    %c0_3 = arith.constant 0 : index
    %c0_4 = arith.constant 0 : index
    %2 = vector.load %arg1[%c0_1, %c0_2, %c0_3, %c0_4] : memref<1x12x12x128xbf16, #tpu.memory_space<vmem>>, vector<1x8x8x128xbf16>
    %3 = vector.shape_cast %2 : vector<1x8x8x128xbf16> to vector<64x128xbf16>
    %c0_5 = arith.constant 0 : index
    %c0_6 = arith.constant 0 : index
    %4 = vector.load %arg5[%c0_5, %c0_6] : memref<64x128xf32, #tpu.memory_space<vmem>>, vector<64x128xf32>
    %c0_7 = arith.constant 0 : index
    %c0_8 = arith.constant 0 : index
    %c0_9 = arith.constant 0 : index
    %5 = vector.load %arg2[%c0_7, %c0_8, %c0_9] : memref<25x128x128xbf16, #tpu.memory_space<vmem>>, vector<1x128x128xbf16>
    %6 = vector.shape_cast %5 : vector<1x128x128xbf16> to vector<128x128xbf16>
    %cst_10 = arith.constant dense<0.000000e+00> : vector<64x128xf32>
    %7 = tpu.matmul %3, %6, %cst_10 {dimension_numbers = #tpu.dot_dimension_numbers<[1], [0], [0], [1], [0, 0, 1, 1], [], []>} : vector<64x128xbf16>, vector<128x128xbf16>, vector<64x128xf32> -> vector<64x128xf32>
    %8 = arith.addf %4, %7 : vector<64x128xf32>
    %c0_11 = arith.constant 0 : index
    %c0_12 = arith.constant 0 : index
    %9 = vector.load %arg5[%c0_11, %c0_12] : memref<64x128xf32, #tpu.memory_space<vmem>>, vector<64x128xf32>
    tpu.vector_store %arg5[%c0_11, %c0_12], %8 {strides = array<i32>} : memref<64x128xf32, #tpu.memory_space<vmem>>, vector<64x128xf32>,
    %c0_13 = arith.constant 0 : index
    %c0_14 = arith.constant 0 : index
    %c1 = arith.constant 1 : index
    %c0_15 = arith.constant 0 : index
    %10 = vector.load %arg1[%c0_13, %c0_14, %c1, %c0_15] : memref<1x12x12x128xbf16, #tpu.memory_space<vmem>>, vector<1x8x8x128xbf16>
    %11 = vector.shape_cast %10 : vector<1x8x8x128xbf16> to vector<64x128xbf16>
    %c0_16 = arith.constant 0 : index
    %c0_17 = arith.constant 0 : index
    %12 = vector.load %arg5[%c0_16, %c0_17] : memref<64x128xf32, #tpu.memory_space<vmem>>, vector<64x128xf32>
    %c1_18 = arith.constant 1 : index
    %c0_19 = arith.constant 0 : index
    %c0_20 = arith.constant 0 : index
    %13 = vector.load %arg2[%c1_18, %c0_19, %c0_20] : memref<25x128x128xbf16, #tpu.memory_space<vmem>>, vector<1x128x128xbf16>
    %14 = vector.shape_cast %13 : vector<1x128x128xbf16> to vector<128x128xbf16>
    %cst_21 = arith.constant dense<0.000000e+00> : vector<64x128xf32>
    %15 = tpu.matmul %11, %14, %cst_21 {dimension_numbers = #tpu.dot_dimension_numbers<[1], [0], [0], [1], [0, 0, 1, 1], [], []>} : vector<64x128xbf16>, vector<128x128xbf16>, vector<64x128xf32> -> vector<64x128xf32>
    %16 = arith.addf %12, %15 : vector<64x128xf32>
    %c0_22 = arith.constant 0 : index
    %c0_23 = arith.constant 0 : index
    %17 = vector.load %arg5[%c0_22, %c0_23] : memref<64x128xf32, #tpu.memory_space<vmem>>, vector<64x128xf32>
    tpu.vector_store %arg5[%c0_22, %c0_23], %16 {strides = array<i32>} : memref<64x128xf32, #tpu.memory_space<vmem>>, vector<64x128xf32>,
    %c0_24 = arith.constant 0 : index
    %c0_25 = arith.constant 0 : index
    %c2 = arith.constant 2 : index
    %c0_26 = arith.constant 0 : index
    %18 = vector.load %arg1[%c0_24, %c0_25, %c2, %c0_26] : memref<1x12x12x128xbf16, #tpu.memory_space<vmem>>, vector<1x8x8x128xbf16>
    %19 = vector.shape_cast %18 : vector<1x8x8x128xbf16> to vector<64x128xbf16>
    %c0_27 = arith.constant 0 : index
    %c0_28 = arith.constant 0 : index
    %20 = vector.load %arg5[%c0_27, %c0_28] : memref<64x128xf32, #tpu.memory_space<vmem>>, vector<64x128xf32>
    %c2_29 = arith.constant 2 : index
    %c0_30 = arith.constant 0 : index
    %c0_31 = arith.constant 0 : index
    %21 = vector.load %arg2[%c2_29, %c0_30, %c0_31] : memref<25x128x128xbf16, #tpu.memory_space<vmem>>, vector<1x128x128xbf16>
    %22 = vector.shape_cast %21 : vector<1x128x128xbf16> to vector<128x128xbf16>
    %cst_32 = arith.constant dense<0.000000e+00> : vector<64x128xf32>
    %23 = tpu.matmul %19, %22, %cst_32 {dimension_numbers = #tpu.dot_dimension_numbers<[1], [0], [0], [1], [0, 0, 1, 1], [], []>} : vector<64x128xbf16>, vector<128x128xbf16>, vector<64x128xf32> -> vector<64x128xf32>
    %24 = arith.addf %20, %23 : vector<64x128xf32>
    %c0_33 = arith.constant 0 : index
    %c0_34 = arith.constant 0 : index
    %25 = vector.load %arg5[%c0_33, %c0_34] : memref<64x128xf32, #tpu.memory_space<vmem>>, vector<64x128xf32>
    tpu.vector_store %arg5[%c0_33, %c0_34], %24 {strides = array<i32>} : memref<64x128xf32, #tpu.memory_space<vmem>>, vector<64x128xf32>,
    %c0_35 = arith.constant 0 : index
    %c0_36 = arith.constant 0 : index
    %c3 = arith.constant 3 : index
    %c0_37 = arith.constant 0 : index
    %26 = vector.load %arg1[%c0_35, %c0_36, %c3, %c0_37] : memref<1x12x12x128xbf16, #tpu.memory_space<vmem>>, vector<1x8x8x128xbf16>
    %27 = vector.shape_cast %26 : vector<1x8x8x128xbf16> to vector<64x128xbf16>
    %c0_38 = arith.constant 0 : index
    %c0_39 = arith.constant 0 : index
    %28 = vector.load %arg5[%c0_38, %c0_39] : memref<64x128xf32, #tpu.memory_space<vmem>>, vector<64x128xf32>
    %c3_40 = arith.constant 3 : index
    %c0_41 = arith.constant 0 : index
    %c0_42 = arith.constant 0 : index
    %29 = vector.load %arg2[%c3_40, %c0_41, %c0_42] : memref<25x128x128xbf16, #tpu.memory_space<vmem>>, vector<1x128x128xbf16>
    %30 = vector.shape_cast %29 : vector<1x128x128xbf16> to vector<128x128xbf16>
    %cst_43 = arith.constant dense<0.000000e+00> : vector<64x128xf32>
    %31 = tpu.matmul %27, %30, %cst_43 {dimension_numbers = #tpu.dot_dimension_numbers<[1], [0], [0], [1], [0, 0, 1, 1], [], []>} : vector<64x128xbf16>, vector<128x128xbf16>, vector<64x128xf32> -> vector<64x128xf32>
    %32 = arith.addf %28, %31 : vector<64x128xf32>
    %c0_44 = arith.constant 0 : index
    %c0_45 = arith.constant 0 : index
    %33 = vector.load %arg5[%c0_44, %c0_45] : memref<64x128xf32, #tpu.memory_space<vmem>>, vector<64x128xf32>
    tpu.vector_store %arg5[%c0_44, %c0_45], %32 {strides = array<i32>} : memref<64x128xf32, #tpu.memory_space<vmem>>, vector<64x128xf32>,
    %c0_46 = arith.constant 0 : index
    %c0_47 = arith.constant 0 : index
    %c4 = arith.constant 4 : index
    %c0_48 = arith.constant 0 : index
    %34 = vector.load %arg1[%c0_46, %c0_47, %c4, %c0_48] : memref<1x12x12x128xbf16, #tpu.memory_space<vmem>>, vector<1x8x8x128xbf16>
    %35 = vector.shape_cast %34 : vector<1x8x8x128xbf16> to vector<64x128xbf16>
    %c0_49 = arith.constant 0 : index
    %c0_50 = arith.constant 0 : index
    %36 = vector.load %arg5[%c0_49, %c0_50] : memref<64x128xf32, #tpu.memory_space<vmem>>, vector<64x128xf32>
    %c4_51 = arith.constant 4 : index
    %c0_52 = arith.constant 0 : index
    %c0_53 = arith.constant 0 : index
    %37 = vector.load %arg2[%c4_51, %c0_52, %c0_53] : memref<25x128x128xbf16, #tpu.memory_space<vmem>>, vector<1x128x128xbf16>
    %38 = vector.shape_cast %37 : vector<1x128x128xbf16> to vector<128x128xbf16>
    %cst_54 = arith.constant dense<0.000000e+00> : vector<64x128xf32>
    %39 = tpu.matmul %35, %38, %cst_54 {dimension_numbers = #tpu.dot_dimension_numbers<[1], [0], [0], [1], [0, 0, 1, 1], [], []>} : vector<64x128xbf16>, vector<128x128xbf16>, vector<64x128xf32> -> vector<64x128xf32>
    %40 = arith.addf %36, %39 : vector<64x128xf32>
    %c0_55 = arith.constant 0 : index
    %c0_56 = arith.constant 0 : index
    %41 = vector.load %arg5[%c0_55, %c0_56] : memref<64x128xf32, #tpu.memory_space<vmem>>, vector<64x128xf32>
    tpu.vector_store %arg5[%c0_55, %c0_56], %40 {strides = array<i32>} : memref<64x128xf32, #tpu.memory_space<vmem>>, vector<64x128xf32>,
    %c0_57 = arith.constant 0 : index
    %c1_58 = arith.constant 1 : index
    %c0_59 = arith.constant 0 : index
    %c0_60 = arith.constant 0 : index
    %42 = vector.load %arg1[%c0_57, %c1_58, %c0_59, %c0_60] : memref<1x12x12x128xbf16, #tpu.memory_space<vmem>>, vector<1x8x8x128xbf16>
    %43 = vector.shape_cast %42 : vector<1x8x8x128xbf16> to vector<64x128xbf16>
    %c0_61 = arith.constant 0 : index
    %c0_62 = arith.constant 0 : index
    %44 = vector.load %arg5[%c0_61, %c0_62] : memref<64x128xf32, #tpu.memory_space<vmem>>, vector<64x128xf32>
    %c5 = arith.constant 5 : index
    %c0_63 = arith.constant 0 : index
    %c0_64 = arith.constant 0 : index
    %45 = vector.load %arg2[%c5, %c0_63, %c0_64] : memref<25x128x128xbf16, #tpu.memory_space<vmem>>, vector<1x128x128xbf16>
    %46 = vector.shape_cast %45 : vector<1x128x128xbf16> to vector<128x128xbf16>
    %cst_65 = arith.constant dense<0.000000e+00> : vector<64x128xf32>
    %47 = tpu.matmul %43, %46, %cst_65 {dimension_numbers = #tpu.dot_dimension_numbers<[1], [0], [0], [1], [0, 0, 1, 1], [], []>} : vector<64x128xbf16>, vector<128x128xbf16>, vector<64x128xf32> -> vector<64x128xf32>
    %48 = arith.addf %44, %47 : vector<64x128xf32>
    %c0_66 = arith.constant 0 : index
    %c0_67 = arith.constant 0 : index
    %49 = vector.load %arg5[%c0_66, %c0_67] : memref<64x128xf32, #tpu.memory_space<vmem>>, vector<64x128xf32>
    tpu.vector_store %arg5[%c0_66, %c0_67], %48 {strides = array<i32>} : memref<64x128xf32, #tpu.memory_space<vmem>>, vector<64x128xf32>,
    %c0_68 = arith.constant 0 : index
    %c1_69 = arith.constant 1 : index
    %c1_70 = arith.constant 1 : index
    %c0_71 = arith.constant 0 : index
    %50 = vector.load %arg1[%c0_68, %c1_69, %c1_70, %c0_71] : memref<1x12x12x128xbf16, #tpu.memory_space<vmem>>, vector<1x8x8x128xbf16>
    %51 = vector.shape_cast %50 : vector<1x8x8x128xbf16> to vector<64x128xbf16>
    %c0_72 = arith.constant 0 : index
    %c0_73 = arith.constant 0 : index
    %52 = vector.load %arg5[%c0_72, %c0_73] : memref<64x128xf32, #tpu.memory_space<vmem>>, vector<64x128xf32>
    %c6 = arith.constant 6 : index
    %c0_74 = arith.constant 0 : index
    %c0_75 = arith.constant 0 : index
    %53 = vector.load %arg2[%c6, %c0_74, %c0_75] : memref<25x128x128xbf16, #tpu.memory_space<vmem>>, vector<1x128x128xbf16>
    %54 = vector.shape_cast %53 : vector<1x128x128xbf16> to vector<128x128xbf16>
    %cst_76 = arith.constant dense<0.000000e+00> : vector<64x128xf32>
    %55 = tpu.matmul %51, %54, %cst_76 {dimension_numbers = #tpu.dot_dimension_numbers<[1], [0], [0], [1], [0, 0, 1, 1], [], []>} : vector<64x128xbf16>, vector<128x128xbf16>, vector<64x128xf32> -> vector<64x128xf32>
    %56 = arith.addf %52, %55 : vector<64x128xf32>
    %c0_77 = arith.constant 0 : index
    %c0_78 = arith.constant 0 : index
    %57 = vector.load %arg5[%c0_77, %c0_78] : memref<64x128xf32, #tpu.memory_space<vmem>>, vector<64x128xf32>
    tpu.vector_store %arg5[%c0_77, %c0_78], %56 {strides = array<i32>} : memref<64x128xf32, #tpu.memory_space<vmem>>, vector<64x128xf32>,
    %c0_79 = arith.constant 0 : index
    %c1_80 = arith.constant 1 : index
    %c2_81 = arith.constant 2 : index
    %c0_82 = arith.constant 0 : index
    %58 = vector.load %arg1[%c0_79, %c1_80, %c2_81, %c0_82] : memref<1x12x12x128xbf16, #tpu.memory_space<vmem>>, vector<1x8x8x128xbf16>
    %59 = vector.shape_cast %58 : vector<1x8x8x128xbf16> to vector<64x128xbf16>
    %c0_83 = arith.constant 0 : index
    %c0_84 = arith.constant 0 : index
    %60 = vector.load %arg5[%c0_83, %c0_84] : memref<64x128xf32, #tpu.memory_space<vmem>>, vector<64x128xf32>
    %c7 = arith.constant 7 : index
    %c0_85 = arith.constant 0 : index
    %c0_86 = arith.constant 0 : index
    %61 = vector.load %arg2[%c7, %c0_85, %c0_86] : memref<25x128x128xbf16, #tpu.memory_space<vmem>>, vector<1x128x128xbf16>
    %62 = vector.shape_cast %61 : vector<1x128x128xbf16> to vector<128x128xbf16>
    %cst_87 = arith.constant dense<0.000000e+00> : vector<64x128xf32>
    %63 = tpu.matmul %59, %62, %cst_87 {dimension_numbers = #tpu.dot_dimension_numbers<[1], [0], [0], [1], [0, 0, 1, 1], [], []>} : vector<64x128xbf16>, vector<128x128xbf16>, vector<64x128xf32> -> vector<64x128xf32>
    %64 = arith.addf %60, %63 : vector<64x128xf32>
    %c0_88 = arith.constant 0 : index
    %c0_89 = arith.constant 0 : index
    %65 = vector.load %arg5[%c0_88, %c0_89] : memref<64x128xf32, #tpu.memory_space<vmem>>, vector<64x128xf32>
    tpu.vector_store %arg5[%c0_88, %c0_89], %64 {strides = array<i32>} : memref<64x128xf32, #tpu.memory_space<vmem>>, vector<64x128xf32>,
    %c0_90 = arith.constant 0 : index
    %c1_91 = arith.constant 1 : index
    %c3_92 = arith.constant 3 : index
    %c0_93 = arith.constant 0 : index
    %66 = vector.load %arg1[%c0_90, %c1_91, %c3_92, %c0_93] : memref<1x12x12x128xbf16, #tpu.memory_space<vmem>>, vector<1x8x8x128xbf16>
    %67 = vector.shape_cast %66 : vector<1x8x8x128xbf16> to vector<64x128xbf16>
    %c0_94 = arith.constant 0 : index
    %c0_95 = arith.constant 0 : index
    %68 = vector.load %arg5[%c0_94, %c0_95] : memref<64x128xf32, #tpu.memory_space<vmem>>, vector<64x128xf32>
    %c8 = arith.constant 8 : index
    %c0_96 = arith.constant 0 : index
    %c0_97 = arith.constant 0 : index
    %69 = vector.load %arg2[%c8, %c0_96, %c0_97] : memref<25x128x128xbf16, #tpu.memory_space<vmem>>, vector<1x128x128xbf16>
    %70 = vector.shape_cast %69 : vector<1x128x128xbf16> to vector<128x128xbf16>
    %cst_98 = arith.constant dense<0.000000e+00> : vector<64x128xf32>
    %71 = tpu.matmul %67, %70, %cst_98 {dimension_numbers = #tpu.dot_dimension_numbers<[1], [0], [0], [1], [0, 0, 1, 1], [], []>} : vector<64x128xbf16>, vector<128x128xbf16>, vector<64x128xf32> -> vector<64x128xf32>
    %72 = arith.addf %68, %71 : vector<64x128xf32>
    %c0_99 = arith.constant 0 : index
    %c0_100 = arith.constant 0 : index
    %73 = vector.load %arg5[%c0_99, %c0_100] : memref<64x128xf32, #tpu.memory_space<vmem>>, vector<64x128xf32>
    tpu.vector_store %arg5[%c0_99, %c0_100], %72 {strides = array<i32>} : memref<64x128xf32, #tpu.memory_space<vmem>>, vector<64x128xf32>,
    %c0_101 = arith.constant 0 : index
    %c1_102 = arith.constant 1 : index
    %c4_103 = arith.constant 4 : index
    %c0_104 = arith.constant 0 : index
    %74 = vector.load %arg1[%c0_101, %c1_102, %c4_103, %c0_104] : memref<1x12x12x128xbf16, #tpu.memory_space<vmem>>, vector<1x8x8x128xbf16>
    %75 = vector.shape_cast %74 : vector<1x8x8x128xbf16> to vector<64x128xbf16>
    %c0_105 = arith.constant 0 : index
    %c0_106 = arith.constant 0 : index
    %76 = vector.load %arg5[%c0_105, %c0_106] : memref<64x128xf32, #tpu.memory_space<vmem>>, vector<64x128xf32>
    %c9 = arith.constant 9 : index
    %c0_107 = arith.constant 0 : index
    %c0_108 = arith.constant 0 : index
    %77 = vector.load %arg2[%c9, %c0_107, %c0_108] : memref<25x128x128xbf16, #tpu.memory_space<vmem>>, vector<1x128x128xbf16>
    %78 = vector.shape_cast %77 : vector<1x128x128xbf16> to vector<128x128xbf16>
    %cst_109 = arith.constant dense<0.000000e+00> : vector<64x128xf32>
    %79 = tpu.matmul %75, %78, %cst_109 {dimension_numbers = #tpu.dot_dimension_numbers<[1], [0], [0], [1], [0, 0, 1, 1], [], []>} : vector<64x128xbf16>, vector<128x128xbf16>, vector<64x128xf32> -> vector<64x128xf32>
    %80 = arith.addf %76, %79 : vector<64x128xf32>
    %c0_110 = arith.constant 0 : index
    %c0_111 = arith.constant 0 : index
    %81 = vector.load %arg5[%c0_110, %c0_111] : memref<64x128xf32, #tpu.memory_space<vmem>>, vector<64x128xf32>
    tpu.vector_store %arg5[%c0_110, %c0_111], %80 {strides = array<i32>} : memref<64x128xf32, #tpu.memory_space<vmem>>, vector<64x128xf32>,
    %c0_112 = arith.constant 0 : index
    %c2_113 = arith.constant 2 : index
    %c0_114 = arith.constant 0 : index
    %c0_115 = arith.constant 0 : index
    %82 = vector.load %arg1[%c0_112, %c2_113, %c0_114, %c0_115] : memref<1x12x12x128xbf16, #tpu.memory_space<vmem>>, vector<1x8x8x128xbf16>
    %83 = vector.shape_cast %82 : vector<1x8x8x128xbf16> to vector<64x128xbf16>
    %c0_116 = arith.constant 0 : index
    %c0_117 = arith.constant 0 : index
    %84 = vector.load %arg5[%c0_116, %c0_117] : memref<64x128xf32, #tpu.memory_space<vmem>>, vector<64x128xf32>
    %c10 = arith.constant 10 : index
    %c0_118 = arith.constant 0 : index
    %c0_119 = arith.constant 0 : index
    %85 = vector.load %arg2[%c10, %c0_118, %c0_119] : memref<25x128x128xbf16, #tpu.memory_space<vmem>>, vector<1x128x128xbf16>
    %86 = vector.shape_cast %85 : vector<1x128x128xbf16> to vector<128x128xbf16>
    %cst_120 = arith.constant dense<0.000000e+00> : vector<64x128xf32>
    %87 = tpu.matmul %83, %86, %cst_120 {dimension_numbers = #tpu.dot_dimension_numbers<[1], [0], [0], [1], [0, 0, 1, 1], [], []>} : vector<64x128xbf16>, vector<128x128xbf16>, vector<64x128xf32> -> vector<64x128xf32>
    %88 = arith.addf %84, %87 : vector<64x128xf32>
    %c0_121 = arith.constant 0 : index
    %c0_122 = arith.constant 0 : index
    %89 = vector.load %arg5[%c0_121, %c0_122] : memref<64x128xf32, #tpu.memory_space<vmem>>, vector<64x128xf32>
    tpu.vector_store %arg5[%c0_121, %c0_122], %88 {strides = array<i32>} : memref<64x128xf32, #tpu.memory_space<vmem>>, vector<64x128xf32>,
    %c0_123 = arith.constant 0 : index
    %c2_124 = arith.constant 2 : index
    %c1_125 = arith.constant 1 : index
    %c0_126 = arith.constant 0 : index
    %90 = vector.load %arg1[%c0_123, %c2_124, %c1_125, %c0_126] : memref<1x12x12x128xbf16, #tpu.memory_space<vmem>>, vector<1x8x8x128xbf16>
    %91 = vector.shape_cast %90 : vector<1x8x8x128xbf16> to vector<64x128xbf16>
    %c0_127 = arith.constant 0 : index
    %c0_128 = arith.constant 0 : index
    %92 = vector.load %arg5[%c0_127, %c0_128] : memref<64x128xf32, #tpu.memory_space<vmem>>, vector<64x128xf32>
    %c11 = arith.constant 11 : index
    %c0_129 = arith.constant 0 : index
    %c0_130 = arith.constant 0 : index
    %93 = vector.load %arg2[%c11, %c0_129, %c0_130] : memref<25x128x128xbf16, #tpu.memory_space<vmem>>, vector<1x128x128xbf16>
    %94 = vector.shape_cast %93 : vector<1x128x128xbf16> to vector<128x128xbf16>
    %cst_131 = arith.constant dense<0.000000e+00> : vector<64x128xf32>
    %95 = tpu.matmul %91, %94, %cst_131 {dimension_numbers = #tpu.dot_dimension_numbers<[1], [0], [0], [1], [0, 0, 1, 1], [], []>} : vector<64x128xbf16>, vector<128x128xbf16>, vector<64x128xf32> -> vector<64x128xf32>
    %96 = arith.addf %92, %95 : vector<64x128xf32>
    %c0_132 = arith.constant 0 : index
    %c0_133 = arith.constant 0 : index
    %97 = vector.load %arg5[%c0_132, %c0_133] : memref<64x128xf32, #tpu.memory_space<vmem>>, vector<64x128xf32>
    tpu.vector_store %arg5[%c0_132, %c0_133], %96 {strides = array<i32>} : memref<64x128xf32, #tpu.memory_space<vmem>>, vector<64x128xf32>,
    %c0_134 = arith.constant 0 : index
    %c2_135 = arith.constant 2 : index
    %c2_136 = arith.constant 2 : index
    %c0_137 = arith.constant 0 : index
    %98 = vector.load %arg1[%c0_134, %c2_135, %c2_136, %c0_137] : memref<1x12x12x128xbf16, #tpu.memory_space<vmem>>, vector<1x8x8x128xbf16>
    %99 = vector.shape_cast %98 : vector<1x8x8x128xbf16> to vector<64x128xbf16>
    %c0_138 = arith.constant 0 : index
    %c0_139 = arith.constant 0 : index
    %100 = vector.load %arg5[%c0_138, %c0_139] : memref<64x128xf32, #tpu.memory_space<vmem>>, vector<64x128xf32>
    %c12 = arith.constant 12 : index
    %c0_140 = arith.constant 0 : index
    %c0_141 = arith.constant 0 : index
    %101 = vector.load %arg2[%c12, %c0_140, %c0_141] : memref<25x128x128xbf16, #tpu.memory_space<vmem>>, vector<1x128x128xbf16>
    %102 = vector.shape_cast %101 : vector<1x128x128xbf16> to vector<128x128xbf16>
    %cst_142 = arith.constant dense<0.000000e+00> : vector<64x128xf32>
    %103 = tpu.matmul %99, %102, %cst_142 {dimension_numbers = #tpu.dot_dimension_numbers<[1], [0], [0], [1], [0, 0, 1, 1], [], []>} : vector<64x128xbf16>, vector<128x128xbf16>, vector<64x128xf32> -> vector<64x128xf32>
    %104 = arith.addf %100, %103 : vector<64x128xf32>
    %c0_143 = arith.constant 0 : index
    %c0_144 = arith.constant 0 : index
    %105 = vector.load %arg5[%c0_143, %c0_144] : memref<64x128xf32, #tpu.memory_space<vmem>>, vector<64x128xf32>
    tpu.vector_store %arg5[%c0_143, %c0_144], %104 {strides = array<i32>} : memref<64x128xf32, #tpu.memory_space<vmem>>, vector<64x128xf32>,
    %c0_145 = arith.constant 0 : index
    %c2_146 = arith.constant 2 : index
    %c3_147 = arith.constant 3 : index
    %c0_148 = arith.constant 0 : index
    %106 = vector.load %arg1[%c0_145, %c2_146, %c3_147, %c0_148] : memref<1x12x12x128xbf16, #tpu.memory_space<vmem>>, vector<1x8x8x128xbf16>
    %107 = vector.shape_cast %106 : vector<1x8x8x128xbf16> to vector<64x128xbf16>
    %c0_149 = arith.constant 0 : index
    %c0_150 = arith.constant 0 : index
    %108 = vector.load %arg5[%c0_149, %c0_150] : memref<64x128xf32, #tpu.memory_space<vmem>>, vector<64x128xf32>
    %c13 = arith.constant 13 : index
    %c0_151 = arith.constant 0 : index
    %c0_152 = arith.constant 0 : index
    %109 = vector.load %arg2[%c13, %c0_151, %c0_152] : memref<25x128x128xbf16, #tpu.memory_space<vmem>>, vector<1x128x128xbf16>
    %110 = vector.shape_cast %109 : vector<1x128x128xbf16> to vector<128x128xbf16>
    %cst_153 = arith.constant dense<0.000000e+00> : vector<64x128xf32>
    %111 = tpu.matmul %107, %110, %cst_153 {dimension_numbers = #tpu.dot_dimension_numbers<[1], [0], [0], [1], [0, 0, 1, 1], [], []>} : vector<64x128xbf16>, vector<128x128xbf16>, vector<64x128xf32> -> vector<64x128xf32>
    %112 = arith.addf %108, %111 : vector<64x128xf32>
    %c0_154 = arith.constant 0 : index
    %c0_155 = arith.constant 0 : index
    %113 = vector.load %arg5[%c0_154, %c0_155] : memref<64x128xf32, #tpu.memory_space<vmem>>, vector<64x128xf32>
    tpu.vector_store %arg5[%c0_154, %c0_155], %112 {strides = array<i32>} : memref<64x128xf32, #tpu.memory_space<vmem>>, vector<64x128xf32>,
    %c0_156 = arith.constant 0 : index
    %c2_157 = arith.constant 2 : index
    %c4_158 = arith.constant 4 : index
    %c0_159 = arith.constant 0 : index
    %114 = vector.load %arg1[%c0_156, %c2_157, %c4_158, %c0_159] : memref<1x12x12x128xbf16, #tpu.memory_space<vmem>>, vector<1x8x8x128xbf16>
    %115 = vector.shape_cast %114 : vector<1x8x8x128xbf16> to vector<64x128xbf16>
    %c0_160 = arith.constant 0 : index
    %c0_161 = arith.constant 0 : index
    %116 = vector.load %arg5[%c0_160, %c0_161] : memref<64x128xf32, #tpu.memory_space<vmem>>, vector<64x128xf32>
    %c14 = arith.constant 14 : index
    %c0_162 = arith.constant 0 : index
    %c0_163 = arith.constant 0 : index
    %117 = vector.load %arg2[%c14, %c0_162, %c0_163] : memref<25x128x128xbf16, #tpu.memory_space<vmem>>, vector<1x128x128xbf16>
    %118 = vector.shape_cast %117 : vector<1x128x128xbf16> to vector<128x128xbf16>
    %cst_164 = arith.constant dense<0.000000e+00> : vector<64x128xf32>
    %119 = tpu.matmul %115, %118, %cst_164 {dimension_numbers = #tpu.dot_dimension_numbers<[1], [0], [0], [1], [0, 0, 1, 1], [], []>} : vector<64x128xbf16>, vector<128x128xbf16>, vector<64x128xf32> -> vector<64x128xf32>
    %120 = arith.addf %116, %119 : vector<64x128xf32>
    %c0_165 = arith.constant 0 : index
    %c0_166 = arith.constant 0 : index
    %121 = vector.load %arg5[%c0_165, %c0_166] : memref<64x128xf32, #tpu.memory_space<vmem>>, vector<64x128xf32>
    tpu.vector_store %arg5[%c0_165, %c0_166], %120 {strides = array<i32>} : memref<64x128xf32, #tpu.memory_space<vmem>>, vector<64x128xf32>,
    %c0_167 = arith.constant 0 : index
    %c3_168 = arith.constant 3 : index
    %c0_169 = arith.constant 0 : index
    %c0_170 = arith.constant 0 : index
    %122 = vector.load %arg1[%c0_167, %c3_168, %c0_169, %c0_170] : memref<1x12x12x128xbf16, #tpu.memory_space<vmem>>, vector<1x8x8x128xbf16>
    %123 = vector.shape_cast %122 : vector<1x8x8x128xbf16> to vector<64x128xbf16>
    %c0_171 = arith.constant 0 : index
    %c0_172 = arith.constant 0 : index
    %124 = vector.load %arg5[%c0_171, %c0_172] : memref<64x128xf32, #tpu.memory_space<vmem>>, vector<64x128xf32>
    %c15 = arith.constant 15 : index
    %c0_173 = arith.constant 0 : index
    %c0_174 = arith.constant 0 : index
    %125 = vector.load %arg2[%c15, %c0_173, %c0_174] : memref<25x128x128xbf16, #tpu.memory_space<vmem>>, vector<1x128x128xbf16>
    %126 = vector.shape_cast %125 : vector<1x128x128xbf16> to vector<128x128xbf16>
    %cst_175 = arith.constant dense<0.000000e+00> : vector<64x128xf32>
    %127 = tpu.matmul %123, %126, %cst_175 {dimension_numbers = #tpu.dot_dimension_numbers<[1], [0], [0], [1], [0, 0, 1, 1], [], []>} : vector<64x128xbf16>, vector<128x128xbf16>, vector<64x128xf32> -> vector<64x128xf32>
    %128 = arith.addf %124, %127 : vector<64x128xf32>
    %c0_176 = arith.constant 0 : index
    %c0_177 = arith.constant 0 : index
    %129 = vector.load %arg5[%c0_176, %c0_177] : memref<64x128xf32, #tpu.memory_space<vmem>>, vector<64x128xf32>
    tpu.vector_store %arg5[%c0_176, %c0_177], %128 {strides = array<i32>} : memref<64x128xf32, #tpu.memory_space<vmem>>, vector<64x128xf32>,
    %c0_178 = arith.constant 0 : index
    %c3_179 = arith.constant 3 : index
    %c1_180 = arith.constant 1 : index
    %c0_181 = arith.constant 0 : index
    %130 = vector.load %arg1[%c0_178, %c3_179, %c1_180, %c0_181] : memref<1x12x12x128xbf16, #tpu.memory_space<vmem>>, vector<1x8x8x128xbf16>
    %131 = vector.shape_cast %130 : vector<1x8x8x128xbf16> to vector<64x128xbf16>
    %c0_182 = arith.constant 0 : index
    %c0_183 = arith.constant 0 : index
    %132 = vector.load %arg5[%c0_182, %c0_183] : memref<64x128xf32, #tpu.memory_space<vmem>>, vector<64x128xf32>
    %c16 = arith.constant 16 : index
    %c0_184 = arith.constant 0 : index
    %c0_185 = arith.constant 0 : index
    %133 = vector.load %arg2[%c16, %c0_184, %c0_185] : memref<25x128x128xbf16, #tpu.memory_space<vmem>>, vector<1x128x128xbf16>
    %134 = vector.shape_cast %133 : vector<1x128x128xbf16> to vector<128x128xbf16>
    %cst_186 = arith.constant dense<0.000000e+00> : vector<64x128xf32>
    %135 = tpu.matmul %131, %134, %cst_186 {dimension_numbers = #tpu.dot_dimension_numbers<[1], [0], [0], [1], [0, 0, 1, 1], [], []>} : vector<64x128xbf16>, vector<128x128xbf16>, vector<64x128xf32> -> vector<64x128xf32>
    %136 = arith.addf %132, %135 : vector<64x128xf32>
    %c0_187 = arith.constant 0 : index
    %c0_188 = arith.constant 0 : index
    %137 = vector.load %arg5[%c0_187, %c0_188] : memref<64x128xf32, #tpu.memory_space<vmem>>, vector<64x128xf32>
    tpu.vector_store %arg5[%c0_187, %c0_188], %136 {strides = array<i32>} : memref<64x128xf32, #tpu.memory_space<vmem>>, vector<64x128xf32>,
    %c0_189 = arith.constant 0 : index
    %c3_190 = arith.constant 3 : index
    %c2_191 = arith.constant 2 : index
    %c0_192 = arith.constant 0 : index
    %138 = vector.load %arg1[%c0_189, %c3_190, %c2_191, %c0_192] : memref<1x12x12x128xbf16, #tpu.memory_space<vmem>>, vector<1x8x8x128xbf16>
    %139 = vector.shape_cast %138 : vector<1x8x8x128xbf16> to vector<64x128xbf16>
    %c0_193 = arith.constant 0 : index
    %c0_194 = arith.constant 0 : index
    %140 = vector.load %arg5[%c0_193, %c0_194] : memref<64x128xf32, #tpu.memory_space<vmem>>, vector<64x128xf32>
    %c17 = arith.constant 17 : index
    %c0_195 = arith.constant 0 : index
    %c0_196 = arith.constant 0 : index
    %141 = vector.load %arg2[%c17, %c0_195, %c0_196] : memref<25x128x128xbf16, #tpu.memory_space<vmem>>, vector<1x128x128xbf16>
    %142 = vector.shape_cast %141 : vector<1x128x128xbf16> to vector<128x128xbf16>
    %cst_197 = arith.constant dense<0.000000e+00> : vector<64x128xf32>
    %143 = tpu.matmul %139, %142, %cst_197 {dimension_numbers = #tpu.dot_dimension_numbers<[1], [0], [0], [1], [0, 0, 1, 1], [], []>} : vector<64x128xbf16>, vector<128x128xbf16>, vector<64x128xf32> -> vector<64x128xf32>
    %144 = arith.addf %140, %143 : vector<64x128xf32>
    %c0_198 = arith.constant 0 : index
    %c0_199 = arith.constant 0 : index
    %145 = vector.load %arg5[%c0_198, %c0_199] : memref<64x128xf32, #tpu.memory_space<vmem>>, vector<64x128xf32>
    tpu.vector_store %arg5[%c0_198, %c0_199], %144 {strides = array<i32>} : memref<64x128xf32, #tpu.memory_space<vmem>>, vector<64x128xf32>,
    %c0_200 = arith.constant 0 : index
    %c3_201 = arith.constant 3 : index
    %c3_202 = arith.constant 3 : index
    %c0_203 = arith.constant 0 : index
    %146 = vector.load %arg1[%c0_200, %c3_201, %c3_202, %c0_203] : memref<1x12x12x128xbf16, #tpu.memory_space<vmem>>, vector<1x8x8x128xbf16>
    %147 = vector.shape_cast %146 : vector<1x8x8x128xbf16> to vector<64x128xbf16>
    %c0_204 = arith.constant 0 : index
    %c0_205 = arith.constant 0 : index
    %148 = vector.load %arg5[%c0_204, %c0_205] : memref<64x128xf32, #tpu.memory_space<vmem>>, vector<64x128xf32>
    %c18 = arith.constant 18 : index
    %c0_206 = arith.constant 0 : index
    %c0_207 = arith.constant 0 : index
    %149 = vector.load %arg2[%c18, %c0_206, %c0_207] : memref<25x128x128xbf16, #tpu.memory_space<vmem>>, vector<1x128x128xbf16>
    %150 = vector.shape_cast %149 : vector<1x128x128xbf16> to vector<128x128xbf16>
    %cst_208 = arith.constant dense<0.000000e+00> : vector<64x128xf32>
    %151 = tpu.matmul %147, %150, %cst_208 {dimension_numbers = #tpu.dot_dimension_numbers<[1], [0], [0], [1], [0, 0, 1, 1], [], []>} : vector<64x128xbf16>, vector<128x128xbf16>, vector<64x128xf32> -> vector<64x128xf32>
    %152 = arith.addf %148, %151 : vector<64x128xf32>
    %c0_209 = arith.constant 0 : index
    %c0_210 = arith.constant 0 : index
    %153 = vector.load %arg5[%c0_209, %c0_210] : memref<64x128xf32, #tpu.memory_space<vmem>>, vector<64x128xf32>
    tpu.vector_store %arg5[%c0_209, %c0_210], %152 {strides = array<i32>} : memref<64x128xf32, #tpu.memory_space<vmem>>, vector<64x128xf32>,
    %c0_211 = arith.constant 0 : index
    %c3_212 = arith.constant 3 : index
    %c4_213 = arith.constant 4 : index
    %c0_214 = arith.constant 0 : index
    %154 = vector.load %arg1[%c0_211, %c3_212, %c4_213, %c0_214] : memref<1x12x12x128xbf16, #tpu.memory_space<vmem>>, vector<1x8x8x128xbf16>
    %155 = vector.shape_cast %154 : vector<1x8x8x128xbf16> to vector<64x128xbf16>
    %c0_215 = arith.constant 0 : index
    %c0_216 = arith.constant 0 : index
    %156 = vector.load %arg5[%c0_215, %c0_216] : memref<64x128xf32, #tpu.memory_space<vmem>>, vector<64x128xf32>
    %c19 = arith.constant 19 : index
    %c0_217 = arith.constant 0 : index
    %c0_218 = arith.constant 0 : index
    %157 = vector.load %arg2[%c19, %c0_217, %c0_218] : memref<25x128x128xbf16, #tpu.memory_space<vmem>>, vector<1x128x128xbf16>
    %158 = vector.shape_cast %157 : vector<1x128x128xbf16> to vector<128x128xbf16>
    %cst_219 = arith.constant dense<0.000000e+00> : vector<64x128xf32>
    %159 = tpu.matmul %155, %158, %cst_219 {dimension_numbers = #tpu.dot_dimension_numbers<[1], [0], [0], [1], [0, 0, 1, 1], [], []>} : vector<64x128xbf16>, vector<128x128xbf16>, vector<64x128xf32> -> vector<64x128xf32>
    %160 = arith.addf %156, %159 : vector<64x128xf32>
    %c0_220 = arith.constant 0 : index
    %c0_221 = arith.constant 0 : index
    %161 = vector.load %arg5[%c0_220, %c0_221] : memref<64x128xf32, #tpu.memory_space<vmem>>, vector<64x128xf32>
    tpu.vector_store %arg5[%c0_220, %c0_221], %160 {strides = array<i32>} : memref<64x128xf32, #tpu.memory_space<vmem>>, vector<64x128xf32>,
    %c0_222 = arith.constant 0 : index
    %c4_223 = arith.constant 4 : index
    %c0_224 = arith.constant 0 : index
    %c0_225 = arith.constant 0 : index
    %162 = vector.load %arg1[%c0_222, %c4_223, %c0_224, %c0_225] : memref<1x12x12x128xbf16, #tpu.memory_space<vmem>>, vector<1x8x8x128xbf16>
    %163 = vector.shape_cast %162 : vector<1x8x8x128xbf16> to vector<64x128xbf16>
    %c0_226 = arith.constant 0 : index
    %c0_227 = arith.constant 0 : index
    %164 = vector.load %arg5[%c0_226, %c0_227] : memref<64x128xf32, #tpu.memory_space<vmem>>, vector<64x128xf32>
    %c20 = arith.constant 20 : index
    %c0_228 = arith.constant 0 : index
    %c0_229 = arith.constant 0 : index
    %165 = vector.load %arg2[%c20, %c0_228, %c0_229] : memref<25x128x128xbf16, #tpu.memory_space<vmem>>, vector<1x128x128xbf16>
    %166 = vector.shape_cast %165 : vector<1x128x128xbf16> to vector<128x128xbf16>
    %cst_230 = arith.constant dense<0.000000e+00> : vector<64x128xf32>
    %167 = tpu.matmul %163, %166, %cst_230 {dimension_numbers = #tpu.dot_dimension_numbers<[1], [0], [0], [1], [0, 0, 1, 1], [], []>} : vector<64x128xbf16>, vector<128x128xbf16>, vector<64x128xf32> -> vector<64x128xf32>
    %168 = arith.addf %164, %167 : vector<64x128xf32>
    %c0_231 = arith.constant 0 : index
    %c0_232 = arith.constant 0 : index
    %169 = vector.load %arg5[%c0_231, %c0_232] : memref<64x128xf32, #tpu.memory_space<vmem>>, vector<64x128xf32>
    tpu.vector_store %arg5[%c0_231, %c0_232], %168 {strides = array<i32>} : memref<64x128xf32, #tpu.memory_space<vmem>>, vector<64x128xf32>,
    %c0_233 = arith.constant 0 : index
    %c4_234 = arith.constant 4 : index
    %c1_235 = arith.constant 1 : index
    %c0_236 = arith.constant 0 : index
    %170 = vector.load %arg1[%c0_233, %c4_234, %c1_235, %c0_236] : memref<1x12x12x128xbf16, #tpu.memory_space<vmem>>, vector<1x8x8x128xbf16>
    %171 = vector.shape_cast %170 : vector<1x8x8x128xbf16> to vector<64x128xbf16>
    %c0_237 = arith.constant 0 : index
    %c0_238 = arith.constant 0 : index
    %172 = vector.load %arg5[%c0_237, %c0_238] : memref<64x128xf32, #tpu.memory_space<vmem>>, vector<64x128xf32>
    %c21 = arith.constant 21 : index
    %c0_239 = arith.constant 0 : index
    %c0_240 = arith.constant 0 : index
    %173 = vector.load %arg2[%c21, %c0_239, %c0_240] : memref<25x128x128xbf16, #tpu.memory_space<vmem>>, vector<1x128x128xbf16>
    %174 = vector.shape_cast %173 : vector<1x128x128xbf16> to vector<128x128xbf16>
    %cst_241 = arith.constant dense<0.000000e+00> : vector<64x128xf32>
    %175 = tpu.matmul %171, %174, %cst_241 {dimension_numbers = #tpu.dot_dimension_numbers<[1], [0], [0], [1], [0, 0, 1, 1], [], []>} : vector<64x128xbf16>, vector<128x128xbf16>, vector<64x128xf32> -> vector<64x128xf32>
    %176 = arith.addf %172, %175 : vector<64x128xf32>
    %c0_242 = arith.constant 0 : index
    %c0_243 = arith.constant 0 : index
    %177 = vector.load %arg5[%c0_242, %c0_243] : memref<64x128xf32, #tpu.memory_space<vmem>>, vector<64x128xf32>
    tpu.vector_store %arg5[%c0_242, %c0_243], %176 {strides = array<i32>} : memref<64x128xf32, #tpu.memory_space<vmem>>, vector<64x128xf32>,
    %c0_244 = arith.constant 0 : index
    %c4_245 = arith.constant 4 : index
    %c2_246 = arith.constant 2 : index
    %c0_247 = arith.constant 0 : index
    %178 = vector.load %arg1[%c0_244, %c4_245, %c2_246, %c0_247] : memref<1x12x12x128xbf16, #tpu.memory_space<vmem>>, vector<1x8x8x128xbf16>
    %179 = vector.shape_cast %178 : vector<1x8x8x128xbf16> to vector<64x128xbf16>
    %c0_248 = arith.constant 0 : index
    %c0_249 = arith.constant 0 : index
    %180 = vector.load %arg5[%c0_248, %c0_249] : memref<64x128xf32, #tpu.memory_space<vmem>>, vector<64x128xf32>
    %c22 = arith.constant 22 : index
    %c0_250 = arith.constant 0 : index
    %c0_251 = arith.constant 0 : index
    %181 = vector.load %arg2[%c22, %c0_250, %c0_251] : memref<25x128x128xbf16, #tpu.memory_space<vmem>>, vector<1x128x128xbf16>
    %182 = vector.shape_cast %181 : vector<1x128x128xbf16> to vector<128x128xbf16>
    %cst_252 = arith.constant dense<0.000000e+00> : vector<64x128xf32>
    %183 = tpu.matmul %179, %182, %cst_252 {dimension_numbers = #tpu.dot_dimension_numbers<[1], [0], [0], [1], [0, 0, 1, 1], [], []>} : vector<64x128xbf16>, vector<128x128xbf16>, vector<64x128xf32> -> vector<64x128xf32>
    %184 = arith.addf %180, %183 : vector<64x128xf32>
    %c0_253 = arith.constant 0 : index
    %c0_254 = arith.constant 0 : index
    %185 = vector.load %arg5[%c0_253, %c0_254] : memref<64x128xf32, #tpu.memory_space<vmem>>, vector<64x128xf32>
    tpu.vector_store %arg5[%c0_253, %c0_254], %184 {strides = array<i32>} : memref<64x128xf32, #tpu.memory_space<vmem>>, vector<64x128xf32>,
    %c0_255 = arith.constant 0 : index
    %c4_256 = arith.constant 4 : index
    %c3_257 = arith.constant 3 : index
    %c0_258 = arith.constant 0 : index
    %186 = vector.load %arg1[%c0_255, %c4_256, %c3_257, %c0_258] : memref<1x12x12x128xbf16, #tpu.memory_space<vmem>>, vector<1x8x8x128xbf16>
    %187 = vector.shape_cast %186 : vector<1x8x8x128xbf16> to vector<64x128xbf16>
    %c0_259 = arith.constant 0 : index
    %c0_260 = arith.constant 0 : index
    %188 = vector.load %arg5[%c0_259, %c0_260] : memref<64x128xf32, #tpu.memory_space<vmem>>, vector<64x128xf32>
    %c23 = arith.constant 23 : index
    %c0_261 = arith.constant 0 : index
    %c0_262 = arith.constant 0 : index
    %189 = vector.load %arg2[%c23, %c0_261, %c0_262] : memref<25x128x128xbf16, #tpu.memory_space<vmem>>, vector<1x128x128xbf16>
    %190 = vector.shape_cast %189 : vector<1x128x128xbf16> to vector<128x128xbf16>
    %cst_263 = arith.constant dense<0.000000e+00> : vector<64x128xf32>
    %191 = tpu.matmul %187, %190, %cst_263 {dimension_numbers = #tpu.dot_dimension_numbers<[1], [0], [0], [1], [0, 0, 1, 1], [], []>} : vector<64x128xbf16>, vector<128x128xbf16>, vector<64x128xf32> -> vector<64x128xf32>
    %192 = arith.addf %188, %191 : vector<64x128xf32>
    %c0_264 = arith.constant 0 : index
    %c0_265 = arith.constant 0 : index
    %193 = vector.load %arg5[%c0_264, %c0_265] : memref<64x128xf32, #tpu.memory_space<vmem>>, vector<64x128xf32>
    tpu.vector_store %arg5[%c0_264, %c0_265], %192 {strides = array<i32>} : memref<64x128xf32, #tpu.memory_space<vmem>>, vector<64x128xf32>,
    %c0_266 = arith.constant 0 : index
    %c4_267 = arith.constant 4 : index
    %c4_268 = arith.constant 4 : index
    %c0_269 = arith.constant 0 : index
    %194 = vector.load %arg1[%c0_266, %c4_267, %c4_268, %c0_269] : memref<1x12x12x128xbf16, #tpu.memory_space<vmem>>, vector<1x8x8x128xbf16>
    %195 = vector.shape_cast %194 : vector<1x8x8x128xbf16> to vector<64x128xbf16>
    %c0_270 = arith.constant 0 : index
    %c0_271 = arith.constant 0 : index
    %196 = vector.load %arg5[%c0_270, %c0_271] : memref<64x128xf32, #tpu.memory_space<vmem>>, vector<64x128xf32>
    %c24 = arith.constant 24 : index
    %c0_272 = arith.constant 0 : index
    %c0_273 = arith.constant 0 : index
    %197 = vector.load %arg2[%c24, %c0_272, %c0_273] : memref<25x128x128xbf16, #tpu.memory_space<vmem>>, vector<1x128x128xbf16>
    %198 = vector.shape_cast %197 : vector<1x128x128xbf16> to vector<128x128xbf16>
    %cst_274 = arith.constant dense<0.000000e+00> : vector<64x128xf32>
    %199 = tpu.matmul %195, %198, %cst_274 {dimension_numbers = #tpu.dot_dimension_numbers<[1], [0], [0], [1], [0, 0, 1, 1], [], []>} : vector<64x128xbf16>, vector<128x128xbf16>, vector<64x128xf32> -> vector<64x128xf32>
    %200 = arith.addf %196, %199 : vector<64x128xf32>
    %c0_275 = arith.constant 0 : index
    %c0_276 = arith.constant 0 : index
    %201 = vector.load %arg5[%c0_275, %c0_276] : memref<64x128xf32, #tpu.memory_space<vmem>>, vector<64x128xf32>
    tpu.vector_store %arg5[%c0_275, %c0_276], %200 {strides = array<i32>} : memref<64x128xf32, #tpu.memory_space<vmem>>, vector<64x128xf32>,
    %c0_277 = arith.constant 0 : index
    %c0_278 = arith.constant 0 : index
    %202 = vector.load %arg5[%c0_277, %c0_278] : memref<64x128xf32, #tpu.memory_space<vmem>>, vector<64x128xf32>
    %c0_279 = arith.constant 0 : index
    %c0_280 = arith.constant 0 : index
    %203 = vector.load %arg3[%c0_279, %c0_280] : memref<1x128xf32, #tpu.memory_space<vmem>>, vector<1x128xf32>
    %204 = vector.broadcast %203 : vector<1x128xf32> to vector<64x128xf32>
    %205 = arith.addf %202, %204 : vector<64x128xf32>
    %206 = arith.truncf %205 : vector<64x128xf32> to vector<64x128xbf16>
    %c0_281 = arith.constant 0 : index
    %c0_282 = arith.constant 0 : index
    %207 = vector.load %arg4[%c0_281, %c0_282] : memref<64x128xbf16, #tpu.memory_space<vmem>>, vector<64x128xbf16>
    tpu.vector_store %arg4[%c0_281, %c0_282], %206 {strides = array<i32>} : memref<64x128xbf16, #tpu.memory_space<vmem>>, vector<64x128xbf16>,
    return
  }
  func.func @transform_0(%arg0: i32) -> (i32, i32, i32, i32) {
    %c0_i32 = arith.constant 0 : i32
    %c0_i32_0 = arith.constant 0 : i32
    %c0_i32_1 = arith.constant 0 : i32
    %c0_i32_2 = arith.constant 0 : i32
    return %arg0, %c0_i32, %c0_i32_0, %c0_i32_1 : i32, i32, i32, i32
  }
  func.func @transform_1(%arg0: i32) -> (i32, i32, i32) {
    %c0_i32 = arith.constant 0 : i32
    %c0_i32_0 = arith.constant 0 : i32
    %c0_i32_1 = arith.constant 0 : i32
    %c0_i32_2 = arith.constant 0 : i32
    return %c0_i32, %c0_i32_0, %c0_i32_1 : i32, i32, i32
  }
  func.func @transform_2(%arg0: i32) -> (i32, i32) {
    %c0_i32 = arith.constant 0 : i32
    %c0_i32_0 = arith.constant 0 : i32
    %c0_i32_1 = arith.constant 0 : i32
    return %c0_i32, %c0_i32_0 : i32, i32
  }
  func.func @transform_3(%arg0: i32) -> (i32, i32) {
    %c0_i32 = arith.constant 0 : i32
    %c0_i32_0 = arith.constant 0 : i32
    return %arg0, %c0_i32 : i32, i32
  }
}

module attributes {stable_mosaic.version = 11 : i64} {
  func.func @_fc_head_kernel(%arg0: i32, %arg1: memref<2x8192xbf16, #tpu.memory_space<vmem>>, %arg2: memref<2048x128xbf16, #tpu.memory_space<vmem>>, %arg3: memref<1x128xf32, #tpu.memory_space<vmem>>, %arg4: memref<128x128xbf16, #tpu.memory_space<vmem>>, %arg5: memref<1x128xf32, #tpu.memory_space<vmem>>, %arg6: memref<2x128xf32, #tpu.memory_space<vmem>>) attributes {dimension_semantics = [#tpu.dimension_semantics<parallel>], iteration_bounds = array<i64: 1>, scalar_prefetch = 0 : i64, scratch_operands = 0 : i64, tpu.core_type = #tpu.core_type<tc>, window_params = [{transform_indices = @transform_0, window_bounds = array<i64: 2, 8192>}, {pipeline_mode = #tpu.pipeline_mode<synchronous>, transform_indices = @transform_1, window_bounds = array<i64: 2048, 128>}, {pipeline_mode = #tpu.pipeline_mode<synchronous>, transform_indices = @transform_2, window_bounds = array<i64: 1, 128>}, {pipeline_mode = #tpu.pipeline_mode<synchronous>, transform_indices = @transform_3, window_bounds = array<i64: 128, 128>}, {pipeline_mode = #tpu.pipeline_mode<synchronous>, transform_indices = @transform_4, window_bounds = array<i64: 1, 128>}, {transform_indices = @transform_5, window_bounds = array<i64: 2, 128>}]} {
    %c0 = arith.constant 0 : index
    %c0_0 = arith.constant 0 : index
    %0 = vector.load %arg1[%c0, %c0_0] : memref<2x8192xbf16, #tpu.memory_space<vmem>>, vector<2x8192xbf16>
    %1 = vector.extract_strided_slice %0 {offsets = [0, 0], sizes = [2, 128], strides = [1, 1]} : vector<2x8192xbf16> to vector<2x128xbf16>
    %2 = vector.extract_strided_slice %0 {offsets = [0, 128], sizes = [2, 128], strides = [1, 1]} : vector<2x8192xbf16> to vector<2x128xbf16>
    %3 = arith.maximumf %1, %2 : vector<2x128xbf16>
    %4 = vector.extract_strided_slice %0 {offsets = [0, 1024], sizes = [2, 128], strides = [1, 1]} : vector<2x8192xbf16> to vector<2x128xbf16>
    %5 = vector.extract_strided_slice %0 {offsets = [0, 1152], sizes = [2, 128], strides = [1, 1]} : vector<2x8192xbf16> to vector<2x128xbf16>
    %6 = arith.maximumf %4, %5 : vector<2x128xbf16>
    %7 = arith.maximumf %3, %6 : vector<2x128xbf16>
    %8 = vector.extract_strided_slice %0 {offsets = [0, 256], sizes = [2, 128], strides = [1, 1]} : vector<2x8192xbf16> to vector<2x128xbf16>
    %9 = vector.extract_strided_slice %0 {offsets = [0, 384], sizes = [2, 128], strides = [1, 1]} : vector<2x8192xbf16> to vector<2x128xbf16>
    %10 = arith.maximumf %8, %9 : vector<2x128xbf16>
    %11 = vector.extract_strided_slice %0 {offsets = [0, 1280], sizes = [2, 128], strides = [1, 1]} : vector<2x8192xbf16> to vector<2x128xbf16>
    %12 = vector.extract_strided_slice %0 {offsets = [0, 1408], sizes = [2, 128], strides = [1, 1]} : vector<2x8192xbf16> to vector<2x128xbf16>
    %13 = arith.maximumf %11, %12 : vector<2x128xbf16>
    %14 = arith.maximumf %10, %13 : vector<2x128xbf16>
    %15 = vector.extract_strided_slice %0 {offsets = [0, 512], sizes = [2, 128], strides = [1, 1]} : vector<2x8192xbf16> to vector<2x128xbf16>
    %16 = vector.extract_strided_slice %0 {offsets = [0, 640], sizes = [2, 128], strides = [1, 1]} : vector<2x8192xbf16> to vector<2x128xbf16>
    %17 = arith.maximumf %15, %16 : vector<2x128xbf16>
    %18 = vector.extract_strided_slice %0 {offsets = [0, 1536], sizes = [2, 128], strides = [1, 1]} : vector<2x8192xbf16> to vector<2x128xbf16>
    %19 = vector.extract_strided_slice %0 {offsets = [0, 1664], sizes = [2, 128], strides = [1, 1]} : vector<2x8192xbf16> to vector<2x128xbf16>
    %20 = arith.maximumf %18, %19 : vector<2x128xbf16>
    %21 = arith.maximumf %17, %20 : vector<2x128xbf16>
    %22 = vector.extract_strided_slice %0 {offsets = [0, 768], sizes = [2, 128], strides = [1, 1]} : vector<2x8192xbf16> to vector<2x128xbf16>
    %23 = vector.extract_strided_slice %0 {offsets = [0, 896], sizes = [2, 128], strides = [1, 1]} : vector<2x8192xbf16> to vector<2x128xbf16>
    %24 = arith.maximumf %22, %23 : vector<2x128xbf16>
    %25 = vector.extract_strided_slice %0 {offsets = [0, 1792], sizes = [2, 128], strides = [1, 1]} : vector<2x8192xbf16> to vector<2x128xbf16>
    %26 = vector.extract_strided_slice %0 {offsets = [0, 1920], sizes = [2, 128], strides = [1, 1]} : vector<2x8192xbf16> to vector<2x128xbf16>
    %27 = arith.maximumf %25, %26 : vector<2x128xbf16>
    %28 = arith.maximumf %24, %27 : vector<2x128xbf16>
    %29 = vector.extract_strided_slice %0 {offsets = [0, 2048], sizes = [2, 128], strides = [1, 1]} : vector<2x8192xbf16> to vector<2x128xbf16>
    %30 = vector.extract_strided_slice %0 {offsets = [0, 2176], sizes = [2, 128], strides = [1, 1]} : vector<2x8192xbf16> to vector<2x128xbf16>
    %31 = arith.maximumf %29, %30 : vector<2x128xbf16>
    %32 = vector.extract_strided_slice %0 {offsets = [0, 3072], sizes = [2, 128], strides = [1, 1]} : vector<2x8192xbf16> to vector<2x128xbf16>
    %33 = vector.extract_strided_slice %0 {offsets = [0, 3200], sizes = [2, 128], strides = [1, 1]} : vector<2x8192xbf16> to vector<2x128xbf16>
    %34 = arith.maximumf %32, %33 : vector<2x128xbf16>
    %35 = arith.maximumf %31, %34 : vector<2x128xbf16>
    %36 = vector.extract_strided_slice %0 {offsets = [0, 2304], sizes = [2, 128], strides = [1, 1]} : vector<2x8192xbf16> to vector<2x128xbf16>
    %37 = vector.extract_strided_slice %0 {offsets = [0, 2432], sizes = [2, 128], strides = [1, 1]} : vector<2x8192xbf16> to vector<2x128xbf16>
    %38 = arith.maximumf %36, %37 : vector<2x128xbf16>
    %39 = vector.extract_strided_slice %0 {offsets = [0, 3328], sizes = [2, 128], strides = [1, 1]} : vector<2x8192xbf16> to vector<2x128xbf16>
    %40 = vector.extract_strided_slice %0 {offsets = [0, 3456], sizes = [2, 128], strides = [1, 1]} : vector<2x8192xbf16> to vector<2x128xbf16>
    %41 = arith.maximumf %39, %40 : vector<2x128xbf16>
    %42 = arith.maximumf %38, %41 : vector<2x128xbf16>
    %43 = vector.extract_strided_slice %0 {offsets = [0, 2560], sizes = [2, 128], strides = [1, 1]} : vector<2x8192xbf16> to vector<2x128xbf16>
    %44 = vector.extract_strided_slice %0 {offsets = [0, 2688], sizes = [2, 128], strides = [1, 1]} : vector<2x8192xbf16> to vector<2x128xbf16>
    %45 = arith.maximumf %43, %44 : vector<2x128xbf16>
    %46 = vector.extract_strided_slice %0 {offsets = [0, 3584], sizes = [2, 128], strides = [1, 1]} : vector<2x8192xbf16> to vector<2x128xbf16>
    %47 = vector.extract_strided_slice %0 {offsets = [0, 3712], sizes = [2, 128], strides = [1, 1]} : vector<2x8192xbf16> to vector<2x128xbf16>
    %48 = arith.maximumf %46, %47 : vector<2x128xbf16>
    %49 = arith.maximumf %45, %48 : vector<2x128xbf16>
    %50 = vector.extract_strided_slice %0 {offsets = [0, 2816], sizes = [2, 128], strides = [1, 1]} : vector<2x8192xbf16> to vector<2x128xbf16>
    %51 = vector.extract_strided_slice %0 {offsets = [0, 2944], sizes = [2, 128], strides = [1, 1]} : vector<2x8192xbf16> to vector<2x128xbf16>
    %52 = arith.maximumf %50, %51 : vector<2x128xbf16>
    %53 = vector.extract_strided_slice %0 {offsets = [0, 3840], sizes = [2, 128], strides = [1, 1]} : vector<2x8192xbf16> to vector<2x128xbf16>
    %54 = vector.extract_strided_slice %0 {offsets = [0, 3968], sizes = [2, 128], strides = [1, 1]} : vector<2x8192xbf16> to vector<2x128xbf16>
    %55 = arith.maximumf %53, %54 : vector<2x128xbf16>
    %56 = arith.maximumf %52, %55 : vector<2x128xbf16>
    %57 = vector.extract_strided_slice %0 {offsets = [0, 4096], sizes = [2, 128], strides = [1, 1]} : vector<2x8192xbf16> to vector<2x128xbf16>
    %58 = vector.extract_strided_slice %0 {offsets = [0, 4224], sizes = [2, 128], strides = [1, 1]} : vector<2x8192xbf16> to vector<2x128xbf16>
    %59 = arith.maximumf %57, %58 : vector<2x128xbf16>
    %60 = vector.extract_strided_slice %0 {offsets = [0, 5120], sizes = [2, 128], strides = [1, 1]} : vector<2x8192xbf16> to vector<2x128xbf16>
    %61 = vector.extract_strided_slice %0 {offsets = [0, 5248], sizes = [2, 128], strides = [1, 1]} : vector<2x8192xbf16> to vector<2x128xbf16>
    %62 = arith.maximumf %60, %61 : vector<2x128xbf16>
    %63 = arith.maximumf %59, %62 : vector<2x128xbf16>
    %64 = vector.extract_strided_slice %0 {offsets = [0, 4352], sizes = [2, 128], strides = [1, 1]} : vector<2x8192xbf16> to vector<2x128xbf16>
    %65 = vector.extract_strided_slice %0 {offsets = [0, 4480], sizes = [2, 128], strides = [1, 1]} : vector<2x8192xbf16> to vector<2x128xbf16>
    %66 = arith.maximumf %64, %65 : vector<2x128xbf16>
    %67 = vector.extract_strided_slice %0 {offsets = [0, 5376], sizes = [2, 128], strides = [1, 1]} : vector<2x8192xbf16> to vector<2x128xbf16>
    %68 = vector.extract_strided_slice %0 {offsets = [0, 5504], sizes = [2, 128], strides = [1, 1]} : vector<2x8192xbf16> to vector<2x128xbf16>
    %69 = arith.maximumf %67, %68 : vector<2x128xbf16>
    %70 = arith.maximumf %66, %69 : vector<2x128xbf16>
    %71 = vector.extract_strided_slice %0 {offsets = [0, 4608], sizes = [2, 128], strides = [1, 1]} : vector<2x8192xbf16> to vector<2x128xbf16>
    %72 = vector.extract_strided_slice %0 {offsets = [0, 4736], sizes = [2, 128], strides = [1, 1]} : vector<2x8192xbf16> to vector<2x128xbf16>
    %73 = arith.maximumf %71, %72 : vector<2x128xbf16>
    %74 = vector.extract_strided_slice %0 {offsets = [0, 5632], sizes = [2, 128], strides = [1, 1]} : vector<2x8192xbf16> to vector<2x128xbf16>
    %75 = vector.extract_strided_slice %0 {offsets = [0, 5760], sizes = [2, 128], strides = [1, 1]} : vector<2x8192xbf16> to vector<2x128xbf16>
    %76 = arith.maximumf %74, %75 : vector<2x128xbf16>
    %77 = arith.maximumf %73, %76 : vector<2x128xbf16>
    %78 = vector.extract_strided_slice %0 {offsets = [0, 4864], sizes = [2, 128], strides = [1, 1]} : vector<2x8192xbf16> to vector<2x128xbf16>
    %79 = vector.extract_strided_slice %0 {offsets = [0, 4992], sizes = [2, 128], strides = [1, 1]} : vector<2x8192xbf16> to vector<2x128xbf16>
    %80 = arith.maximumf %78, %79 : vector<2x128xbf16>
    %81 = vector.extract_strided_slice %0 {offsets = [0, 5888], sizes = [2, 128], strides = [1, 1]} : vector<2x8192xbf16> to vector<2x128xbf16>
    %82 = vector.extract_strided_slice %0 {offsets = [0, 6016], sizes = [2, 128], strides = [1, 1]} : vector<2x8192xbf16> to vector<2x128xbf16>
    %83 = arith.maximumf %81, %82 : vector<2x128xbf16>
    %84 = arith.maximumf %80, %83 : vector<2x128xbf16>
    %85 = vector.extract_strided_slice %0 {offsets = [0, 6144], sizes = [2, 128], strides = [1, 1]} : vector<2x8192xbf16> to vector<2x128xbf16>
    %86 = vector.extract_strided_slice %0 {offsets = [0, 6272], sizes = [2, 128], strides = [1, 1]} : vector<2x8192xbf16> to vector<2x128xbf16>
    %87 = arith.maximumf %85, %86 : vector<2x128xbf16>
    %88 = vector.extract_strided_slice %0 {offsets = [0, 7168], sizes = [2, 128], strides = [1, 1]} : vector<2x8192xbf16> to vector<2x128xbf16>
    %89 = vector.extract_strided_slice %0 {offsets = [0, 7296], sizes = [2, 128], strides = [1, 1]} : vector<2x8192xbf16> to vector<2x128xbf16>
    %90 = arith.maximumf %88, %89 : vector<2x128xbf16>
    %91 = arith.maximumf %87, %90 : vector<2x128xbf16>
    %92 = vector.extract_strided_slice %0 {offsets = [0, 6400], sizes = [2, 128], strides = [1, 1]} : vector<2x8192xbf16> to vector<2x128xbf16>
    %93 = vector.extract_strided_slice %0 {offsets = [0, 6528], sizes = [2, 128], strides = [1, 1]} : vector<2x8192xbf16> to vector<2x128xbf16>
    %94 = arith.maximumf %92, %93 : vector<2x128xbf16>
    %95 = vector.extract_strided_slice %0 {offsets = [0, 7424], sizes = [2, 128], strides = [1, 1]} : vector<2x8192xbf16> to vector<2x128xbf16>
    %96 = vector.extract_strided_slice %0 {offsets = [0, 7552], sizes = [2, 128], strides = [1, 1]} : vector<2x8192xbf16> to vector<2x128xbf16>
    %97 = arith.maximumf %95, %96 : vector<2x128xbf16>
    %98 = arith.maximumf %94, %97 : vector<2x128xbf16>
    %99 = vector.extract_strided_slice %0 {offsets = [0, 6656], sizes = [2, 128], strides = [1, 1]} : vector<2x8192xbf16> to vector<2x128xbf16>
    %100 = vector.extract_strided_slice %0 {offsets = [0, 6784], sizes = [2, 128], strides = [1, 1]} : vector<2x8192xbf16> to vector<2x128xbf16>
    %101 = arith.maximumf %99, %100 : vector<2x128xbf16>
    %102 = vector.extract_strided_slice %0 {offsets = [0, 7680], sizes = [2, 128], strides = [1, 1]} : vector<2x8192xbf16> to vector<2x128xbf16>
    %103 = vector.extract_strided_slice %0 {offsets = [0, 7808], sizes = [2, 128], strides = [1, 1]} : vector<2x8192xbf16> to vector<2x128xbf16>
    %104 = arith.maximumf %102, %103 : vector<2x128xbf16>
    %105 = arith.maximumf %101, %104 : vector<2x128xbf16>
    %106 = vector.extract_strided_slice %0 {offsets = [0, 6912], sizes = [2, 128], strides = [1, 1]} : vector<2x8192xbf16> to vector<2x128xbf16>
    %107 = vector.extract_strided_slice %0 {offsets = [0, 7040], sizes = [2, 128], strides = [1, 1]} : vector<2x8192xbf16> to vector<2x128xbf16>
    %108 = arith.maximumf %106, %107 : vector<2x128xbf16>
    %109 = vector.extract_strided_slice %0 {offsets = [0, 7936], sizes = [2, 128], strides = [1, 1]} : vector<2x8192xbf16> to vector<2x128xbf16>
    %110 = vector.extract_strided_slice %0 {offsets = [0, 8064], sizes = [2, 128], strides = [1, 1]} : vector<2x8192xbf16> to vector<2x128xbf16>
    %111 = arith.maximumf %109, %110 : vector<2x128xbf16>
    %112 = arith.maximumf %108, %111 : vector<2x128xbf16>
    %113 = tpu.concatenate %7, %14, %21, %28, %35, %42, %49, %56, %63, %70, %77, %84, %91, %98, %105, %112 in 1 : vector<2x128xbf16>, vector<2x128xbf16>, vector<2x128xbf16>, vector<2x128xbf16>, vector<2x128xbf16>, vector<2x128xbf16>, vector<2x128xbf16>, vector<2x128xbf16>, vector<2x128xbf16>, vector<2x128xbf16>, vector<2x128xbf16>, vector<2x128xbf16>, vector<2x128xbf16>, vector<2x128xbf16>, vector<2x128xbf16>, vector<2x128xbf16> -> vector<2x2048xbf16>
    %cst = arith.constant 0.000000e+00 : bf16
    %114 = vector.broadcast %cst : bf16 to vector<2x2048xbf16>
    %115 = arith.maximumf %113, %114 : vector<2x2048xbf16>
    %c0_1 = arith.constant 0 : index
    %c0_2 = arith.constant 0 : index
    %116 = vector.load %arg2[%c0_1, %c0_2] : memref<2048x128xbf16, #tpu.memory_space<vmem>>, vector<2048x128xbf16>
    %cst_3 = arith.constant dense<0.000000e+00> : vector<2x128xf32>
    %117 = tpu.matmul %115, %116, %cst_3 {dimension_numbers = #tpu.dot_dimension_numbers<[1], [0], [0], [1], [0, 0, 1, 1], [], []>} : vector<2x2048xbf16>, vector<2048x128xbf16>, vector<2x128xf32> -> vector<2x128xf32>
    %c0_4 = arith.constant 0 : index
    %c0_5 = arith.constant 0 : index
    %118 = vector.load %arg3[%c0_4, %c0_5] : memref<1x128xf32, #tpu.memory_space<vmem>>, vector<1x128xf32>
    %119 = vector.broadcast %118 : vector<1x128xf32> to vector<2x128xf32>
    %120 = arith.addf %117, %119 : vector<2x128xf32>
    %cst_6 = arith.constant 0.000000e+00 : f32
    %121 = vector.broadcast %cst_6 : f32 to vector<2x128xf32>
    %122 = arith.maximumf %120, %121 : vector<2x128xf32>
    %123 = arith.truncf %122 : vector<2x128xf32> to vector<2x128xbf16>
    %c0_7 = arith.constant 0 : index
    %c0_8 = arith.constant 0 : index
    %124 = vector.load %arg4[%c0_7, %c0_8] : memref<128x128xbf16, #tpu.memory_space<vmem>>, vector<128x128xbf16>
    %cst_9 = arith.constant dense<0.000000e+00> : vector<2x128xf32>
    %125 = tpu.matmul %123, %124, %cst_9 {dimension_numbers = #tpu.dot_dimension_numbers<[1], [0], [0], [1], [0, 0, 1, 1], [], []>} : vector<2x128xbf16>, vector<128x128xbf16>, vector<2x128xf32> -> vector<2x128xf32>
    %c0_10 = arith.constant 0 : index
    %c0_11 = arith.constant 0 : index
    %126 = vector.load %arg5[%c0_10, %c0_11] : memref<1x128xf32, #tpu.memory_space<vmem>>, vector<1x128xf32>
    %127 = vector.broadcast %126 : vector<1x128xf32> to vector<2x128xf32>
    %128 = arith.addf %125, %127 : vector<2x128xf32>
    %129 = tpu.iota {dimensions = array<i32: 1>} : vector<2x128xi32>
    %c10_i32 = arith.constant 10 : i32
    %130 = vector.broadcast %c10_i32 : i32 to vector<2x128xi32>
    %131 = arith.cmpi slt, %129, %130 : vector<2x128xi32>
    %cst_12 = arith.constant -1.000000e+30 : f32
    %132 = vector.broadcast %cst_12 : f32 to vector<2x128xf32>
    %133 = arith.select %131, %128, %132 : vector<2x128xi1>, vector<2x128xf32>
    %cst_13 = arith.constant dense<0xFF800000> : vector<2xf32>
    %134 = vector.multi_reduction <maximumf>, %133, %cst_13 [1] : vector<2x128xf32> to vector<2xf32>
    %135 = vector.shape_cast %134 : vector<2xf32> to vector<2x1xf32>
    %136 = vector.broadcast %135 : vector<2x1xf32> to vector<2x128xf32>
    %137 = arith.subf %133, %136 : vector<2x128xf32>
    %138 = math.exp %137 : vector<2x128xf32>
    %cst_14 = arith.constant dense<0.000000e+00> : vector<2xf32>
    %139 = vector.multi_reduction <add>, %138, %cst_14 [1] : vector<2x128xf32> to vector<2xf32>
    %140 = vector.shape_cast %139 : vector<2xf32> to vector<2x1xf32>
    %141 = math.log %140 : vector<2x1xf32>
    %142 = arith.addf %141, %135 : vector<2x1xf32>
    %143 = vector.broadcast %142 : vector<2x1xf32> to vector<2x128xf32>
    %144 = arith.subf %133, %143 : vector<2x128xf32>
    %c0_15 = arith.constant 0 : index
    %c0_16 = arith.constant 0 : index
    %145 = vector.load %arg6[%c0_15, %c0_16] : memref<2x128xf32, #tpu.memory_space<vmem>>, vector<2x128xf32>
    tpu.vector_store %arg6[%c0_15, %c0_16], %144 {strides = array<i32>} : memref<2x128xf32, #tpu.memory_space<vmem>>, vector<2x128xf32>,
    return
  }
  func.func @transform_0(%arg0: i32) -> (i32, i32) {
    %c0_i32 = arith.constant 0 : i32
    %c0_i32_0 = arith.constant 0 : i32
    return %arg0, %c0_i32 : i32, i32
  }
  func.func @transform_1(%arg0: i32) -> (i32, i32) {
    %c0_i32 = arith.constant 0 : i32
    %c0_i32_0 = arith.constant 0 : i32
    %c0_i32_1 = arith.constant 0 : i32
    return %c0_i32, %c0_i32_0 : i32, i32
  }
  func.func @transform_2(%arg0: i32) -> (i32, i32) {
    %c0_i32 = arith.constant 0 : i32
    %c0_i32_0 = arith.constant 0 : i32
    %c0_i32_1 = arith.constant 0 : i32
    return %c0_i32, %c0_i32_0 : i32, i32
  }
  func.func @transform_3(%arg0: i32) -> (i32, i32) {
    %c0_i32 = arith.constant 0 : i32
    %c0_i32_0 = arith.constant 0 : i32
    %c0_i32_1 = arith.constant 0 : i32
    return %c0_i32, %c0_i32_0 : i32, i32
  }
  func.func @transform_4(%arg0: i32) -> (i32, i32) {
    %c0_i32 = arith.constant 0 : i32
    %c0_i32_0 = arith.constant 0 : i32
    %c0_i32_1 = arith.constant 0 : i32
    return %c0_i32, %c0_i32_0 : i32, i32
  }
  func.func @transform_5(%arg0: i32) -> (i32, i32) {
    %c0_i32 = arith.constant 0 : i32
    %c0_i32_0 = arith.constant 0 : i32
    return %arg0, %c0_i32 : i32, i32
  }
}

</mosaic_0001>

<bundles_post_ra>
// kernel: custom_net_forward.3
= control target key start
LH: loop header
LB: loop body
LE: loop exit
PB: predicated region body
PF: predicated region fallthrough
CT: control target
= control target key end

     0   :  { %s1027_s12 = smov 0   ;;  %s1227_s0 = inlined_call_operand.vmem [shape: bf16[288,36], index: 0, kind: input, shape index: {}]   ;;  %s1228_s1 = inlined_call_operand.vmem [shape: bf16[36,512], index: 1, kind: input, shape index: {}]   ;;  %s1229_s2 = inlined_call_operand.vmem [shape: f32[1,512], index: 2, kind: input, shape index: {}]   ;;  %s1230_s3 = inlined_call_operand.vmem [shape: bf16[288,128], index: 3, kind: output, shape index: {}]  }
   0x1 LB: > { %s825_s13 = sadd.s32 4294967295, %s1004_s12   ;;  %p829_p0 = scmp.ge.s32.totalorder %s1004_s12, 1  ;;  %s1004_s12 = sphi %s1027_s12, %s13_s12  }
   0x2   : > { %p138_p1 = scmp.lt.s32.totalorder %s1004_s12, 3 }
   0x4   : > { %p139_p2 = pnand %p829_p0, %p138_p1 }
   0x5   : > { %v973_v0 = vld [vmem:[%s1228_s1 + $0x4] ss:$16 sps:$4 sm:$0xff] (!%p139_p2)   ;;  %v975_v1 = vld [vmem:[%s1228_s1 + $0xc] ss:$16 sps:$4 sm:$0xff] (!%p139_p2)   ;;  %v1006_v2 = vmov (!%p139_p2), 0   ;;  %s162_s18 = smul.u32 (!%p139_p2), 18, %s825_s13  ;;  %v205_v26 = vlaneseq (!%p139_p2) }
   0x6   : > { %142 = sbr.rel (%p139_p2) target bundleno = 309 (0x135), region = 32  ;;  %393 = vmatprep.mubr.bf16.mxu0 (!%p139_p2), %v1006_v2  ;;  %516 = vmatprep.mubr.bf16.mxu1 (!%p139_p2), %v1006_v2  ;;  %v977_v3 = vld [vmem:[%s1228_s1] ss:$16 sps:$4 sm:$0xff] (!%p139_p2)   ;;  %v978_v4 = vld [vmem:[%s1228_s1 + $0x8] ss:$16 sps:$4 sm:$0xff] (!%p139_p2)   ;;  %vm348_vm0 = vcmask (!%p139_p2), 1041408  }
   0x7   : > { %361 = vmatprep.subr.bf16.mxu0 (!%p139_p2), %v973_v0  ;;  %484 = vmatprep.subr.bf16.mxu1 (!%p139_p2), %v975_v1  ;;  %v979_v5 = vld [vmem:[%s1228_s1 + $0x24] ss:$16 sps:$4 sm:$0xff] (!%p139_p2)   ;;  %p163_p3 = scmp.lt.s32.totalorder (!%p139_p2), %s162_s18, 35  ;;  %v981_v6 = vld [vmem:[%s1228_s1 + $0x2c] ss:$16 sps:$4 sm:$0xff] (!%p139_p2)   ;;  %vm320_vm1 = vcmask (!%p139_p2), 293888  }
   0x8   : > { %362 = vmatpush1.bf16.msra.mxu0 (!%p139_p2), %v977_v3  ;;  %485 = vmatpush1.bf16.msra.mxu1 (!%p139_p2), %v978_v4  ;;  %v983_v7 = vld [vmem:[%s1228_s1 + $0x20] ss:$16 sps:$4 sm:$0xff] (!%p139_p2)   ;;  %v984_v8 = vld [vmem:[%s1228_s1 + $0x28] ss:$16 sps:$4 sm:$0xff] (!%p139_p2)   ;;  %v206_v27 = vshrl.u32 (!%p139_p2), %v205_v26, 7 }
   0x9   : > { %363 = vmatprep.subr.bf16.mxu0 (!%p139_p2), %v979_v5  ;;  %v201_v9 = vld [vmem:[%s1228_s1 + $0x40] sm:$0x33] (!%p139_p2)  ;;  %v202_v10 = vld [vmem:[%s1228_s1 + $0x48] sm:$0x33] (!%p139_p2)  ;;  %486 = vmatprep.subr.bf16.mxu1 (!%p139_p2), %v981_v6 }
   0xa   : > { %v850_v11 = vcombine.high (!%p139_p2), %v201_v9, %v201_v9  ;;  %v852_v12 = vcombine.high (!%p139_p2), %v202_v10, %v202_v10  ;;  %v849_v13 = vcombine.low (!%p139_p2), %v201_v9, %v201_v9  ;;  %v851_v14 = vcombine.low (!%p139_p2), %v202_v10, %v202_v10  ;;  %v203_v30 = vld [vmem:[%s1229_s2] sm:$0xf] (!%p139_p2) }
   0xb   : > { %v207_v28 = vsub.s32 (!%p139_p2), 0, %v206_v27  ;;  %v215_v29 = vsub.s32 (!%p139_p2), 2, %v206_v27  ;;  %v211_v31 = vsub.s32 (!%p139_p2), 1, %v206_v27  ;;  %v219_v32 = vsub.s32 (!%p139_p2), 3, %v206_v27 }
   0xc   : > { %364 = vmatpush1.bf16.msra.mxu0 (!%p139_p2), %v983_v7  ;;  %487 = vmatpush1.bf16.msra.mxu1 (!%p139_p2), %v984_v8  ;;  %v350_v15 = vsel (!%p139_p2), %vm348_vm0, %v849_v13, 0  ;;  %v356_v16 = vsel (!%p139_p2), %vm348_vm0, %v851_v14, 0 }
   0xd   : > { %s1232_s18 = smov (!%p163_p3, %s162_s18), 35  ;;  %853 = vmatprep.subr.msk.bf16.mxu0 %vm348_vm0, %v850_v11  ;;  %863 = vmatprep.subr.msk.bf16.mxu1 %vm348_vm0, %v852_v12  ;;  %v1128_v33 = vrot.slane %v203_v30, %v207_v28  ;;  %v1130_v34 = vrot.slane %v203_v30, %v215_v29  ;;  %v1132_v35 = vrot.slane %v203_v30, %v211_v31 }
   0xe   : > { %s830_s8 = sshll.u32 %s1232_s18, 2  ;;  %v1134_v36 = vrot.slane %v203_v30, %v219_v32 }
   0xf   : > { %s1080_s11 = scalar_lea.vmem %s1227_s0, %s830_s8  ;;  %s1153_s17 = scalar_lea.vmem %s1230_s3, %s830_s8 }
  0x10   : > { %v989_v17 = vld [vmem:[%s1080_s11] sm:$0xff]   ;;  %366 = vmatpush1.bf16.msra.mxu0 %v350_v15  ;;  %489 = vmatpush1.bf16.msra.mxu1 %v356_v16  ;;  %v990_v18 = vld [vmem:[%s1080_s11 + $0x8] sm:$0xff]   ;;  %v991_v19 = vld [vmem:[%s1080_s11 + $0x10] sm:$0xff]  }
  0x11   : > { %v992_v20 = vld [vmem:[%s1080_s11 + $0x18] sm:$0xff]   ;;  %v993_v21 = vld [vmem:[%s1080_s11 + $0x20] sm:$0xff]   ;;  %v994_v22 = vld [vmem:[%s1080_s11 + $0x28] sm:$0xff]  }
  0x12   : > { %v995_v23 = vld [vmem:[%s1080_s11 + $0x30] sm:$0xff]   ;;  %v996_v24 = vld [vmem:[%s1080_s11 + $0x38] sm:$0xff]   ;;  %v997_v25 = vld [vmem:[%s1080_s11 + $0x40] sm:$0xff]  }
  0x13   : > { %854 = vmatmul.mubr.msk.bf16.vlgmr.msra.gmra.mrb[0].mxu0 %vm320_vm1, %v989_v17  ;;  %864 = vmatmul.mubr.msk.bf16.vlgmr.msra.gmra.mrb[0].mxu1 %vm320_vm1, %v989_v17 }
  0x14   : > { %403 = vmatprep.mubr.bf16.mxu0 %v1006_v2  ;;  %526 = vmatprep.mubr.bf16.mxu1 %v1006_v2 }
  0x1b   : > { %855 = vmatmul.mubr.msk.bf16.gmra.mrb[4].mxu0 %vm320_vm1, %v990_v18  ;;  %865 = vmatmul.mubr.msk.bf16.gmra.mrb[4].mxu1 %vm320_vm1, %v990_v18 }
  0x1c   : > { %413 = vmatprep.mubr.bf16.mxu0 %v1006_v2  ;;  %536 = vmatprep.mubr.bf16.mxu1 %v1006_v2 }
  0x23   : > { %856 = vmatmul.mubr.msk.bf16.gmra.mrb[8].mxu0 %vm320_vm1, %v991_v19  ;;  %866 = vmatmul.mubr.msk.bf16.gmra.mrb[8].mxu1 %vm320_vm1, %v991_v19 }
  0x24   : > { %423 = vmatprep.mubr.bf16.mxu0 %v1006_v2  ;;  %546 = vmatprep.mubr.bf16.mxu1 %v1006_v2 }
  0x2b   : > { %857 = vmatmul.mubr.msk.bf16.gmra.mrb[12].mxu0 %vm320_vm1, %v992_v20  ;;  %867 = vmatmul.mubr.msk.bf16.gmra.mrb[12].mxu1 %vm320_vm1, %v992_v20 }
  0x2c   : > { %433 = vmatprep.mubr.bf16.mxu0 %v1006_v2  ;;  %556 = vmatprep.mubr.bf16.mxu1 %v1006_v2 }
  0x33   : > { %858 = vmatmul.mubr.msk.bf16.gmra.mrb[16].mxu0 %vm320_vm1, %v993_v21  ;;  %868 = vmatmul.mubr.msk.bf16.gmra.mrb[16].mxu1 %vm320_vm1, %v993_v21 }
  0x34   : > { %443 = vmatprep.mubr.bf16.mxu0 %v1006_v2  ;;  %566 = vmatprep.mubr.bf16.mxu1 %v1006_v2 }
  0x3b   : > { %859 = vmatmul.mubr.msk.bf16.gmra.mrb[20].mxu0 %vm320_vm1, %v994_v22  ;;  %869 = vmatmul.mubr.msk.bf16.gmra.mrb[20].mxu1 %vm320_vm1, %v994_v22 }
  0x3c   : > { %453 = vmatprep.mubr.bf16.mxu0 %v1006_v2  ;;  %576 = vmatprep.mubr.bf16.mxu1 %v1006_v2 }
  0x43   : > { %860 = vmatmul.mubr.msk.bf16.gmra.mrb[24].mxu0 %vm320_vm1, %v995_v23  ;;  %870 = vmatmul.mubr.msk.bf16.gmra.mrb[24].mxu1 %vm320_vm1, %v995_v23 }
  0x44   : > { %463 = vmatprep.mubr.bf16.mxu0 %v1006_v2  ;;  %586 = vmatprep.mubr.bf16.mxu1 %v1006_v2 }
  0x4b   : > { %861 = vmatmul.mubr.msk.bf16.gmra.mrb[28].mxu0 %vm320_vm1, %v996_v24  ;;  %871 = vmatmul.mubr.msk.bf16.gmra.mrb[28].mxu1 %vm320_vm1, %v996_v24 }
  0x4c   : > { %473 = vmatprep.mubr.bf16.mxu0 %v1006_v2  ;;  %596 = vmatprep.mubr.bf16.mxu1 %v1006_v2 }
  0x53   : > { %862 = vmatmul.mubr.msk.bf16.gmra.mrb[32].mxu0 %vm320_vm1, %v997_v25  ;;  %872 = vmatmul.mubr.msk.bf16.gmra.mrb[32].mxu1 %vm320_vm1, %v997_v25 }
  0xe6   : > { %v395_v37 = vpop.f32.mrb[0].mxu0  ;;  %v518_v38 = vpop.f32.mrb[0].mxu1 }
  0xe7   : > { %v396_v39 = vadd.f32 %v395_v37, %v1128_v33  ;;  %v519_v40 = vadd.f32 %v518_v38, %v1130_v34  ;;  %v397_v41 = vpop.f32.mrb[1].mxu0  ;;  %v520_v42 = vpop.f32.mrb[1].mxu1 }
  0xe8   : > { %v398_v43 = vadd.f32 %v397_v41, %v1132_v35  ;;  %v521_v44 = vadd.f32 %v520_v42, %v1134_v36  ;;  %v399_v45 = vpop.f32.mrb[2].mxu0  ;;  %v522_v46 = vpop.f32.mrb[2].mxu1 }
  0xe9   : > { %v400_v47 = vadd.f32 %v399_v45, %v1128_v33  ;;  %v523_v48 = vadd.f32 %v522_v46, %v1130_v34  ;;  %v401_v49 = vpop.f32.mrb[3].mxu0  ;;  %v524_v50 = vpop.f32.mrb[3].mxu1 }
  0xea   : > { %v607_v51 = vmax.f32 %v396_v39, %v398_v43  ;;  %v625_v52 = vmax.f32 %v519_v40, %v521_v44  ;;  %v402_v53 = vadd.f32 %v401_v49, %v1132_v35  ;;  %v525_v54 = vadd.f32 %v524_v50, %v1134_v36 }
  0xec   : > { %v643_v55 = vmax.f32 %v607_v51, %v625_v52  ;;  %v608_v56 = vmax.f32 %v400_v47, %v402_v53  ;;  %v626_v57 = vmax.f32 %v523_v48, %v525_v54 }
  0xee   : > { %v644_v58 = vmax.f32 %v608_v56, %v626_v57  ;;  %v405_v59 = vpop.f32.mrb[4].mxu0  ;;  %v528_v60 = vpop.f32.mrb[4].mxu1  ;;  %v661_v1 = vmax.f32 %v643_v55, 0.0 }
  0xef   : > { %v406_v61 = vadd.f32 %v405_v59, %v1128_v33  ;;  %v529_v62 = vadd.f32 %v528_v60, %v1130_v34  ;;  %v407_v63 = vpop.f32.mrb[5].mxu0  ;;  %v530_v0 = vpop.f32.mrb[5].mxu1 }
  0xf0   : > { %v662_v2 = vmax.f32 %v644_v58, 0.0  ;;  %v408_v3 = vadd.f32 %v407_v63, %v1132_v35  ;;  %v531_v4 = vadd.f32 %v530_v0, %v1134_v36  ;;  %v409_v5 = vpop.f32.mrb[6].mxu0  ;;  %v532_v6 = vpop.f32.mrb[6].mxu1 }
  0xf1   : > { %v410_v7 = vadd.f32 %v409_v5, %v1128_v33  ;;  %v533_v8 = vadd.f32 %v532_v6, %v1130_v34  ;;  %v411_v9 = vpop.f32.mrb[7].mxu0  ;;  %v534_v10 = vpop.f32.mrb[7].mxu1 }
  0xf2   : > { %v914_v11 = vpack.c.bf16 %v662_v2, %v661_v1  ;;  %v609_v12 = vmax.f32 %v406_v61, %v408_v3  ;;  %v627_v13 = vmax.f32 %v529_v62, %v531_v4  ;;  %v412_v14 = vadd.f32 %v411_v9, %v1132_v35 }
  0xf3   : > { %v535_v15 = vadd.f32 %v534_v10, %v1134_v36 }
  0xf4   : > { %915 = vst [vmem:[%s1153_s17] sm:$0xff] %v914_v11   ;;  %v645_v16 = vmax.f32 %v609_v12, %v627_v13  ;;  %v610_v17 = vmax.f32 %v410_v7, %v412_v14 }
  0xf5   : > { %v628_v18 = vmax.f32 %v533_v8, %v535_v15 }
  0xf6   : > { %v415_v19 = vpop.f32.mrb[8].mxu0  ;;  %v538_v20 = vpop.f32.mrb[8].mxu1  ;;  %v663_v30 = vmax.f32 %v645_v16, 0.0 }
  0xf7   : > { %v646_v21 = vmax.f32 %v610_v17, %v628_v18  ;;  %v416_v22 = vadd.f32 %v415_v19, %v1128_v33  ;;  %v539_v23 = vadd.f32 %v538_v20, %v1130_v34  ;;  %v417_v24 = vpop.f32.mrb[9].mxu0  ;;  %v540_v25 = vpop.f32.mrb[9].mxu1 }
  0xf8   : > { %v418_v26 = vadd.f32 %v417_v24, %v1132_v35  ;;  %v541_v27 = vadd.f32 %v540_v25, %v1134_v36  ;;  %v419_v28 = vpop.f32.mrb[10].mxu0  ;;  %v542_v29 = vpop.f32.mrb[10].mxu1 }
  0xf9   : > { %v664_v31 = vmax.f32 %v646_v21, 0.0  ;;  %v420_v32 = vadd.f32 %v419_v28, %v1128_v33  ;;  %v543_v37 = vadd.f32 %v542_v29, %v1130_v34  ;;  %v421_v38 = vpop.f32.mrb[11].mxu0  ;;  %v544_v39 = vpop.f32.mrb[11].mxu1 }
  0xfa   : > { %v611_v40 = vmax.f32 %v416_v22, %v418_v26  ;;  %v629_v41 = vmax.f32 %v539_v23, %v541_v27  ;;  %v422_v42 = vadd.f32 %v421_v38, %v1132_v35  ;;  %v545_v43 = vadd.f32 %v544_v39, %v1134_v36 }
  0xfb   : > { %v919_v44 = vpack.c.bf16 %v664_v31, %v663_v30 }
  0xfc   : > { %v647_v45 = vmax.f32 %v611_v40, %v629_v41  ;;  %v612_v46 = vmax.f32 %v420_v32, %v422_v42  ;;  %v630_v47 = vmax.f32 %v543_v37, %v545_v43 }
  0xfd   : > { %956 = vst [vmem:[%s1153_s17 + $0x8] sm:$0xff] %v919_v44  }
  0xfe   : > { %v648_v48 = vmax.f32 %v612_v46, %v630_v47  ;;  %v425_v49 = vpop.f32.mrb[12].mxu0  ;;  %v548_v50 = vpop.f32.mrb[12].mxu1  ;;  %v665_v55 = vmax.f32 %v647_v45, 0.0 }
  0xff   : > { %v426_v51 = vadd.f32 %v425_v49, %v1128_v33  ;;  %v549_v52 = vadd.f32 %v548_v50, %v1130_v34  ;;  %v427_v53 = vpop.f32.mrb[13].mxu0  ;;  %v550_v54 = vpop.f32.mrb[13].mxu1 }
 0x100   : > { %v666_v56 = vmax.f32 %v648_v48, 0.0  ;;  %v428_v57 = vadd.f32 %v427_v53, %v1132_v35  ;;  %v551_v58 = vadd.f32 %v550_v54, %v1134_v36  ;;  %v429_v59 = vpop.f32.mrb[14].mxu0  ;;  %v552_v60 = vpop.f32.mrb[14].mxu1 }
 0x101   : > { %v430_v61 = vadd.f32 %v429_v59, %v1128_v33  ;;  %v553_v62 = vadd.f32 %v552_v60, %v1130_v34  ;;  %v431_v63 = vpop.f32.mrb[15].mxu0  ;;  %v554_v0 = vpop.f32.mrb[15].mxu1 }
 0x102   : > { %v924_v1 = vpack.c.bf16 %v666_v56, %v665_v55  ;;  %v613_v2 = vmax.f32 %v426_v51, %v428_v57  ;;  %v631_v3 = vmax.f32 %v549_v52, %v551_v58  ;;  %v432_v4 = vadd.f32 %v431_v63, %v1132_v35 }
 0x103   : > { %v555_v5 = vadd.f32 %v554_v0, %v1134_v36 }
 0x104   : > { %957 = vst [vmem:[%s1153_s17 + $0x10] sm:$0xff] %v924_v1   ;;  %v649_v6 = vmax.f32 %v613_v2, %v631_v3  ;;  %v614_v7 = vmax.f32 %v430_v61, %v432_v4 }
 0x105   : > { %v632_v8 = vmax.f32 %v553_v62, %v555_v5 }
 0x106   : > { %v435_v9 = vpop.f32.mrb[16].mxu0  ;;  %v558_v10 = vpop.f32.mrb[16].mxu1  ;;  %v667_v20 = vmax.f32 %v649_v6, 0.0 }
 0x107   : > { %v650_v11 = vmax.f32 %v614_v7, %v632_v8  ;;  %v436_v12 = vadd.f32 %v435_v9, %v1128_v33  ;;  %v559_v13 = vadd.f32 %v558_v10, %v1130_v34  ;;  %v437_v14 = vpop.f32.mrb[17].mxu0  ;;  %v560_v15 = vpop.f32.mrb[17].mxu1 }
 0x108   : > { %v438_v16 = vadd.f32 %v437_v14, %v1132_v35  ;;  %v561_v17 = vadd.f32 %v560_v15, %v1134_v36  ;;  %v439_v18 = vpop.f32.mrb[18].mxu0  ;;  %v562_v19 = vpop.f32.mrb[18].mxu1 }
 0x109   : > { %v668_v21 = vmax.f32 %v650_v11, 0.0  ;;  %v440_v22 = vadd.f32 %v439_v18, %v1128_v33  ;;  %v563_v23 = vadd.f32 %v562_v19, %v1130_v34  ;;  %v441_v24 = vpop.f32.mrb[19].mxu0  ;;  %v564_v25 = vpop.f32.mrb[19].mxu1 }
 0x10a   : > { %v615_v26 = vmax.f32 %v436_v12, %v438_v16  ;;  %v633_v27 = vmax.f32 %v559_v13, %v561_v17  ;;  %v442_v28 = vadd.f32 %v441_v24, %v1132_v35  ;;  %v565_v29 = vadd.f32 %v564_v25, %v1134_v36 }
 0x10b   : > { %v929_v30 = vpack.c.bf16 %v668_v21, %v667_v20 }
 0x10c   : > { %v651_v31 = vmax.f32 %v615_v26, %v633_v27  ;;  %v616_v32 = vmax.f32 %v440_v22, %v442_v28  ;;  %v634_v37 = vmax.f32 %v563_v23, %v565_v29 }
 0x10d   : > { %958 = vst [vmem:[%s1153_s17 + $0x18] sm:$0xff] %v929_v30  }
 0x10e   : > { %v652_v38 = vmax.f32 %v616_v32, %v634_v37  ;;  %v445_v39 = vpop.f32.mrb[20].mxu0  ;;  %v568_v40 = vpop.f32.mrb[20].mxu1  ;;  %v669_v45 = vmax.f32 %v651_v31, 0.0 }
 0x10f   : > { %v446_v41 = vadd.f32 %v445_v39, %v1128_v33  ;;  %v569_v42 = vadd.f32 %v568_v40, %v1130_v34  ;;  %v447_v43 = vpop.f32.mrb[21].mxu0  ;;  %v570_v44 = vpop.f32.mrb[21].mxu1 }
 0x110   : > { %v670_v46 = vmax.f32 %v652_v38, 0.0  ;;  %v448_v47 = vadd.f32 %v447_v43, %v1132_v35  ;;  %v571_v48 = vadd.f32 %v570_v44, %v1134_v36  ;;  %v449_v49 = vpop.f32.mrb[22].mxu0  ;;  %v572_v50 = vpop.f32.mrb[22].mxu1 }
 0x111   : > { %v450_v51 = vadd.f32 %v449_v49, %v1128_v33  ;;  %v573_v52 = vadd.f32 %v572_v50, %v1130_v34  ;;  %v451_v53 = vpop.f32.mrb[23].mxu0  ;;  %v574_v54 = vpop.f32.mrb[23].mxu1 }
 0x112   : > { %v934_v55 = vpack.c.bf16 %v670_v46, %v669_v45  ;;  %v617_v56 = vmax.f32 %v446_v41, %v448_v47  ;;  %v635_v57 = vmax.f32 %v569_v42, %v571_v48  ;;  %v452_v58 = vadd.f32 %v451_v53, %v1132_v35 }
 0x113   : > { %v575_v59 = vadd.f32 %v574_v54, %v1134_v36 }
 0x114   : > { %959 = vst [vmem:[%s1153_s17 + $0x20] sm:$0xff] %v934_v55   ;;  %v653_v60 = vmax.f32 %v617_v56, %v635_v57  ;;  %v618_v61 = vmax.f32 %v450_v51, %v452_v58 }
 0x115   : > { %v636_v62 = vmax.f32 %v573_v52, %v575_v59 }
 0x116   : > { %v455_v63 = vpop.f32.mrb[24].mxu0  ;;  %v578_v0 = vpop.f32.mrb[24].mxu1  ;;  %v671_v10 = vmax.f32 %v653_v60, 0.0 }
 0x117   : > { %v654_v1 = vmax.f32 %v618_v61, %v636_v62  ;;  %v456_v2 = vadd.f32 %v455_v63, %v1128_v33  ;;  %v579_v3 = vadd.f32 %v578_v0, %v1130_v34  ;;  %v457_v4 = vpop.f32.mrb[25].mxu0  ;;  %v580_v5 = vpop.f32.mrb[25].mxu1 }
 0x118   : > { %v458_v6 = vadd.f32 %v457_v4, %v1132_v35  ;;  %v581_v7 = vadd.f32 %v580_v5, %v1134_v36  ;;  %v459_v8 = vpop.f32.mrb[26].mxu0  ;;  %v582_v9 = vpop.f32.mrb[26].mxu1 }
 0x119   : > { %v672_v11 = vmax.f32 %v654_v1, 0.0  ;;  %v460_v12 = vadd.f32 %v459_v8, %v1128_v33  ;;  %v583_v13 = vadd.f32 %v582_v9, %v1130_v34  ;;  %v461_v14 = vpop.f32.mrb[27].mxu0  ;;  %v584_v15 = vpop.f32.mrb[27].mxu1 }
 0x11a   : > { %v619_v16 = vmax.f32 %v456_v2, %v458_v6  ;;  %v637_v17 = vmax.f32 %v579_v3, %v581_v7  ;;  %v462_v18 = vadd.f32 %v461_v14, %v1132_v35  ;;  %v585_v19 = vadd.f32 %v584_v15, %v1134_v36 }
 0x11b   : > { %v939_v20 = vpack.c.bf16 %v672_v11, %v671_v10 }
 0x11c   : > { %v655_v21 = vmax.f32 %v619_v16, %v637_v17  ;;  %v620_v22 = vmax.f32 %v460_v12, %v462_v18  ;;  %v638_v23 = vmax.f32 %v583_v13, %v585_v19 }
 0x11d   : > { %960 = vst [vmem:[%s1153_s17 + $0x28] sm:$0xff] %v939_v20  }
 0x11e   : > { %v656_v24 = vmax.f32 %v620_v22, %v638_v23  ;;  %v465_v25 = vpop.f32.mrb[28].mxu0  ;;  %v588_v26 = vpop.f32.mrb[28].mxu1  ;;  %v673_v31 = vmax.f32 %v655_v21, 0.0 }
 0x11f   : > { %v466_v27 = vadd.f32 %v465_v25, %v1128_v33  ;;  %v589_v28 = vadd.f32 %v588_v26, %v1130_v34  ;;  %v467_v29 = vpop.f32.mrb[29].mxu0  ;;  %v590_v30 = vpop.f32.mrb[29].mxu1 }
 0x120   : > { %v674_v32 = vmax.f32 %v656_v24, 0.0  ;;  %v468_v37 = vadd.f32 %v467_v29, %v1132_v35  ;;  %v591_v38 = vadd.f32 %v590_v30, %v1134_v36  ;;  %v469_v39 = vpop.f32.mrb[30].mxu0  ;;  %v592_v40 = vpop.f32.mrb[30].mxu1 }
 0x121   : > { %v470_v41 = vadd.f32 %v469_v39, %v1128_v33  ;;  %v593_v42 = vadd.f32 %v592_v40, %v1130_v34  ;;  %v471_v43 = vpop.f32.mrb[31].mxu0  ;;  %v594_v44 = vpop.f32.mrb[31].mxu1 }
 0x122   : > { %v944_v45 = vpack.c.bf16 %v674_v32, %v673_v31  ;;  %v621_v46 = vmax.f32 %v466_v27, %v468_v37  ;;  %v639_v47 = vmax.f32 %v589_v28, %v591_v38  ;;  %v472_v48 = vadd.f32 %v471_v43, %v1132_v35 }
 0x123   : > { %v595_v49 = vadd.f32 %v594_v44, %v1134_v36 }
 0x124   : > { %961 = vst [vmem:[%s1153_s17 + $0x30] sm:$0xff] %v944_v45   ;;  %v657_v50 = vmax.f32 %v621_v46, %v639_v47  ;;  %v622_v51 = vmax.f32 %v470_v41, %v472_v48 }
 0x125   : > { %v640_v52 = vmax.f32 %v593_v42, %v595_v49 }
 0x126   : > { %v475_v53 = vpop.f32.mrb[32].mxu0  ;;  %v598_v54 = vpop.f32.mrb[32].mxu1  ;;  %v675_v0 = vmax.f32 %v657_v50, 0.0 }
 0x127   : > { %v658_v55 = vmax.f32 %v622_v51, %v640_v52  ;;  %v476_v56 = vadd.f32 %v475_v53, %v1128_v33  ;;  %v599_v57 = vadd.f32 %v598_v54, %v1130_v34  ;;  %v477_v58 = vpop.f32.mrb[33].mxu0  ;;  %v600_v59 = vpop.f32.mrb[33].mxu1 }
 0x128   : > { %v478_v60 = vadd.f32 %v477_v58, %v1132_v35  ;;  %v601_v61 = vadd.f32 %v600_v59, %v1134_v36  ;;  %v479_v62 = vpop.f32.mrb[34].mxu0  ;;  %v602_v63 = vpop.f32.mrb[34].mxu1 }
 0x129   : > { %v676_v1 = vmax.f32 %v658_v55, 0.0  ;;  %v480_v2 = vadd.f32 %v479_v62, %v1128_v33  ;;  %v603_v3 = vadd.f32 %v602_v63, %v1130_v34  ;;  %v481_v4 = vpop.f32.mrb[35].mxu0  ;;  %v604_v5 = vpop.f32.mrb[35].mxu1 }
 0x12a   : > { %v623_v6 = vmax.f32 %v476_v56, %v478_v60  ;;  %v641_v7 = vmax.f32 %v599_v57, %v601_v61  ;;  %v482_v8 = vadd.f32 %v481_v4, %v1132_v35  ;;  %v605_v9 = vadd.f32 %v604_v5, %v1134_v36 }
 0x12b   : > { %v949_v10 = vpack.c.bf16 %v676_v1, %v675_v0 }
 0x12c   : > { %v659_v11 = vmax.f32 %v623_v6, %v641_v7  ;;  %v624_v12 = vmax.f32 %v480_v2, %v482_v8  ;;  %v642_v13 = vmax.f32 %v603_v3, %v605_v9 }
 0x12d   : > { %962 = vst [vmem:[%s1153_s17 + $0x38] sm:$0xff] %v949_v10  }
 0x12e   : > { %v660_v14 = vmax.f32 %v624_v12, %v642_v13  ;;  %v677_v15 = vmax.f32 %v659_v11, 0.0 }
 0x130   : > { %v678_v16 = vmax.f32 %v660_v14, 0.0 }
 0x132   : > { %v954_v33 = vpack.c.bf16 %v678_v16, %v677_v15 }
 0x134   : > { %963 = vst [vmem:[%s1153_s17 + $0x40] sm:$0xff] %v954_v33  }
 0x135 PF: > { %s13_s12 = sadd.s32 1, %s1004_s12  }
 0x136   : > { %p10_p4 = scmp.ge.s32.totalorder %s13_s12, 4  }
 0x138   :  { %12 = sbr.rel (!%p10_p4) target bundleno = 1 (0x1), region = 62 }

// kernel: custom_net_forward.5
= control target key start
LH: loop header
LB: loop body
LE: loop exit
PB: predicated region body
PF: predicated region fallthrough
CT: control target
= control target key end

     0   :  { %v2222_v59 = vmov 0   ;;  %s2722_s0 = inlined_call_operand.vmem [shape: bf16[2,8192], index: 0, kind: input, shape index: {}]   ;;  %s2723_s1 = inlined_call_operand.vmem [shape: bf16[2048,128], index: 1, kind: input, shape index: {}]   ;;  %s2724_s2 = inlined_call_operand.vmem [shape: f32[1,128], index: 2, kind: input, shape index: {}]   ;;  %s2725_s3 = inlined_call_operand.vmem [shape: bf16[128,128], index: 3, kind: input, shape index: {}]   ;;  %s2726_s4 = inlined_call_operand.vmem [shape: f32[1,128], index: 4, kind: input, shape index: {}]   ;;  %s2727_s5 = inlined_call_operand.hbm [shape: f32[2,128], index: 5, kind: output, shape index: {}]  }
   0x1   :  { %v2058_v0 = vld [vmem:[%s2723_s1 + $0x40] sm:$0xff]   ;;  %v2062_v4 = vld [vmem:[%s2723_s1 + $0x48] sm:$0xff]   ;;  %v2066_v8 = vld [vmem:[%s2723_s1 + $0x50] sm:$0xff]  }
   0x2   :  { %v2059_v1 = vld [vmem:[%s2723_s1 + $0xc0] sm:$0xff]   ;;  %1849 = vmatprep.subr.bf16.mxu0 %v2058_v0  ;;  %v2063_v5 = vld [vmem:[%s2723_s1 + $0xc8] sm:$0xff]   ;;  %v2067_v9 = vld [vmem:[%s2723_s1 + $0xd0] sm:$0xff]  }
   0x3   :  { %v2060_v2 = vld [vmem:[%s2723_s1] sm:$0xff]   ;;  %1871 = vmatprep.subr.bf16.mxu1 %v2059_v1  ;;  %v2064_v6 = vld [vmem:[%s2723_s1 + $0x8] sm:$0xff]   ;;  %v2068_v10 = vld [vmem:[%s2723_s1 + $0x10] sm:$0xff]  }
   0x4   :  { %v2061_v3 = vld [vmem:[%s2723_s1 + $0x80] sm:$0xff]   ;;  %1850 = vmatpush3.bf16.msra.mxu0 %v2060_v2  ;;  %v2065_v7 = vld [vmem:[%s2723_s1 + $0x88] sm:$0xff]   ;;  %v2069_v11 = vld [vmem:[%s2723_s1 + $0x90] sm:$0xff]  }
   0x5   :  { %1872 = vmatpush3.bf16.msra.mxu1 %v2061_v3  ;;  %1851 = vmatprep.subr.bf16.mxu0 %v2062_v4  ;;  %v2070_v12 = vld [vmem:[%s2723_s1 + $0x58] sm:$0xff]   ;;  %v2074_v16 = vld [vmem:[%s2723_s1 + $0x60] sm:$0xff]   ;;  %v2078_v20 = vld [vmem:[%s2723_s1 + $0x68] sm:$0xff]  }
   0x6   :  { %1873 = vmatprep.subr.bf16.mxu1 %v2063_v5  ;;  %v2071_v13 = vld [vmem:[%s2723_s1 + $0xd8] sm:$0xff]   ;;  %v2075_v17 = vld [vmem:[%s2723_s1 + $0xe0] sm:$0xff]   ;;  %v2079_v21 = vld [vmem:[%s2723_s1 + $0xe8] sm:$0xff]  }
   0x7   :  { %v2072_v14 = vld [vmem:[%s2723_s1 + $0x18] sm:$0xff]   ;;  %v2076_v18 = vld [vmem:[%s2723_s1 + $0x20] sm:$0xff]   ;;  %v2080_v22 = vld [vmem:[%s2723_s1 + $0x28] sm:$0xff]  }
   0x8   :  { %1852 = vmatpush3.bf16.msra.mxu0 %v2064_v6  ;;  %v2073_v15 = vld [vmem:[%s2723_s1 + $0x98] sm:$0xff]   ;;  %v2077_v19 = vld [vmem:[%s2723_s1 + $0xa0] sm:$0xff]   ;;  %v2081_v23 = vld [vmem:[%s2723_s1 + $0xa8] sm:$0xff]  }
   0x9   :  { %1874 = vmatpush3.bf16.msra.mxu1 %v2065_v7  ;;  %1853 = vmatprep.subr.bf16.mxu0 %v2066_v8  ;;  %v2082_v24 = vld [vmem:[%s2723_s1 + $0x70] sm:$0xff]   ;;  %v2086_v28 = vld [vmem:[%s2723_s1 + $0x78] sm:$0xff]   ;;  %v22_v32 = vld [vmem:[%s2722_s0] sm:$0xff] }
   0xa   :  { %1875 = vmatprep.subr.bf16.mxu1 %v2067_v9  ;;  %v2083_v25 = vld [vmem:[%s2723_s1 + $0xf0] sm:$0xff]   ;;  %v2087_v29 = vld [vmem:[%s2723_s1 + $0xf8] sm:$0xff]   ;;  %v23_v33 = vld [vmem:[%s2722_s0 + $0x8] sm:$0xff]  ;;  %v39_v34 = vrot.slane %v22_v32, 2  ;;  %v41_v35 = vrot.slane %v22_v32, 3  ;;  %v61_v38 = vrot.slane %v22_v32, 6 }
   0xb   :  { %v2084_v26 = vld [vmem:[%s2723_s1 + $0x30] sm:$0xff]   ;;  %v2088_v30 = vld [vmem:[%s2723_s1 + $0x38] sm:$0xff]   ;;  %v44_v36 = vrot.slane %v23_v33, 2  ;;  %v46_v37 = vrot.slane %v23_v33, 3  ;;  %v63_v39 = vrot.slane %v22_v32, 7  ;;  %v66_v40 = vrot.slane %v23_v33, 6 }
   0xc   :  { %1854 = vmatpush3.bf16.msra.mxu0 %v2068_v10  ;;  %v2085_v27 = vld [vmem:[%s2723_s1 + $0xb0] sm:$0xff]   ;;  %v2089_v31 = vld [vmem:[%s2723_s1 + $0xb8] sm:$0xff]   ;;  %v68_v41 = vrot.slane %v23_v33, 7  ;;  %v2090_v42 = vld [vmem:[%s2723_s1 + $0x140] sm:$0xff]   ;;  %v43_v44 = vmax.bf16 %v41_v35, %v39_v34  ;;  %v31_v46 = vrot.slane %v22_v32, 1  ;;  %v35_v47 = vrot.slane %v23_v33, 1 }
   0xd   :  { %1876 = vmatpush3.bf16.msra.mxu1 %v2069_v11  ;;  %1855 = vmatprep.subr.bf16.mxu0 %v2070_v12  ;;  %v2091_v43 = vld [vmem:[%s2723_s1 + $0x1c0] sm:$0xff]   ;;  %v48_v45 = vmax.bf16 %v46_v37, %v44_v36  ;;  %v65_v48 = vmax.bf16 %v63_v39, %v61_v38  ;;  %v50_v50 = vrot.slane %v22_v32, 4  ;;  %v52_v51 = vrot.slane %v22_v32, 5  ;;  %v2094_v2 = vld [vmem:[%s2723_s1 + $0x148] sm:$0xff]   ;;  %v2098_v8 = vld [vmem:[%s2723_s1 + $0x150] sm:$0xff]  }
   0xe   :  { %1877 = vmatprep.subr.bf16.mxu1 %v2071_v13  ;;  %v70_v49 = vmax.bf16 %v68_v41, %v66_v40  ;;  %v33_v53 = vmax.bf16 %v31_v46, %v22_v32  ;;  %v37_v54 = vmax.bf16 %v35_v47, %v23_v33  ;;  %v55_v55 = vrot.slane %v23_v33, 4  ;;  %v2092_v0 = vld [vmem:[%s2723_s1 + $0x100] sm:$0xff]   ;;  %v2095_v5 = vld [vmem:[%s2723_s1 + $0x1c8] sm:$0xff]   ;;  %v2099_v10 = vld [vmem:[%s2723_s1 + $0x1d0] sm:$0xff]  }
   0xf   :  { %v49_v52 = vmax.bf16 %v48_v45, %v43_v44  ;;  %v54_v57 = vmax.bf16 %v52_v51, %v50_v50  ;;  %v57_v58 = vrot.slane %v23_v33, 5  ;;  %v2093_v4 = vld [vmem:[%s2723_s1 + $0x180] sm:$0xff]   ;;  %v2096_v7 = vld [vmem:[%s2723_s1 + $0x108] sm:$0xff]   ;;  %v2100_v11 = vld [vmem:[%s2723_s1 + $0x110] sm:$0xff]  }
  0x10   :  { %1856 = vmatpush3.bf16.msra.mxu0 %v2072_v14  ;;  %v71_v56 = vmax.bf16 %v70_v49, %v65_v48  ;;  %v38_v61 = vmax.bf16 %v37_v54, %v33_v53  ;;  %v2097_v9 = vld [vmem:[%s2723_s1 + $0x188] sm:$0xff]   ;;  %v2102_v12 = vld [vmem:[%s2723_s1 + $0x158] sm:$0xff]   ;;  %v2101_v13 = vld [vmem:[%s2723_s1 + $0x190] sm:$0xff]  }
  0x11   :  { %1878 = vmatpush3.bf16.msra.mxu1 %v2073_v15  ;;  %1857 = vmatprep.subr.bf16.mxu0 %v2074_v16  ;;  %v199_v60 = vmax.bf16 %v2222_v59, %v49_v52  ;;  %v59_v63 = vmax.bf16 %v57_v58, %v55_v55  ;;  %v2103_v14 = vld [vmem:[%s2723_s1 + $0x1d8] sm:$0xff]   ;;  %v2106_v16 = vld [vmem:[%s2723_s1 + $0x160] sm:$0xff]   ;;  %v24_v32 = vld [vmem:[%s2722_s0 + $0x10] sm:$0xff] }
  0x12   :  { %1879 = vmatprep.subr.bf16.mxu1 %v2075_v17  ;;  %v201_v62 = vmax.bf16 %v2222_v59, %v71_v56  ;;  %v198_v1 = vmax.bf16 %v2222_v59, %v38_v61  ;;  %v2104_v15 = vld [vmem:[%s2723_s1 + $0x118] sm:$0xff]   ;;  %v81_v34 = vrot.slane %v24_v32, 2  ;;  %v83_v35 = vrot.slane %v24_v32, 3  ;;  %v2122_v46 = vld [vmem:[%s2723_s1 + $0x240] sm:$0xff]  }
  0x13   :  { %1277 = vmatprep.mubr.bf16.mxu0 %v199_v60  ;;  %v60_v3 = vmax.bf16 %v59_v63, %v54_v57  ;;  %v2105_v17 = vld [vmem:[%s2723_s1 + $0x198] sm:$0xff]   ;;  %v103_v38 = vrot.slane %v24_v32, 6  ;;  %v105_v39 = vrot.slane %v24_v32, 7  ;;  %v73_v44 = vrot.slane %v24_v32, 1  ;;  %v2123_v60 = vld [vmem:[%s2723_s1 + $0x2c0] sm:$0xff]  }
  0x14   :  { %1858 = vmatpush3.bf16.msra.mxu0 %v2076_v18  ;;  %1317 = vmatprep.mubr.bf16.mxu1 %v201_v62  ;;  %v2107_v18 = vld [vmem:[%s2723_s1 + $0x1e0] sm:$0xff]   ;;  %v25_v33 = vld [vmem:[%s2722_s0 + $0x18] sm:$0xff]  ;;  %v92_v49 = vrot.slane %v24_v32, 4  ;;  %v94_v50 = vrot.slane %v24_v32, 5 }
  0x15   :  { %1880 = vmatpush3.bf16.msra.mxu1 %v2077_v19  ;;  %1859 = vmatprep.subr.bf16.mxu0 %v2078_v20  ;;  %v200_v6 = vmax.bf16 %v2222_v59, %v60_v3  ;;  %v2108_v19 = vld [vmem:[%s2723_s1 + $0x120] sm:$0xff]   ;;  %v2110_v20 = vld [vmem:[%s2723_s1 + $0x168] sm:$0xff]   ;;  %v86_v36 = vrot.slane %v25_v33, 2  ;;  %v88_v37 = vrot.slane %v25_v33, 3  ;;  %v108_v40 = vrot.slane %v25_v33, 6  ;;  %v2121_v51 = vld [vmem:[%s2723_s1 + $0x1b8] sm:$0xff]  }
  0x16   :  { %1881 = vmatprep.subr.bf16.mxu1 %v2079_v21  ;;  %v2109_v21 = vld [vmem:[%s2723_s1 + $0x1a0] sm:$0xff]   ;;  %v110_v41 = vrot.slane %v25_v33, 7  ;;  %v77_v45 = vrot.slane %v25_v33, 1  ;;  %v107_v47 = vmax.bf16 %v105_v39, %v103_v38  ;;  %v75_v53 = vmax.bf16 %v73_v44, %v24_v32  ;;  %v2126_v3 = vld [vmem:[%s2723_s1 + $0x248] sm:$0xff]   ;;  %v2152_v32 = vld [vmem:[%s2723_s1 + $0x238] sm:$0xff]  }
  0x17   :  { %v97_v55 = vrot.slane %v25_v33, 4  ;;  %v96_v57 = vmax.bf16 %v94_v50, %v92_v49  ;;  %v99_v58 = vrot.slane %v25_v33, 5  ;;  %v2154_v39 = vld [vmem:[%s2723_s1 + $0x340] sm:$0xff]  }
  0x18   :  { %1860 = vmatpush3.bf16.msra.mxu0 %v2080_v22  ;;  %v2111_v22 = vld [vmem:[%s2723_s1 + $0x1e8] sm:$0xff]   ;;  %v112_v48 = vmax.bf16 %v110_v41, %v108_v40  ;;  %v79_v54 = vmax.bf16 %v77_v45, %v25_v33  ;;  %v26_v33 = vld [vmem:[%s2722_s0 + $0x20] sm:$0xff] }
  0x19   :  { %1882 = vmatpush3.bf16.msra.mxu1 %v2081_v23  ;;  %1861 = vmatprep.subr.bf16.mxu0 %v2082_v24  ;;  %v2112_v23 = vld [vmem:[%s2723_s1 + $0x128] sm:$0xff]   ;;  %v2114_v24 = vld [vmem:[%s2723_s1 + $0x170] sm:$0xff]   ;;  %v147_v38 = vrot.slane %v26_v33, 7 }
  0x1a   :  { %1883 = vmatprep.subr.bf16.mxu1 %v2083_v25  ;;  %v2113_v25 = vld [vmem:[%s2723_s1 + $0x1a8] sm:$0xff]   ;;  %v113_v56 = vmax.bf16 %v112_v48, %v107_v47  ;;  %v80_v62 = vmax.bf16 %v79_v54, %v75_v53  ;;  %v2153_v48 = vld [vmem:[%s2723_s1 + $0x2b8] sm:$0xff]  }
  0x1c   :  { %1862 = vmatpush3.bf16.msra.mxu0 %v2084_v26  ;;  %v2115_v26 = vld [vmem:[%s2723_s1 + $0x1f0] sm:$0xff]   ;;  %v205_v63 = vmax.bf16 %v2222_v59, %v113_v56 }
  0x1d   :  { %1884 = vmatpush3.bf16.msra.mxu1 %v2085_v27  ;;  %1863 = vmatprep.subr.bf16.mxu0 %v2086_v28  ;;  %v2116_v27 = vld [vmem:[%s2723_s1 + $0x130] sm:$0xff]  }
  0x1e   :  { %1885 = vmatprep.subr.bf16.mxu1 %v2087_v29  ;;  %v2117_v28 = vld [vmem:[%s2723_s1 + $0x1b0] sm:$0xff]   ;;  %v2118_v29 = vld [vmem:[%s2723_s1 + $0x178] sm:$0xff]  }
  0x20   :  { %1864 = vmatpush3.bf16.msra.mxu0 %v2088_v30  ;;  %v2119_v30 = vld [vmem:[%s2723_s1 + $0x1f8] sm:$0xff]  }
  0x21   :  { %1886 = vmatpush3.bf16.msra.mxu1 %v2089_v31  ;;  %1893 = vmatprep.subr.bf16.mxu0 %v2090_v42  ;;  %v2120_v31 = vld [vmem:[%s2723_s1 + $0x138] sm:$0xff]   ;;  %v85_v42 = vmax.bf16 %v83_v35, %v81_v34  ;;  %v27_v34 = vld [vmem:[%s2722_s0 + $0x28] sm:$0xff]  ;;  %v123_v35 = vrot.slane %v26_v33, 2 }
  0x22   :  { %1915 = vmatprep.subr.bf16.mxu1 %v2091_v43  ;;  %v90_v43 = vmax.bf16 %v88_v37, %v86_v36  ;;  %v125_v36 = vrot.slane %v26_v33, 3  ;;  %v145_v37 = vrot.slane %v26_v33, 6  ;;  %v128_v40 = vrot.slane %v27_v34, 2 }
  0x23   :  { %1278 = vmatmul.mubr.bf16.vlgmr.msra.gmra.mrb[0].mxu0 %v198_v1  ;;  %v2124_v1 = vld [vmem:[%s2723_s1 + $0x200] sm:$0xff]   ;;  %v130_v41 = vrot.slane %v27_v34, 3  ;;  %v119_v47 = vrot.slane %v27_v34, 1  ;;  %v141_v56 = vrot.slane %v27_v34, 5 }
  0x24   :  { %1894 = vmatpush3.bf16.msra.mxu0 %v2092_v0  ;;  %1318 = vmatmul.mubr.bf16.vlgmr.msra.gmra.mrb[0].mxu1 %v200_v6  ;;  %v91_v52 = vmax.bf16 %v90_v43, %v85_v42  ;;  %v101_v0 = vmax.bf16 %v99_v58, %v97_v55  ;;  %v2127_v6 = vld [vmem:[%s2723_s1 + $0x2c8] sm:$0xff]   ;;  %v150_v42 = vrot.slane %v27_v34, 6  ;;  %v152_v43 = vrot.slane %v27_v34, 7 }
  0x25   :  { %1895 = vmatprep.subr.bf16.mxu0 %v2094_v2  ;;  %1916 = vmatpush3.bf16.msra.mxu1 %v2093_v4  ;;  %v202_v2 = vmax.bf16 %v2222_v59, %v80_v62  ;;  %v127_v44 = vmax.bf16 %v125_v36, %v123_v35  ;;  %v149_v45 = vmax.bf16 %v147_v38, %v145_v37  ;;  %v139_v55 = vrot.slane %v27_v34, 4  ;;  %v29_v35 = vld [vmem:[%s2722_s0 + $0x38] sm:$0xff] }
  0x26   :  { %1917 = vmatprep.subr.bf16.mxu1 %v2095_v5  ;;  %v203_v61 = vmax.bf16 %v2222_v59, %v91_v52  ;;  %1397 = vmatprep.mubr.bf16.mxu1 %v205_v63  ;;  %v102_v4 = vmax.bf16 %v101_v0, %v96_v57  ;;  %v2125_v5 = vld [vmem:[%s2723_s1 + $0x280] sm:$0xff]   ;;  %v132_v49 = vmax.bf16 %v130_v41, %v128_v40  ;;  %v136_v52 = vrot.slane %v26_v33, 5  ;;  %v2185_v36 = vld [vmem:[%s2723_s1 + $0x3b8] sm:$0xff]  }
  0x27   :  { %v154_v50 = vmax.bf16 %v152_v43, %v150_v42  ;;  %v121_v54 = vmax.bf16 %v119_v47, %v27_v34  ;;  %v143_v63 = vmax.bf16 %v141_v56, %v139_v55  ;;  %v2156_v0 = vld [vmem:[%s2723_s1 + $0x300] sm:$0xff]   ;;  %v28_v34 = vld [vmem:[%s2722_s0 + $0x30] sm:$0xff]  ;;  %v172_v40 = vrot.slane %v29_v35, 3 }
  0x28   :  { %1896 = vmatpush3.bf16.msra.mxu0 %v2096_v7  ;;  %1357 = vmatprep.mubr.bf16.mxu0 %v203_v61  ;;  %v204_v7 = vmax.bf16 %v2222_v59, %v102_v4  ;;  %v133_v57 = vmax.bf16 %v132_v49, %v127_v44  ;;  %v2155_v61 = vld [vmem:[%s2723_s1 + $0x3c0] sm:$0xff]   ;;  %v165_v37 = vrot.slane %v28_v34, 2  ;;  %v167_v38 = vrot.slane %v28_v34, 3 }
  0x29   :  { %1897 = vmatprep.subr.bf16.mxu0 %v2098_v8  ;;  %1918 = vmatpush3.bf16.msra.mxu1 %v2097_v9  ;;  %v2128_v8 = vld [vmem:[%s2723_s1 + $0x208] sm:$0xff]   ;;  %v2130_v9 = vld [vmem:[%s2723_s1 + $0x250] sm:$0xff]   ;;  %v155_v58 = vmax.bf16 %v154_v50, %v149_v45  ;;  %v187_v41 = vrot.slane %v28_v34, 6  ;;  %v189_v42 = vrot.slane %v28_v34, 7  ;;  %v192_v43 = vrot.slane %v29_v35, 6 }
  0x2a   :  { %1919 = vmatprep.subr.bf16.mxu1 %v2099_v10  ;;  %v2129_v10 = vld [vmem:[%s2723_s1 + $0x288] sm:$0xff]   ;;  %v194_v44 = vrot.slane %v29_v35, 7  ;;  %v169_v45 = vmax.bf16 %v167_v38, %v165_v37  ;;  %v157_v47 = vrot.slane %v28_v34, 1  ;;  %v181_v56 = vrot.slane %v29_v35, 4 }
  0x2b   :  { %v191_v49 = vmax.bf16 %v189_v42, %v187_v41 }
  0x2c   :  { %1898 = vmatpush3.bf16.msra.mxu0 %v2100_v11  ;;  %v2131_v11 = vld [vmem:[%s2723_s1 + $0x2d0] sm:$0xff]   ;;  %v196_v50 = vmax.bf16 %v194_v44, %v192_v43 }
  0x2d   :  { %1899 = vmatprep.subr.bf16.mxu0 %v2102_v12  ;;  %1920 = vmatpush3.bf16.msra.mxu1 %v2101_v13  ;;  %v2132_v12 = vld [vmem:[%s2723_s1 + $0x210] sm:$0xff]   ;;  %v2134_v13 = vld [vmem:[%s2723_s1 + $0x258] sm:$0xff]  }
  0x2e   :  { %1921 = vmatprep.subr.bf16.mxu1 %v2103_v14  ;;  %v2133_v14 = vld [vmem:[%s2723_s1 + $0x290] sm:$0xff]  }
  0x30   :  { %1900 = vmatpush3.bf16.msra.mxu0 %v2104_v15  ;;  %v2135_v15 = vld [vmem:[%s2723_s1 + $0x2d8] sm:$0xff]  }
  0x31   :  { %1901 = vmatprep.subr.bf16.mxu0 %v2106_v16  ;;  %1922 = vmatpush3.bf16.msra.mxu1 %v2105_v17  ;;  %v2136_v16 = vld [vmem:[%s2723_s1 + $0x218] sm:$0xff]   ;;  %v2138_v17 = vld [vmem:[%s2723_s1 + $0x260] sm:$0xff]  }
  0x32   :  { %1923 = vmatprep.subr.bf16.mxu1 %v2107_v18  ;;  %v2137_v18 = vld [vmem:[%s2723_s1 + $0x298] sm:$0xff]  }
  0x34   :  { %1902 = vmatpush3.bf16.msra.mxu0 %v2108_v19  ;;  %v2139_v19 = vld [vmem:[%s2723_s1 + $0x2e0] sm:$0xff]  }
  0x35   :  { %1903 = vmatprep.subr.bf16.mxu0 %v2110_v20  ;;  %1924 = vmatpush3.bf16.msra.mxu1 %v2109_v21  ;;  %v2140_v20 = vld [vmem:[%s2723_s1 + $0x220] sm:$0xff]   ;;  %v2142_v21 = vld [vmem:[%s2723_s1 + $0x268] sm:$0xff]  }
  0x36   :  { %1925 = vmatprep.subr.bf16.mxu1 %v2111_v22  ;;  %v2141_v22 = vld [vmem:[%s2723_s1 + $0x2a0] sm:$0xff]  }
  0x38   :  { %1904 = vmatpush3.bf16.msra.mxu0 %v2112_v23  ;;  %v2143_v23 = vld [vmem:[%s2723_s1 + $0x2e8] sm:$0xff]  }
  0x39   :  { %1905 = vmatprep.subr.bf16.mxu0 %v2114_v24  ;;  %1926 = vmatpush3.bf16.msra.mxu1 %v2113_v25  ;;  %v2144_v24 = vld [vmem:[%s2723_s1 + $0x228] sm:$0xff]   ;;  %v2146_v25 = vld [vmem:[%s2723_s1 + $0x270] sm:$0xff]  }
  0x3a   :  { %1927 = vmatprep.subr.bf16.mxu1 %v2115_v26  ;;  %v2145_v26 = vld [vmem:[%s2723_s1 + $0x2a8] sm:$0xff]  }
  0x3c   :  { %1906 = vmatpush3.bf16.msra.mxu0 %v2116_v27  ;;  %v2147_v27 = vld [vmem:[%s2723_s1 + $0x2f0] sm:$0xff]  }
  0x3d   :  { %1907 = vmatprep.subr.bf16.mxu0 %v2118_v29  ;;  %1928 = vmatpush3.bf16.msra.mxu1 %v2117_v28  ;;  %v2148_v28 = vld [vmem:[%s2723_s1 + $0x230] sm:$0xff]  }
  0x3e   :  { %1929 = vmatprep.subr.bf16.mxu1 %v2119_v30  ;;  %v2149_v29 = vld [vmem:[%s2723_s1 + $0x2b0] sm:$0xff]   ;;  %v2150_v30 = vld [vmem:[%s2723_s1 + $0x278] sm:$0xff]  }
  0x40   :  { %1908 = vmatpush3.bf16.msra.mxu0 %v2120_v31  ;;  %v2151_v31 = vld [vmem:[%s2723_s1 + $0x2f8] sm:$0xff]  }
  0x41   :  { %1937 = vmatprep.subr.bf16.mxu0 %v2122_v46  ;;  %1930 = vmatpush3.bf16.msra.mxu1 %v2121_v51  ;;  %v115_v46 = vrot.slane %v26_v33, 1  ;;  %v134_v51 = vrot.slane %v26_v33, 4 }
  0x42   :  { %1959 = vmatprep.subr.bf16.mxu1 %v2123_v60 }
  0x43   :  { %1358 = vmatmul.mubr.bf16.vlgmr.msra.gmra.mrb[4].mxu0 %v202_v2  ;;  %v117_v53 = vmax.bf16 %v115_v46, %v26_v33  ;;  %v138_v60 = vmax.bf16 %v136_v52, %v134_v51  ;;  %v209_v2 = vmax.bf16 %v2222_v59, %v155_v58  ;;  %v2184_v33 = vld [vmem:[%s2723_s1 + $0x338] sm:$0xff]   ;;  %v176_v51 = vrot.slane %v28_v34, 4 }
  0x44   :  { %1938 = vmatpush3.bf16.msra.mxu0 %v2124_v1  ;;  %1398 = vmatmul.mubr.bf16.vlgmr.msra.gmra.mrb[4].mxu1 %v204_v7  ;;  %v207_v1 = vmax.bf16 %v2222_v59, %v133_v57  ;;  %v2159_v7 = vld [vmem:[%s2723_s1 + $0x3c8] sm:$0xff]   ;;  %v178_v52 = vrot.slane %v28_v34, 5  ;;  %v197_v57 = vmax.bf16 %v196_v50, %v191_v49 }
  0x45   :  { %1939 = vmatprep.subr.bf16.mxu0 %v2126_v3  ;;  %1960 = vmatpush3.bf16.msra.mxu1 %v2125_v5  ;;  %v122_v62 = vmax.bf16 %v121_v54, %v117_v53  ;;  %v2157_v3 = vld [vmem:[%s2723_s1 + $0x380] sm:$0xff]   ;;  %v144_v5 = vmax.bf16 %v143_v63, %v138_v60  ;;  %v159_v54 = vmax.bf16 %v157_v47, %v28_v34  ;;  %v183_v60 = vrot.slane %v29_v35, 5 }
  0x46   :  { %1961 = vmatprep.subr.bf16.mxu1 %v2127_v6  ;;  %v2158_v6 = vld [vmem:[%s2723_s1 + $0x348] sm:$0xff]   ;;  %1437 = vmatprep.mubr.bf16.mxu0 %v207_v1  ;;  %v180_v58 = vmax.bf16 %v178_v52, %v176_v51  ;;  %v213_v63 = vmax.bf16 %v2222_v59, %v197_v57 }
  0x47   :  { %v206_v4 = vmax.bf16 %v2222_v59, %v122_v62  ;;  %1477 = vmatprep.mubr.bf16.mxu1 %v209_v2 }
  0x48   :  { %1940 = vmatpush3.bf16.msra.mxu0 %v2128_v8  ;;  %v208_v8 = vmax.bf16 %v2222_v59, %v144_v5 }
  0x49   :  { %1941 = vmatprep.subr.bf16.mxu0 %v2130_v9  ;;  %1962 = vmatpush3.bf16.msra.mxu1 %v2129_v10  ;;  %v2160_v9 = vld [vmem:[%s2723_s1 + $0x308] sm:$0xff]  }
  0x4a   :  { %1963 = vmatprep.subr.bf16.mxu1 %v2131_v11  ;;  %v2161_v10 = vld [vmem:[%s2723_s1 + $0x388] sm:$0xff]   ;;  %v2162_v11 = vld [vmem:[%s2723_s1 + $0x350] sm:$0xff]  }
  0x4c   :  { %1942 = vmatpush3.bf16.msra.mxu0 %v2132_v12  ;;  %v2163_v12 = vld [vmem:[%s2723_s1 + $0x3d0] sm:$0xff]  }
  0x4d   :  { %1943 = vmatprep.subr.bf16.mxu0 %v2134_v13  ;;  %1964 = vmatpush3.bf16.msra.mxu1 %v2133_v14  ;;  %v2164_v13 = vld [vmem:[%s2723_s1 + $0x310] sm:$0xff]  }
  0x4e   :  { %1965 = vmatprep.subr.bf16.mxu1 %v2135_v15  ;;  %v2165_v14 = vld [vmem:[%s2723_s1 + $0x390] sm:$0xff]   ;;  %v2166_v15 = vld [vmem:[%s2723_s1 + $0x358] sm:$0xff]  }
  0x50   :  { %1944 = vmatpush3.bf16.msra.mxu0 %v2136_v16  ;;  %v2167_v16 = vld [vmem:[%s2723_s1 + $0x3d8] sm:$0xff]  }
  0x51   :  { %1945 = vmatprep.subr.bf16.mxu0 %v2138_v17  ;;  %1966 = vmatpush3.bf16.msra.mxu1 %v2137_v18  ;;  %v2168_v17 = vld [vmem:[%s2723_s1 + $0x318] sm:$0xff]  }
  0x52   :  { %1967 = vmatprep.subr.bf16.mxu1 %v2139_v19  ;;  %v2169_v18 = vld [vmem:[%s2723_s1 + $0x398] sm:$0xff]   ;;  %v2170_v19 = vld [vmem:[%s2723_s1 + $0x360] sm:$0xff]  }
  0x54   :  { %1946 = vmatpush3.bf16.msra.mxu0 %v2140_v20  ;;  %v2171_v20 = vld [vmem:[%s2723_s1 + $0x3e0] sm:$0xff]  }
  0x55   :  { %1947 = vmatprep.subr.bf16.mxu0 %v2142_v21  ;;  %1968 = vmatpush3.bf16.msra.mxu1 %v2141_v22  ;;  %v2172_v21 = vld [vmem:[%s2723_s1 + $0x320] sm:$0xff]  }
  0x56   :  { %1969 = vmatprep.subr.bf16.mxu1 %v2143_v23  ;;  %v2173_v22 = vld [vmem:[%s2723_s1 + $0x3a0] sm:$0xff]   ;;  %v2174_v23 = vld [vmem:[%s2723_s1 + $0x368] sm:$0xff]  }
  0x58   :  { %1948 = vmatpush3.bf16.msra.mxu0 %v2144_v24  ;;  %v2175_v24 = vld [vmem:[%s2723_s1 + $0x3e8] sm:$0xff]  }
  0x59   :  { %1949 = vmatprep.subr.bf16.mxu0 %v2146_v25  ;;  %1970 = vmatpush3.bf16.msra.mxu1 %v2145_v26  ;;  %v2176_v25 = vld [vmem:[%s2723_s1 + $0x328] sm:$0xff]  }
  0x5a   :  { %1971 = vmatprep.subr.bf16.mxu1 %v2147_v27  ;;  %v2177_v26 = vld [vmem:[%s2723_s1 + $0x3a8] sm:$0xff]   ;;  %v2178_v27 = vld [vmem:[%s2723_s1 + $0x370] sm:$0xff]  }
  0x5c   :  { %1950 = vmatpush3.bf16.msra.mxu0 %v2148_v28  ;;  %v2179_v28 = vld [vmem:[%s2723_s1 + $0x3f0] sm:$0xff]  }
  0x5d   :  { %1951 = vmatprep.subr.bf16.mxu0 %v2150_v30  ;;  %1972 = vmatpush3.bf16.msra.mxu1 %v2149_v29  ;;  %v2180_v29 = vld [vmem:[%s2723_s1 + $0x330] sm:$0xff]  }
  0x5e   :  { %1973 = vmatprep.subr.bf16.mxu1 %v2151_v31  ;;  %v2181_v30 = vld [vmem:[%s2723_s1 + $0x3b0] sm:$0xff]   ;;  %v2182_v31 = vld [vmem:[%s2723_s1 + $0x378] sm:$0xff]  }
  0x60   :  { %1952 = vmatpush3.bf16.msra.mxu0 %v2152_v32  ;;  %v2183_v32 = vld [vmem:[%s2723_s1 + $0x3f8] sm:$0xff]  }
  0x61   :  { %1981 = vmatprep.subr.bf16.mxu0 %v2154_v39  ;;  %1974 = vmatpush3.bf16.msra.mxu1 %v2153_v48  ;;  %v170_v39 = vrot.slane %v29_v35, 2  ;;  %v161_v48 = vrot.slane %v29_v35, 1 }
  0x62   :  { %2003 = vmatprep.subr.bf16.mxu1 %v2155_v61 }
  0x63   :  { %1438 = vmatmul.mubr.bf16.vlgmr.msra.gmra.mrb[8].mxu0 %v206_v4  ;;  %v174_v46 = vmax.bf16 %v172_v40, %v170_v39  ;;  %v163_v55 = vmax.bf16 %v161_v48, %v29_v35 }
  0x64   :  { %1982 = vmatpush3.bf16.msra.mxu0 %v2156_v0  ;;  %1478 = vmatmul.mubr.bf16.vlgmr.msra.gmra.mrb[8].mxu1 %v208_v8  ;;  %v185_v0 = vmax.bf16 %v183_v60, %v181_v56 }
  0x65   :  { %1983 = vmatprep.subr.bf16.mxu0 %v2158_v6  ;;  %2004 = vmatpush3.bf16.msra.mxu1 %v2157_v3  ;;  %v175_v53 = vmax.bf16 %v174_v46, %v169_v45  ;;  %v164_v62 = vmax.bf16 %v163_v55, %v159_v54 }
  0x66   :  { %2005 = vmatprep.subr.bf16.mxu1 %v2159_v7 }
  0x67   :  { %v211_v61 = vmax.bf16 %v2222_v59, %v175_v53  ;;  %v210_v1 = vmax.bf16 %v2222_v59, %v164_v62 }
  0x68   :  { %1984 = vmatpush3.bf16.msra.mxu0 %v2160_v9 }
  0x69   :  { %1985 = vmatprep.subr.bf16.mxu0 %v2162_v11  ;;  %2006 = vmatpush3.bf16.msra.mxu1 %v2161_v10 }
  0x6a   :  { %2007 = vmatprep.subr.bf16.mxu1 %v2163_v12  ;;  %1517 = vmatprep.mubr.bf16.mxu0 %v211_v61 }
  0x6c   :  { %1986 = vmatpush3.bf16.msra.mxu0 %v2164_v13 }
  0x6d   :  { %1987 = vmatprep.subr.bf16.mxu0 %v2166_v15  ;;  %2008 = vmatpush3.bf16.msra.mxu1 %v2165_v14 }
  0x6e   :  { %2009 = vmatprep.subr.bf16.mxu1 %v2167_v16 }
  0x70   :  { %1988 = vmatpush3.bf16.msra.mxu0 %v2168_v17 }
  0x71   :  { %1989 = vmatprep.subr.bf16.mxu0 %v2170_v19  ;;  %2010 = vmatpush3.bf16.msra.mxu1 %v2169_v18 }
  0x72   :  { %2011 = vmatprep.subr.bf16.mxu1 %v2171_v20 }
  0x74   :  { %1990 = vmatpush3.bf16.msra.mxu0 %v2172_v21 }
  0x75   :  { %1991 = vmatprep.subr.bf16.mxu0 %v2174_v23  ;;  %2012 = vmatpush3.bf16.msra.mxu1 %v2173_v22 }
  0x76   :  { %2013 = vmatprep.subr.bf16.mxu1 %v2175_v24 }
  0x78   :  { %1992 = vmatpush3.bf16.msra.mxu0 %v2176_v25 }
  0x79   :  { %1993 = vmatprep.subr.bf16.mxu0 %v2178_v27  ;;  %2014 = vmatpush3.bf16.msra.mxu1 %v2177_v26 }
  0x7a   :  { %2015 = vmatprep.subr.bf16.mxu1 %v2179_v28 }
  0x7c   :  { %1994 = vmatpush3.bf16.msra.mxu0 %v2180_v29 }
  0x7d   :  { %1995 = vmatprep.subr.bf16.mxu0 %v2182_v31  ;;  %2016 = vmatpush3.bf16.msra.mxu1 %v2181_v30 }
  0x7e   :  { %2017 = vmatprep.subr.bf16.mxu1 %v2183_v32 }
  0x80   :  { %1996 = vmatpush3.bf16.msra.mxu0 %v2184_v33 }
  0x81   :  { %2018 = vmatpush3.bf16.msra.mxu1 %v2185_v36 }
  0x82   :  { %10 = vsyncpa [#allocation3], 0  ;;  %1557 = vmatprep.mubr.bf16.mxu1 %v213_v63  ;;  %v186_v2 = vmax.bf16 %v185_v0, %v180_v58  ;;  %v2186_v4 = vld [vmem:[%s2725_s3] sm:$0xff]   ;;  %v2223_v5 = vmov 0.0   ;;  %v2187_v6 = vld [vmem:[%s2725_s3 + $0x8] sm:$0xff]   ;;  %vm2224_vm0 = vmmov 0   ;;  %v1678_v0 = vlaneseq }
  0x83   :  { %1518 = vmatmul.mubr.bf16.vlgmr.msra.gmra.mrb[12].mxu0 %v210_v1  ;;  %2034 = vmatprep.subr.bf16.mxu0 %v2223_v5  ;;  %v2188_v7 = vld [vmem:[%s2725_s3 + $0x10] sm:$0xff]   ;;  %v2190_v8 = vld [vmem:[%s2725_s3 + $0x20] sm:$0xff]   ;;  %v2191_v9 = vld [vmem:[%s2725_s3 + $0x28] sm:$0xff]   ;;  %vm1682_vm2 = vcmask 1041408  }
  0x84   :  { %v212_v3 = vmax.bf16 %v2222_v59, %v186_v2  ;;  %2035 = vmatpush3.bf16.msra.mxu0 %v2186_v4  ;;  %v2189_v59 = vld [vmem:[%s2725_s3 + $0x18] sm:$0xff]   ;;  %v2192_v10 = vld [vmem:[%s2725_s3 + $0x30] sm:$0xff]   ;;  %2050 = vmatprep.mubr.msk.bf16.mxu0 %vm2224_vm0, %v2223_v5  ;;  %v1711_v13 = vld [vmem:[%s2724_s2] ss:$0 sm:$0xff]  ;;  %v1679_v1 = vand.u32 127, %v1678_v0 }
  0x85   :  { %2036 = vmatprep.subr.bf16.mxu0 %v2223_v5  ;;  %v2193_v11 = vld [vmem:[%s2725_s3 + $0x38] sm:$0xff]   ;;  %v1840_v2 = vld [vmem:[%s2726_s4] ss:$0 sm:$0xff]  ;;  %s2225_s4 = smov [#allocation2]  }
  0x86   :  { %1558 = vmatmul.mubr.bf16.vlgmr.msra.gmra.mrb[12].mxu1 %v212_v3  ;;  %vm1680_vm1 = vcmp.lt.s32.totalorder %v1679_v1, 10  ;;  %s1703_s6 = sshll.u32 %s2225_s4, 4  ;;  %s1704_s6 = int_to_ptr.vmem [resolvable:$true] %s1703_s6 }
  0x87   :  { %s2198_s7 = scalar_lea.vmem %s1704_s6, 32  ;;  %p2203_p1 = scmp.lt.s32.totalorder %s1704_s6, %s1704_s6 }
  0x88   :  { %2037 = vmatpush3.bf16.msra.mxu0 %v2187_v6  ;;  %p2199_p0 = scmp.ne.s32.totalorder %s1704_s6, %s2198_s7  ;;  %p2204_p2 = scmp.lt.s32.totalorder %s2198_s7, %s2198_s7 }
  0x89   :  { %2038 = vmatprep.subr.bf16.mxu0 %v2223_v5 }
  0x8a   :  { %p2205_p3 = por %p2204_p2, %p2203_p1 }
  0x8c   :  { %2039 = vmatpush3.bf16.msra.mxu0 %v2188_v7  ;;  %p2206_p4 = pnand %p2205_p3, %p2199_p0 }
  0x8d   :  { %2040 = vmatprep.subr.bf16.mxu0 %v2223_v5 }
  0x90   :  { %2041 = vmatpush3.bf16.msra.mxu0 %v2189_v59 }
  0x91   :  { %2042 = vmatprep.subr.bf16.mxu0 %v2223_v5 }
  0x94   :  { %2043 = vmatpush3.bf16.msra.mxu0 %v2190_v8 }
  0x95   :  { %2044 = vmatprep.subr.bf16.mxu0 %v2223_v5 }
  0x98   :  { %2045 = vmatpush3.bf16.msra.mxu0 %v2191_v9 }
  0x99   :  { %2046 = vmatprep.subr.bf16.mxu0 %v2223_v5 }
  0x9c   :  { %2047 = vmatpush3.bf16.msra.mxu0 %v2192_v10 }
  0x9d   :  { %2048 = vmatprep.subr.bf16.mxu0 %v2223_v5 }
  0xa0   :  { %2049 = vmatpush3.bf16.msra.mxu0 %v2193_v11 }
  0xf6   :  { %v1865_v12 = vpop.f32.mrb[0].mxu0 }
  0xf7   :  { %v1866_v14 = vpop.f32.mrb[1].mxu0  ;;  %v1887_v17 = vpop.f32.mrb[0].mxu1 }
  0xf8   :  { %v1867_v15 = vadd.f32 %v1866_v14, %v1865_v12  ;;  %v1868_v16 = vpop.f32.mrb[2].mxu0  ;;  %v1888_v20 = vpop.f32.mrb[1].mxu1 }
  0xf9   :  { %v1869_v18 = vpop.f32.mrb[3].mxu0  ;;  %v1889_v21 = vadd.f32 %v1888_v20, %v1887_v17  ;;  %v1890_v22 = vpop.f32.mrb[2].mxu1 }
  0xfa   :  { %v1280_v19 = vadd.f32 %v1867_v15, %v1711_v13  ;;  %v1891_v23 = vpop.f32.mrb[3].mxu1 }
  0xfc   :  { %v1320_v24 = vadd.f32 %v1889_v21, %v1280_v19 }
 0x116   :  { %v1909_v25 = vpop.f32.mrb[4].mxu0 }
 0x117   :  { %v1910_v26 = vpop.f32.mrb[5].mxu0  ;;  %v1931_v29 = vpop.f32.mrb[4].mxu1 }
 0x118   :  { %v1911_v27 = vadd.f32 %v1910_v26, %v1909_v25  ;;  %v1912_v28 = vpop.f32.mrb[6].mxu0  ;;  %v1932_v32 = vpop.f32.mrb[5].mxu1 }
 0x119   :  { %v1913_v30 = vpop.f32.mrb[7].mxu0  ;;  %v1933_v33 = vadd.f32 %v1932_v32, %v1931_v29  ;;  %v1934_v34 = vpop.f32.mrb[6].mxu1 }
 0x11a   :  { %v1360_v31 = vadd.f32 %v1911_v27, %v1320_v24  ;;  %v1935_v35 = vpop.f32.mrb[7].mxu1 }
 0x11c   :  { %v1400_v36 = vadd.f32 %v1933_v33, %v1360_v31 }
 0x136   :  { %v1953_v37 = vpop.f32.mrb[8].mxu0 }
 0x137   :  { %v1954_v38 = vpop.f32.mrb[9].mxu0  ;;  %v1975_v39 = vpop.f32.mrb[8].mxu1 }
 0x138   :  { %v1955_v40 = vadd.f32 %v1954_v38, %v1953_v37  ;;  %v1956_v41 = vpop.f32.mrb[10].mxu0  ;;  %v1976_v42 = vpop.f32.mrb[9].mxu1 }
 0x139   :  { %v1957_v43 = vpop.f32.mrb[11].mxu0  ;;  %v1977_v45 = vadd.f32 %v1976_v42, %v1975_v39  ;;  %v1978_v46 = vpop.f32.mrb[10].mxu1 }
 0x13a   :  { %v1440_v44 = vadd.f32 %v1955_v40, %v1400_v36  ;;  %v1979_v47 = vpop.f32.mrb[11].mxu1 }
 0x13c   :  { %v1480_v48 = vadd.f32 %v1977_v45, %v1440_v44 }
 0x156   :  { %v1997_v49 = vpop.f32.mrb[12].mxu0 }
 0x157   :  { %v1998_v50 = vpop.f32.mrb[13].mxu0 }
 0x158   :  { %v1999_v51 = vadd.f32 %v1998_v50, %v1997_v49  ;;  %v2000_v52 = vpop.f32.mrb[14].mxu0 }
 0x159   :  { %v2019_v53 = vpop.f32.mrb[12].mxu1  ;;  %v2001_v54 = vpop.f32.mrb[15].mxu0 }
 0x15a   :  { %v1520_v55 = vadd.f32 %v1999_v51, %v1480_v48  ;;  %v2020_v56 = vpop.f32.mrb[13].mxu1 }
 0x15b   :  { %v2021_v57 = vadd.f32 %v2020_v56, %v2019_v53  ;;  %v2022_v58 = vpop.f32.mrb[14].mxu1 }
 0x15c   :  { %v2023_v60 = vpop.f32.mrb[15].mxu1 }
 0x15d   :  { %v1560_v61 = vadd.f32 %v2021_v57, %v1520_v55 }
 0x15f   :  { %v1565_v62 = vmax.f32 %v1560_v61, 0.0 }
 0x161   :  { %v1566_v63 = vpack.c.bf16 %v1565_v62, %v1565_v62 }
 0x163   :  { %2051 = vmatmul.mubr.bf16.vlgmr.msra.gmra.mrb[16].mxu0 %v1566_v63 }
 0x236   :  { %v1672_v3 = vpop.f32.mrb[16].mxu0 }
 0x237   :  { %v1673_v4 = vadd.f32 %v1840_v2, %v1672_v3  ;;  %v2052_v5 = vpop.f32.mrb[17].mxu0 }
 0x238   :  { %v1675_v6 = vpop.f32.mrb[18].mxu0 }
 0x239   :  { %v2053_v7 = vpop.f32.mrb[19].mxu0  ;;  %v1681_v59 = vsel %vm1680_vm1, %v1673_v4, -1e+30 }
 0x23a   :  { %v1683_v8 = vsel %vm1682_vm2, %v1681_v59, -inf }
 0x23b   :  { %1684 = vmax.xlane.f32.xlu0 %v1683_v8 }
 0x2c8   :  { %v1685_v9 = vpop.xlane.xlu0 %1684 }
 0x2c9   :  { %v1686_v10 = vsub.f32 %v1681_v59, %v1685_v9 }
 0x2cb   :  { %v1687_v11 = vmul.f32 1.442695, %v1686_v10 }
 0x2cd   :  { %2194 = vpow2.f32 %v1687_v11 }
 0x2d7   :  { %v2195_v12 = vpop.eup %2194 }
 0x2d8   :  { %v1689_v13 = vsel %vm1682_vm2, %v2195_v12, 0.0 }
 0x2d9   :  { %1690 = vadd.xlane.f32.xlu0 %v1689_v13 }
 0x366   :  { %v1691_v14 = vpop.xlane.xlu0 %1690 }
 0x367   :  { %2196 = vlog2.f32 %v1691_v14 }
 0x371   :  { %v2197_v15 = vpop.eup %2196 }
 0x372   :  { %v1693_v16 = vmul.f32 0.6931472, %v2197_v15 }
 0x374   :  { %v1694_v17 = vadd.f32 %v1693_v16, %v1685_v9 }
 0x376   :  { %v1695_v18 = vsub.f32 %v1681_v59, %v1694_v17 }
 0x378   :  { %1696 = vst [vmem:[#allocation2] sm:$0x3] %v1695_v18 }
 0x379   :  { %2209 = shalt.err (!%p2206_p4)
}
 0x37a   :  { %s2210_s10 = scalar_lea.hbm %s2727_s5, 32 }
 0x37b   :  { %p2211_p5 = scmp.ne.s32.totalorder %s2727_s5, %s2210_s10  ;;  %p2214_p6 = scmp.lt.u32.totalorder %s2210_s10, %s2727_s5 }
 0x37d   :  { %p2216_p7 = pnand %p2214_p6, %p2211_p5 }
 0x37f   :  { %2219 = shalt.err (!%p2216_p7)
}
 0x380   :  { %1706 = dma.vmem_to_hbm [thread:$0]  %s1704_s6, 32, %s2727_s5, [#allocation3]  }
 0x381   :  { %2220 = dma.done.wait [#allocation3], 32  }
 0x382   :  { %2221 = vsyncadd [#allocation3], 4294967264 }
 0x383   :  { %1710 = vsyncpa [#allocation3], 1 }

// kernel: custom_net_forward.4
= control target key start
LH: loop header
LB: loop body
LE: loop exit
PB: predicated region body
PF: predicated region fallthrough
CT: control target
= control target key end

     0   :  { %s9192_s12 = smov 0   ;;  %s10551_s0 = inlined_call_operand.vmem [shape: bf16[2,12,12,128], index: 0, kind: input, shape index: {}]   ;;  %s10552_s1 = inlined_call_operand.vmem [shape: bf16[25,128,128], index: 1, kind: input, shape index: {}]   ;;  %s10553_s2 = inlined_call_operand.vmem [shape: f32[1,128], index: 2, kind: input, shape index: {}]   ;;  %s10554_s3 = inlined_call_operand.vmem [shape: bf16[128,128], index: 3, kind: output, shape index: {}]  }
   0x1 LB: > { %s9198_s13 = sadd.s32 4294967295, %s9170_s12   ;;  %p6729_p0 = scmp.ge.s32.totalorder %s9170_s12, 1  ;;  %s9170_s12 = sphi %s9192_s12, %s13_s12  }
   0x2   : > { %p137_p1 = scmp.lt.s32.totalorder %s9170_s12, 3 }
   0x4   : > { %p138_p2 = pnand %p6729_p0, %p137_p1 }
   0x5   : > { %v8944_v0 = vld [vmem:[%s10552_s1] sm:$0xff] (!%p138_p2)   ;;  %v8946_v2 = vld [vmem:[%s10552_s1 + $0x8] sm:$0xff] (!%p138_p2)   ;;  %p161_p3 = scmp.lt.s32.totalorder (!%p138_p2), %s9198_s13, 1  ;;  %v8948_v4 = vld [vmem:[%s10552_s1 + $0x10] sm:$0xff] (!%p138_p2)   ;;  %vm699_vm0 = vcmask (!%p138_p2), 1042432   ;;  %vm700_vm1 = vcmask (!%p138_p2), 1046532  }
   0x6   : > { %141 = sbr.rel (%p138_p2) target bundleno = 653 (0x28d), region = 32  ;;  %v8945_v1 = vld [vmem:[%s10552_s1 + $0x300] sm:$0xff] (!%p138_p2)   ;;  %8127 = vmatprep.subr.bf16.mxu1 (!%p138_p2), %v8944_v0  ;;  %v8947_v3 = vld [vmem:[%s10552_s1 + $0x308] sm:$0xff] (!%p138_p2)   ;;  %v8949_v5 = vld [vmem:[%s10552_s1 + $0x310] sm:$0xff] (!%p138_p2)   ;;  %vm382_vm3 = vsmask.f32 (!%p138_p2), 3328 }
   0x7   : > { %8415 = vmatprep.subr.bf16.mxu0 (!%p138_p2), %v8945_v1  ;;  %8128 = vmatpush3.bf16.msra.mxu1 (!%p138_p2), %v8944_v0  ;;  %v8950_v6 = vld [vmem:[%s10552_s1 + $0x18] sm:$0xff] (!%p138_p2)   ;;  %v8952_v8 = vld [vmem:[%s10552_s1 + $0x20] sm:$0xff] (!%p138_p2)   ;;  %v8954_v10 = vld [vmem:[%s10552_s1 + $0x28] sm:$0xff] (!%p138_p2)   ;;  %vm383_vm4 = vsmask.f32 (!%p138_p2), 7440  ;;  %vm1269_vm9 = vcmask (!%p138_p2), 1041408  }
   0x8   : > { %8416 = vmatpush3.bf16.msra.mxu0 (!%p138_p2), %v8945_v1  ;;  %8129 = vmatprep.subr.bf16.mxu1 (!%p138_p2), %v8946_v2  ;;  %v8951_v7 = vld [vmem:[%s10552_s1 + $0x318] sm:$0xff] (!%p138_p2)   ;;  %v8953_v9 = vld [vmem:[%s10552_s1 + $0x320] sm:$0xff] (!%p138_p2)   ;;  %v8955_v12 = vld [vmem:[%s10552_s1 + $0x328] sm:$0xff] (!%p138_p2)   ;;  %vm920_vm5 = vsmask.f32 (!%p138_p2), 2304  ;;  %vm1270_vm10 = vcmask (!%p138_p2), 1045508  }
   0x9   : > { %8417 = vmatprep.subr.bf16.mxu0 (!%p138_p2), %v8947_v3  ;;  %v8956_v13 = vld [vmem:[%s10552_s1 + $0x30] sm:$0xff] (!%p138_p2)   ;;  %vm9249_vm2 = vmor (!%p138_p2), %vm699_vm0, %vm700_vm1  ;;  %v8958_v25 = vld [vmem:[%s10552_s1 + $0x38] sm:$0xff] (!%p138_p2)   ;;  %vm921_vm6 = vsmask.f32 (!%p138_p2), 6416 }
   0xa   : > { %v8957_v23 = vld [vmem:[%s10552_s1 + $0x330] sm:$0xff] (!%p138_p2)   ;;  %v8959_v36 = vld [vmem:[%s10552_s1 + $0x338] sm:$0xff] (!%p138_p2)   ;;  %v8961_v37 = vld [vmem:[%s10552_s1 + $0x40] sm:$0xff] (!%p138_p2)  }
   0xb   : > { %8130 = vmatpush3.bf16.msra.mxu1 (!%p138_p2), %v8946_v2  ;;  %v8962_v40 = vld [vmem:[%s10552_s1 + $0x340] sm:$0xff] (!%p138_p2)   ;;  %v8964_v43 = vld [vmem:[%s10552_s1 + $0x48] sm:$0xff] (!%p138_p2)   ;;  %v8966_v45 = vld [vmem:[%s10552_s1 + $0x50] sm:$0xff] (!%p138_p2)  }
   0xc   : > { %8418 = vmatpush3.bf16.msra.mxu0 (!%p138_p2), %v8947_v3  ;;  %8131 = vmatprep.subr.bf16.mxu1 (!%p138_p2), %v8948_v4  ;;  %v8965_v44 = vld [vmem:[%s10552_s1 + $0x348] sm:$0xff] (!%p138_p2)   ;;  %v8967_v47 = vld [vmem:[%s10552_s1 + $0x350] sm:$0xff] (!%p138_p2)   ;;  %v8968_v54 = vld [vmem:[%s10552_s1 + $0x58] sm:$0xff] (!%p138_p2)  }
   0xd   : > { %s162_s26 = scalar_select %p161_p3, %s9198_s13, 1  ;;  %8419 = vmatprep.subr.bf16.mxu0 %v8949_v5  ;;  %v8969_v57 = vld [vmem:[%s10552_s1 + $0x358] sm:$0xff]   ;;  %vm9348_vm7 = vmor %vm382_vm3, %vm383_vm4 }
   0xe   : > { %vm9367_vm8 = vmor %vm920_vm5, %vm921_vm6 }
   0xf   : > { %8132 = vmatpush3.bf16.msra.mxu1 %v8948_v4  ;;  %s8935_s4 = smul.u32 96, %s162_s26  ;;  %vm9481_vm11 = vmor %vm1269_vm9, %vm1270_vm10 }
  0x10   : > { %8420 = vmatpush3.bf16.msra.mxu0 %v8949_v5  ;;  %8133 = vmatprep.subr.bf16.mxu1 %v8950_v6 }
  0x11   : > { %8421 = vmatprep.subr.bf16.mxu0 %v8951_v7  ;;  %s9240_s15 = scalar_lea.vmem %s10551_s0, %s8935_s4 }
  0x12   : > { %v8960_v11 = vld [vmem:[%s9240_s15] ss:$8 sps:$4 sm:$0xff]   ;;  %v7181_v15 = vld [vmem:[%s9240_s15 + $0x10] sm:$0xe]  ;;  %v7182_v16 = vld [vmem:[%s9240_s15 + $0x14] sm:$0x1] }
  0x13   : > { %8134 = vmatpush3.bf16.msra.mxu1 %v8950_v6  ;;  %8143 = vmatprep.mubr.bf16.mxu1 %v8960_v11  ;;  %v7183_v17 = vld [vmem:[%s9240_s15 + $0x18] sm:$0xe]  ;;  %v7184_v18 = vld [vmem:[%s9240_s15 + $0x1c] sm:$0x1]  ;;  %v7197_v19 = vrot.slane %v7181_v15, 9  ;;  %v3276_v20 = vrot.slane %v7182_v16, 5 }
  0x14   : > { %8422 = vmatpush3.bf16.msra.mxu0 %v8951_v7  ;;  %8135 = vmatprep.subr.bf16.mxu1 %v8952_v8  ;;  %v7198_v21 = vrot.slane %v7183_v17, 9  ;;  %v3280_v22 = vrot.slane %v7184_v18, 5  ;;  %v7185_v27 = vld [vmem:[%s9240_s15 + $0x20] sm:$0xe]  ;;  %v7186_v28 = vld [vmem:[%s9240_s15 + $0x24] sm:$0x1] }
  0x15   : > { %8423 = vmatprep.subr.bf16.mxu0 %v8953_v9  ;;  %v3277_v24 = vsel %vm9249_vm2, %v7197_v19, %v3276_v20  ;;  %v7187_v30 = vld [vmem:[%s9240_s15 + $0x28] sm:$0xe]  ;;  %v7188_v31 = vld [vmem:[%s9240_s15 + $0x2c] sm:$0x1]  ;;  %v7199_v32 = vrot.slane %v7185_v27, 9  ;;  %v3284_v33 = vrot.slane %v7186_v28, 5 }
  0x16   : > { %v3281_v26 = vsel %vm9249_vm2, %v7198_v21, %v3280_v22  ;;  %v7200_v34 = vrot.slane %v7187_v30, 9  ;;  %v3288_v35 = vrot.slane %v7188_v31, 5  ;;  %v8963_v41 = vld [vmem:[%s9240_s15 + $0x10] ss:$8 sps:$4 sm:$0xff]   ;;  %v8974_v46 = vld [vmem:[%s9240_s15 + $0x20] ss:$8 sps:$4 sm:$0xff]  }
  0x17   : > { %8136 = vmatpush3.bf16.msra.mxu1 %v8952_v8  ;;  %v7221_v29 = vcombine.low %v3277_v24, %v3281_v26  ;;  %v3285_v38 = vsel %vm9249_vm2, %v7199_v32, %v3284_v33  ;;  %v7189_v48 = vld [vmem:[%s9240_s15 + $0x30] sm:$0xe]  ;;  %v7190_v49 = vld [vmem:[%s9240_s15 + $0x34] sm:$0x1]  ;;  %v7191_v50 = vld [vmem:[%s9240_s15 + $0x38] sm:$0xe] }
  0x18   : > { %8424 = vmatpush3.bf16.msra.mxu0 %v8953_v9  ;;  %8137 = vmatprep.subr.bf16.mxu1 %v8954_v10  ;;  %v3289_v39 = vsel %vm9249_vm2, %v7200_v34, %v3288_v35  ;;  %v7192_v51 = vld [vmem:[%s9240_s15 + $0x3c] sm:$0x1]  ;;  %v7201_v52 = vrot.slane %v7189_v48, 9  ;;  %v3292_v53 = vrot.slane %v7190_v49, 5  ;;  %v7202_v55 = vrot.slane %v7191_v50, 9  ;;  %v8970_v7 = vld [vmem:[%s10552_s1 + $0x60] sm:$0xff]  }
  0x19   : > { %8425 = vmatprep.subr.bf16.mxu0 %v8955_v12  ;;  %8431 = vmatprep.mubr.bf16.mxu0 %v7221_v29  ;;  %v7222_v42 = vcombine.low %v3285_v38, %v3289_v39  ;;  %v3296_v56 = vrot.slane %v7192_v51, 5  ;;  %v8977_v60 = vld [vmem:[%s9240_s15 + $0x30] ss:$8 sps:$4 sm:$0xff]   ;;  %v7193_v61 = vld [vmem:[%s9240_s15 + $0x40] sm:$0xe]  ;;  %v8972_v16 = vld [vmem:[%s10552_s1 + $0x68] sm:$0xff]  }
  0x1a   : > { %v3293_v58 = vsel %vm9249_vm2, %v7201_v52, %v3292_v53  ;;  %v7194_v62 = vld [vmem:[%s9240_s15 + $0x44] sm:$0x1]  ;;  %v7195_v0 = vld [vmem:[%s9240_s15 + $0x48] sm:$0xe]  ;;  %v7196_v1 = vld [vmem:[%s9240_s15 + $0x4c] sm:$0x1] }
  0x1b   : > { %8138 = vmatpush3.bf16.msra.mxu1 %v8954_v10  ;;  %v3297_v59 = vsel %vm9249_vm2, %v7202_v55, %v3296_v56  ;;  %v7203_v2 = vrot.slane %v7193_v61, 9  ;;  %v3300_v3 = vrot.slane %v7194_v62, 5  ;;  %v7204_v4 = vrot.slane %v7195_v0, 9  ;;  %v366_v9 = vld [vmem:[%s9240_s15] sm:$0xf]  ;;  %v8973_v21 = vld [vmem:[%s10552_s1 + $0x368] sm:$0xff]  }
  0x1c   : > { %8426 = vmatpush3.bf16.msra.mxu0 %v8955_v12  ;;  %8139 = vmatprep.subr.bf16.mxu1 %v8956_v13  ;;  %v7223_v63 = vcombine.low %v3293_v58, %v3297_v59  ;;  %v3304_v5 = vrot.slane %v7196_v1, 5  ;;  %v367_v10 = vld [vmem:[%s9240_s15 + $0x4] sm:$0x1]  ;;  %v369_v15 = vld [vmem:[%s9240_s15 + $0xc] sm:$0x1]  ;;  %v386_v17 = vshrl.u32 %v366_v9, 16 }
  0x1d   : > { %8427 = vmatprep.subr.bf16.mxu0 %v8957_v23  ;;  %v3301_v6 = vsel %vm9249_vm2, %v7203_v2, %v3300_v3  ;;  %v8971_v11 = vld [vmem:[%s10552_s1 + $0x360] sm:$0xff]   ;;  %v389_v18 = vshll.u32 %v366_v9, 16  ;;  %v395_v19 = vshll.u32 %v367_v10, 16  ;;  %v7233_v28 = vld [vmem:[%s9240_s15 + $0x10] sm:$0xe]  ;;  %v8978_v52 = vld [vmem:[%s10552_s1 + $0x78] sm:$0xff]  }
  0x1e   : > { %v3305_v8 = vsel %vm9249_vm2, %v7204_v4, %v3304_v5  ;;  %v388_v24 = vrot.slane %v386_v17, 4  ;;  %v8975_v31 = vld [vmem:[%s10552_s1 + $0x70] sm:$0xff]   ;;  %v7235_v34 = vld [vmem:[%s9240_s15 + $0x18] sm:$0xe]  ;;  %v3493_v35 = vshrl.u32 %v7233_v28, 16 }
  0x1f   : > { %8140 = vmatpush3.bf16.msra.mxu1 %v8956_v13  ;;  %v7224_v12 = vcombine.low %v3301_v6, %v3305_v8  ;;  %v368_v13 = vld [vmem:[%s9240_s15 + $0x8] sm:$0xf]  ;;  %v397_v26 = vrot.slane %v395_v19, 5  ;;  %v7234_v33 = vld [vmem:[%s9240_s15 + $0x14] sm:$0x3]  ;;  %v8979_v59 = vld [vmem:[%s10552_s1 + $0x378] sm:$0xff]  }
  0x20   : > { %8428 = vmatpush3.bf16.msra.mxu0 %v8957_v23  ;;  %8141 = vmatprep.subr.bf16.mxu1 %v8958_v25  ;;  %v400_v20 = vshrl.u32 %v368_v13, 16  ;;  %v403_v22 = vshll.u32 %v368_v13, 16  ;;  %v409_v23 = vshll.u32 %v369_v15, 16  ;;  %v371_v58 = vld [vmem:[%s9240_s15 + $0x14] sm:$0x1]  ;;  %v8980_v13 = vld [vmem:[%s10552_s1 + $0x80] sm:$0xff]  }
  0x21   : > { %8429 = vmatprep.subr.bf16.mxu0 %v8959_v36  ;;  %v372_v0 = vld [vmem:[%s9240_s15 + $0x18] sm:$0xf]  ;;  %v373_v6 = vld [vmem:[%s9240_s15 + $0x1c] sm:$0x1]  ;;  %v7239_v19 = vld [vmem:[%s9240_s15 + $0x28] sm:$0xe] }
  0x22   : > { %v402_v27 = vrot.slane %v400_v20, 4  ;;  %v405_v29 = vrot.slane %v403_v22, 5  ;;  %v411_v30 = vrot.slane %v409_v23, 5  ;;  %v428_v17 = vshrl.u32 %v372_v0, 16 }
  0x23   : > { %8142 = vmatpush3.bf16.msra.mxu1 %v8958_v25  ;;  %v391_v25 = vrot.slane %v389_v18, 5  ;;  %v431_v18 = vshll.u32 %v372_v0, 16  ;;  %v8984_v0 = vld [vmem:[%s10552_s1 + $0x90] sm:$0xff]  }
  0x24   : > { %8430 = vmatpush3.bf16.msra.mxu0 %v8959_v36  ;;  %8151 = vmatprep.subr.bf16.mxu1 %v8961_v37  ;;  %v3496_v36 = vshll.u32 %v7233_v28, 16  ;;  %v406_v39 = vor.u32 %v405_v29, %v402_v27 }
  0x25   : > { %8439 = vmatprep.subr.bf16.mxu0 %v8962_v40  ;;  %v392_v32 = vor.u32 %v391_v25, %v388_v24  ;;  %v437_v24 = vshll.u32 %v373_v6, 16  ;;  %v7240_v25 = vld [vmem:[%s9240_s15 + $0x2c] sm:$0x3]  ;;  %v433_v27 = vrot.slane %v431_v18, 5 }
  0x26   : > { %8144 = vmatmul.mubr.bf16.vlgmr.msra.gmra.mrb[0].mxu1 %v8963_v41  ;;  %v3502_v41 = vshrl.u32 %v7234_v33, 16  ;;  %v407_v48 = vrot.slane %v406_v39, 4 }
  0x27   : > { %8152 = vmatpush3.bf16.msra.mxu1 %v8961_v37  ;;  %8432 = vmatmul.mubr.bf16.vlgmr.msra.gmra.mrb[0].mxu0 %v7222_v42  ;;  %v8976_v37 = vld [vmem:[%s10552_s1 + $0x370] sm:$0xff]   ;;  %v3505_v42 = vshll.u32 %v7234_v33, 16 }
  0x28   : > { %8440 = vmatpush3.bf16.msra.mxu0 %v8962_v40  ;;  %8153 = vmatprep.subr.bf16.mxu1 %v8964_v43  ;;  %v7236_v40 = vld [vmem:[%s9240_s15 + $0x1c] sm:$0x3]  ;;  %v3504_v49 = vrot.slane %v3502_v41, 5 }
  0x29   : > { %8441 = vmatprep.subr.bf16.mxu0 %v8965_v44  ;;  %8147 = vmatprep.mubr.bf16.mxu1 %v8974_v46  ;;  %v3498_v46 = vrot.slane %v3496_v36, 6  ;;  %v3507_v50 = vrot.slane %v3505_v42, 6  ;;  %v3520_v56 = vshrl.u32 %v7236_v40, 16  ;;  %v3547_v42 = vshrl.u32 %v7239_v19, 16 }
  0x2a   : > { %8435 = vmatprep.mubr.bf16.mxu0 %v7223_v63  ;;  %v3523_v63 = vshll.u32 %v7236_v40, 16 }
  0x2b   : > { %8154 = vmatpush3.bf16.msra.mxu1 %v8964_v43  ;;  %v3511_v43 = vshrl.u32 %v7235_v34, 16  ;;  %v3508_v62 = vor.u32 %v3507_v50, %v3504_v49  ;;  %v3522_v5 = vrot.slane %v3520_v56, 5  ;;  %v3549_v49 = vrot.slane %v3547_v42, 5 }
  0x2c   : > { %8442 = vmatpush3.bf16.msra.mxu0 %v8965_v44  ;;  %8155 = vmatprep.subr.bf16.mxu1 %v8966_v45  ;;  %v393_v44 = vrot.slane %v392_v32, 4  ;;  %v3525_v8 = vrot.slane %v3523_v63, 6  ;;  %v439_v32 = vrot.slane %v437_v24, 5  ;;  %v3559_v50 = vshll.u32 %v7240_v25, 16 }
  0x2d   : > { %8443 = vmatprep.subr.bf16.mxu0 %v8967_v47  ;;  %v3513_v51 = vrot.slane %v3511_v43, 5 }
  0x2e   : > { %8148 = vmatmul.mubr.bf16.gmra.mrb[4].mxu1 %v8977_v60  ;;  %v398_v53 = vsel %vm9348_vm7, %v393_v44, %v397_v26  ;;  %v412_v60 = vsel %vm9348_vm7, %v407_v48, %v411_v30  ;;  %v3526_v20 = vor.u32 %v3525_v8, %v3522_v5  ;;  %v430_v26 = vrot.slane %v428_v17, 4  ;;  %v377_v5 = vld [vmem:[%s9240_s15 + $0x2c] sm:$0x1] }
  0x2f   : > { %8156 = vmatpush3.bf16.msra.mxu1 %v8966_v45  ;;  %8436 = vmatmul.mubr.bf16.gmra.mrb[4].mxu0 %v7224_v12  ;;  %v3495_v45 = vrot.slane %v3493_v35, 5  ;;  %v6761_v2 = vcombine.low %v398_v53, %v412_v60  ;;  %v7238_v12 = vld [vmem:[%s9240_s15 + $0x24] sm:$0x3] }
  0x30   : > { %8444 = vmatpush3.bf16.msra.mxu0 %v8967_v47  ;;  %8157 = vmatprep.subr.bf16.mxu1 %v8968_v54  ;;  %v3514_v47 = vshll.u32 %v7235_v34, 16  ;;  %v3538_v33 = vshrl.u32 %v7238_v12, 16  ;;  %v434_v35 = vor.u32 %v433_v27, %v430_v26 }
  0x31   : > { %8445 = vmatprep.subr.bf16.mxu0 %v8969_v57  ;;  %8167 = vmatprep.mubr.bf16.mxu1 %v6761_v2 }
  0x32   : > { %v3516_v55 = vrot.slane %v3514_v47, 6  ;;  %v3540_v41 = vrot.slane %v3538_v33, 5  ;;  %v435_v43 = vrot.slane %v434_v35, 4 }
  0x33   : > { %8158 = vmatpush3.bf16.msra.mxu1 %v8968_v54  ;;  %v3499_v54 = vor.u32 %v3498_v46, %v3495_v45  ;;  %v3550_v45 = vshll.u32 %v7239_v19, 16  ;;  %v3556_v46 = vshrl.u32 %v7240_v25, 16  ;;  %v7242_v25 = vld [vmem:[%s9240_s15 + $0x34] sm:$0x3] }
  0x34   : > { %8446 = vmatpush3.bf16.msra.mxu0 %v8969_v57  ;;  %8159 = vmatprep.subr.bf16.mxu1 %v8970_v7  ;;  %v370_v57 = vld [vmem:[%s9240_s15 + $0x10] sm:$0xf]  ;;  %v3517_v4 = vor.u32 %v3516_v55, %v3513_v51  ;;  %v440_v51 = vsel %vm9348_vm7, %v435_v43, %v439_v32  ;;  %v8988_v32 = vld [vmem:[%s10552_s1 + $0xa0] sm:$0xff]  }
  0x35   : > { %8447 = vmatprep.subr.bf16.mxu0 %v8971_v11  ;;  %v414_v1 = vshrl.u32 %v370_v57, 16  ;;  %v3500_v3 = vrot.slane %v3499_v54, 4  ;;  %v417_v10 = vshll.u32 %v370_v57, 16  ;;  %v3552_v53 = vrot.slane %v3550_v45, 6 }
  0x36   : > { %v3558_v54 = vrot.slane %v3556_v46, 5  ;;  %v3561_v57 = vrot.slane %v3559_v50, 6  ;;  %v378_v46 = vld [vmem:[%s9240_s15 + $0x30] sm:$0xf] }
  0x37   : > { %8160 = vmatpush3.bf16.msra.mxu1 %v8970_v7  ;;  %v7237_v7 = vld [vmem:[%s9240_s15 + $0x20] sm:$0xe]  ;;  %v416_v9 = vrot.slane %v414_v1, 4  ;;  %v3509_v15 = vsel %vm9367_vm8, %v3500_v3, %v3508_v62  ;;  %v419_v22 = vrot.slane %v417_v10, 5  ;;  %v375_v3 = vld [vmem:[%s9240_s15 + $0x24] sm:$0x1] }
  0x38   : > { %8448 = vmatpush3.bf16.msra.mxu0 %v8971_v11  ;;  %8161 = vmatprep.subr.bf16.mxu1 %v8972_v16  ;;  %v423_v11 = vshll.u32 %v371_v58, 16  ;;  %v3529_v28 = vshrl.u32 %v7237_v7, 16  ;;  %v3532_v29 = vshll.u32 %v7237_v7, 16  ;;  %v8982_v58 = vld [vmem:[%s10552_s1 + $0x88] sm:$0xff]   ;;  %v3562_v60 = vor.u32 %v3561_v57, %v3558_v54  ;;  %v374_v1 = vld [vmem:[%s9240_s15 + $0x20] sm:$0xf] }
  0x39   : > { %8449 = vmatprep.subr.bf16.mxu0 %v8973_v21  ;;  %v8983_v7 = vld [vmem:[%s10552_s1 + $0x388] sm:$0xff]   ;;  %v442_v8 = vshrl.u32 %v374_v1, 16  ;;  %v451_v10 = vshll.u32 %v375_v3, 16  ;;  %v470_v57 = vshrl.u32 %v378_v46, 16  ;;  %v473_v3 = vshll.u32 %v378_v46, 16  ;;  %v8993_v46 = vld [vmem:[%s10552_s1 + $0x3b0] sm:$0xff]  }
  0x3a   : > { %v425_v23 = vrot.slane %v423_v11, 5  ;;  %v3531_v36 = vrot.slane %v3529_v28, 5  ;;  %v3534_v39 = vrot.slane %v3532_v29, 6  ;;  %v7243_v28 = vld [vmem:[%s9240_s15 + $0x38] sm:$0xe] }
  0x3b   : > { %8162 = vmatpush3.bf16.msra.mxu1 %v8972_v16  ;;  %v3518_v16 = vrot.slane %v3517_v4, 4  ;;  %v376_v4 = vld [vmem:[%s9240_s15 + $0x28] sm:$0xf]  ;;  %v444_v17 = vrot.slane %v442_v8, 4  ;;  %v453_v19 = vrot.slane %v451_v10, 5  ;;  %v3583_v35 = vshrl.u32 %v7243_v28, 16 }
  0x3c   : > { %8450 = vmatpush3.bf16.msra.mxu0 %v8973_v21  ;;  %8163 = vmatprep.subr.bf16.mxu1 %v8975_v31  ;;  %v9384_v21 = vld [vmem:[%s10552_s1 + $0x380] sm:$0xff]   ;;  %v3535_v44 = vor.u32 %v3534_v39, %v3531_v36  ;;  %v456_v11 = vshrl.u32 %v376_v4, 16  ;;  %v7244_v29 = vld [vmem:[%s9240_s15 + $0x3c] sm:$0x3] }
  0x3d   : > { %8451 = vmatprep.subr.bf16.mxu0 %v8976_v37  ;;  %v3527_v30 = vsel %vm9367_vm8, %v3518_v16, %v3526_v20  ;;  %v8986_v16 = vld [vmem:[%s10552_s1 + $0x98] sm:$0xff]   ;;  %v7241_v20 = vld [vmem:[%s9240_s15 + $0x30] sm:$0xe]  ;;  %v3592_v45 = vshrl.u32 %v7244_v29, 16  ;;  %v3595_v50 = vshll.u32 %v7244_v29, 16 }
  0x3e   : > { %v7265_v34 = vcombine.low %v3509_v15, %v3527_v30  ;;  %v8985_v15 = vld [vmem:[%s10552_s1 + $0x390] sm:$0xff]   ;;  %v3565_v26 = vshrl.u32 %v7241_v20, 16  ;;  %v3568_v30 = vshll.u32 %v7241_v20, 16  ;;  %v8987_v36 = vld [vmem:[%s10552_s1 + $0x398] sm:$0xff]  }
  0x3f   : > { %8164 = vmatpush3.bf16.msra.mxu1 %v8975_v31  ;;  %v420_v31 = vor.u32 %v419_v22, %v416_v9  ;;  %v445_v9 = vshll.u32 %v374_v1, 16  ;;  %v458_v22 = vrot.slane %v456_v11, 4  ;;  %v7245_v1 = vld [vmem:[%s9240_s15 + $0x40] sm:$0xe]  ;;  %v7247_v11 = vld [vmem:[%s9240_s15 + $0x48] sm:$0xe] }
  0x40   : > { %8452 = vmatpush3.bf16.msra.mxu0 %v8976_v37  ;;  %8165 = vmatprep.subr.bf16.mxu1 %v8978_v52  ;;  %v3541_v37 = vshll.u32 %v7238_v12, 16  ;;  %v459_v12 = vshll.u32 %v376_v4, 16  ;;  %v3601_v20 = vshrl.u32 %v7245_v1, 16 }
  0x41   : > { %8453 = vmatprep.subr.bf16.mxu0 %v8979_v59  ;;  %v421_v40 = vrot.slane %v420_v31, 4  ;;  %8455 = vmatprep.mubr.bf16.mxu0 %v7265_v34  ;;  %v447_v18 = vrot.slane %v445_v9, 5  ;;  %v3574_v31 = vshrl.u32 %v7242_v25, 16  ;;  %v3567_v34 = vrot.slane %v3565_v26, 5  ;;  %v7248_v26 = vld [vmem:[%s9240_s15 + $0x4c] sm:$0x3] }
  0x42   : > { %v3543_v48 = vrot.slane %v3541_v37, 6  ;;  %v3586_v37 = vshll.u32 %v7243_v28, 16  ;;  %v8991_v28 = vld [vmem:[%s10552_s1 + $0x3a8] sm:$0xff]  }
  0x43   : > { %8166 = vmatpush3.bf16.msra.mxu1 %v8978_v52  ;;  %v426_v47 = vsel %vm9348_vm7, %v421_v40, %v425_v23  ;;  %v3536_v52 = vrot.slane %v3535_v44, 4  ;;  %v461_v23 = vrot.slane %v459_v12, 5  ;;  %v448_v27 = vor.u32 %v447_v18, %v444_v17  ;;  %v8992_v17 = vld [vmem:[%s10552_s1 + $0xb0] sm:$0xff]  }
  0x44   : > { %8454 = vmatpush3.bf16.msra.mxu0 %v8979_v59  ;;  %8175 = vmatprep.subr.bf16.mxu1 %v8980_v13  ;;  %v6762_v55 = vcombine.low %v426_v47, %v440_v51  ;;  %v3544_v56 = vor.u32 %v3543_v48, %v3540_v41  ;;  %v3553_v59 = vor.u32 %v3552_v53, %v3549_v49  ;;  %v3570_v40 = vrot.slane %v3568_v30, 6  ;;  %v379_v51 = vld [vmem:[%s9240_s15 + $0x34] sm:$0x1]  ;;  %v8990_v53 = vld [vmem:[%s10552_s1 + $0xa8] sm:$0xff]  }
  0x45   : > { %8463 = vmatprep.subr.bf16.mxu0 %v9384_v21  ;;  %v462_v33 = vor.u32 %v461_v23, %v458_v22  ;;  %v449_v39 = vrot.slane %v448_v27, 4  ;;  %v3576_v41 = vrot.slane %v3574_v31, 5  ;;  %v3585_v44 = vrot.slane %v3583_v35, 5 }
  0x46   : > { %8168 = vmatmul.mubr.bf16.vlgmr.msra.gmra.mrb[0].mxu1 %v6762_v55  ;;  %v3545_v62 = vsel %vm9367_vm8, %v3536_v52, %v3544_v56  ;;  %v3554_v63 = vrot.slane %v3553_v59, 4  ;;  %v3571_v48 = vor.u32 %v3570_v40, %v3567_v34  ;;  %v3588_v49 = vrot.slane %v3586_v37, 6  ;;  %v380_v52 = vld [vmem:[%s9240_s15 + $0x38] sm:$0xf]  ;;  %v669_v40 = vld [vmem:[%s9240_s15 + $0x8] sm:$0xe] }
  0x47   : > { %8176 = vmatpush3.bf16.msra.mxu1 %v8980_v13  ;;  %v465_v13 = vshll.u32 %v377_v5, 16  ;;  %v463_v42 = vrot.slane %v462_v33, 4  ;;  %v454_v47 = vsel %vm9348_vm7, %v449_v39, %v453_v19  ;;  %v3594_v56 = vrot.slane %v3592_v45, 5  ;;  %v667_v33 = vld [vmem:[%s9240_s15] sm:$0xe]  ;;  %v8994_v45 = vld [vmem:[%s10552_s1 + $0xb8] sm:$0xff]  }
  0x48   : > { %8177 = vmatprep.subr.bf16.mxu1 %v8982_v58  ;;  %v3563_v2 = vsel %vm9367_vm8, %v3554_v63, %v3562_v60  ;;  %v3572_v60 = vrot.slane %v3571_v48, 4  ;;  %v3597_v63 = vrot.slane %v3595_v50, 6  ;;  %v479_v4 = vshll.u32 %v379_v51, 16  ;;  %v668_v39 = vld [vmem:[%s9240_s15 + $0x4] sm:$0x1] }
  0x49   : > { %v7266_v6 = vcombine.low %v3545_v62, %v3563_v2  ;;  %v467_v24 = vrot.slane %v465_v13, 5  ;;  %v3589_v62 = vor.u32 %v3588_v49, %v3585_v44  ;;  %v472_v2 = vrot.slane %v470_v57, 4 }
  0x4a   : > { %v484_v5 = vshrl.u32 %v380_v52, 16  ;;  %v3598_v9 = vor.u32 %v3597_v63, %v3594_v56  ;;  %v487_v10 = vshll.u32 %v380_v52, 16  ;;  %v475_v12 = vrot.slane %v473_v3, 5  ;;  %v7278_v56 = vld [vmem:[%s9240_s15 + $0x14] sm:$0x3] }
  0x4b   : > { %8178 = vmatpush3.bf16.msra.mxu1 %v8982_v58  ;;  %8456 = vmatmul.mubr.bf16.vlgmr.msra.gmra.mrb[0].mxu0 %v7266_v6  ;;  %v468_v54 = vsel %vm9348_vm7, %v463_v42, %v467_v24  ;;  %v8989_v58 = vld [vmem:[%s10552_s1 + $0x3a0] sm:$0xff]   ;;  %v3590_v8 = vrot.slane %v3589_v62, 4  ;;  %v481_v13 = vrot.slane %v479_v4, 5  ;;  %v3604_v22 = vshll.u32 %v7245_v1, 16  ;;  %v7279_v62 = vld [vmem:[%s9240_s15 + $0x18] sm:$0xc] }
  0x4c   : > { %8179 = vmatprep.subr.bf16.mxu1 %v8984_v0  ;;  %8464 = vmatpush3.bf16.msra.mxu0 %v9384_v21  ;;  %v3577_v21 = vshll.u32 %v7242_v25, 16  ;;  %v6763_v59 = vcombine.low %v454_v47, %v468_v54  ;;  %v7246_v6 = vld [vmem:[%s9240_s15 + $0x44] sm:$0x3]  ;;  %v489_v19 = vrot.slane %v487_v10, 5  ;;  %v476_v24 = vor.u32 %v475_v12, %v472_v2  ;;  %v7280_v63 = vld [vmem:[%s9240_s15 + $0x1c] sm:$0x3] }
  0x4d   : > { %8465 = vmatprep.subr.bf16.mxu0 %v8983_v7  ;;  %v3599_v18 = vsel %vm9367_vm8, %v3590_v8, %v3598_v9  ;;  %v3610_v27 = vshrl.u32 %v7246_v6, 16  ;;  %v3603_v30 = vrot.slane %v3601_v20, 5  ;;  %v3606_v31 = vrot.slane %v3604_v22, 6  ;;  %v8996_v4 = vld [vmem:[%s10552_s1 + $0xc0] sm:$0xff]   ;;  %v8995_v8 = vld [vmem:[%s10552_s1 + $0x3b8] sm:$0xff]  }
  0x4e   : > { %v3579_v43 = vrot.slane %v3577_v21, 6  ;;  %8171 = vmatprep.mubr.bf16.mxu1 %v6763_v59  ;;  %v477_v34 = vrot.slane %v476_v24, 4  ;;  %v3619_v35 = vshrl.u32 %v7247_v11, 16  ;;  %v3628_v44 = vshrl.u32 %v7248_v26, 16  ;;  %v673_v22 = vld [vmem:[%s9240_s15 + $0x18] sm:$0xe] }
  0x4f   : > { %8180 = vmatpush3.bf16.msra.mxu1 %v8984_v0  ;;  %v381_v0 = vld [vmem:[%s9240_s15 + $0x3c] sm:$0x1]  ;;  %v3612_v21 = vrot.slane %v3610_v27, 5  ;;  %v3607_v42 = vor.u32 %v3606_v31, %v3603_v30  ;;  %v3631_v50 = vshll.u32 %v7248_v26, 16  ;;  %v704_v1 = vrot.slane %v668_v39, 5  ;;  %v8997_v27 = vld [vmem:[%s10552_s1 + $0x3c0] sm:$0xff]  }
  0x50   : > { %8181 = vmatprep.subr.bf16.mxu1 %v8986_v16  ;;  %8466 = vmatpush3.bf16.msra.mxu0 %v8983_v7  ;;  %v3580_v55 = vor.u32 %v3579_v43, %v3576_v41  ;;  %v670_v41 = vld [vmem:[%s9240_s15 + $0xc] sm:$0x1]  ;;  %v482_v47 = vsel %vm9348_vm7, %v477_v34, %v481_v13  ;;  %v3621_v48 = vrot.slane %v3619_v35, 5  ;;  %v3630_v54 = vrot.slane %v3628_v44, 5  ;;  %v7281_v30 = vld [vmem:[%s9240_s15 + $0x20] sm:$0xc] }
  0x51   : > { %8467 = vmatprep.subr.bf16.mxu0 %v8985_v15  ;;  %v3608_v52 = vrot.slane %v3607_v42, 4  ;;  %v3633_v59 = vrot.slane %v3631_v50, 6  ;;  %v6774_v2 = vrot.slane %v669_v40, 9  ;;  %v708_v3 = vrot.slane %v670_v41, 5  ;;  %v7282_v31 = vld [vmem:[%s9240_s15 + $0x24] sm:$0x3] }
  0x52   : > { %v3581_v7 = vsel %vm9367_vm8, %v3572_v60, %v3580_v55  ;;  %v7277_v55 = vld [vmem:[%s9240_s15 + $0x10] sm:$0xc]  ;;  %v6773_v60 = vrot.slane %v667_v33, 9  ;;  %v3840_v10 = vrot.slane %v7278_v56, 6  ;;  %v7294_v13 = vrot.slane %v7279_v62, 10  ;;  %v9002_v50 = vld [vmem:[%s10552_s1 + $0xd8] sm:$0xff]  }
  0x53   : > { %8182 = vmatpush3.bf16.msra.mxu1 %v8986_v16  ;;  %v493_v16 = vshll.u32 %v381_v0, 16  ;;  %v7267_v23 = vcombine.low %v3581_v7, %v3599_v18  ;;  %v3634_v7 = vor.u32 %v3633_v59, %v3630_v54  ;;  %v7293_v9 = vrot.slane %v7277_v55, 10  ;;  %v7283_v34 = vld [vmem:[%s9240_s15 + $0x28] sm:$0xc]  ;;  %v678_v54 = vld [vmem:[%s9240_s15 + $0x2c] sm:$0x1] }
  0x54   : > { %8183 = vmatprep.subr.bf16.mxu1 %v8988_v32  ;;  %8468 = vmatpush3.bf16.msra.mxu0 %v8985_v15  ;;  %v486_v15 = vrot.slane %v484_v5, 4  ;;  %v709_v12 = vsel %vm9249_vm2, %v6774_v2, %v708_v3  ;;  %v7295_v35 = vrot.slane %v7281_v30, 10  ;;  %v3848_v39 = vrot.slane %v7282_v31, 6  ;;  %v7285_v59 = vld [vmem:[%s9240_s15 + $0x30] sm:$0xc]  ;;  %v9003_v2 = vld [vmem:[%s10552_s1 + $0x3d8] sm:$0xff]  }
  0x55   : > { %8469 = vmatprep.subr.bf16.mxu0 %v8987_v36  ;;  %v495_v25 = vrot.slane %v493_v16, 5  ;;  %8459 = vmatprep.mubr.bf16.mxu0 %v7267_v23  ;;  %v671_v16 = vld [vmem:[%s9240_s15 + $0x10] sm:$0xe]  ;;  %v3841_v20 = vsel %vm9481_vm11, %v7293_v9, %v3840_v10  ;;  %v674_v23 = vld [vmem:[%s9240_s15 + $0x1c] sm:$0x1]  ;;  %v7296_v40 = vrot.slane %v7283_v34, 10 }
  0x56   : > { %v490_v29 = vor.u32 %v489_v19, %v486_v15  ;;  %v3844_v15 = vrot.slane %v7280_v63, 6  ;;  %v6775_v24 = vrot.slane %v671_v16, 9  ;;  %v716_v33 = vrot.slane %v674_v23, 5  ;;  %v7286_v63 = vld [vmem:[%s9240_s15 + $0x34] sm:$0x3]  ;;  %v9005_v16 = vld [vmem:[%s10552_s1 + $0x3e0] sm:$0xff]  }
  0x57   : > { %8184 = vmatpush3.bf16.msra.mxu1 %v8988_v32  ;;  %v3613_v32 = vshll.u32 %v7246_v6, 16  ;;  %v3849_v44 = vsel %vm9481_vm11, %v7295_v35, %v3848_v39  ;;  %v679_v10 = vld [vmem:[%s9240_s15 + $0x30] sm:$0xe]  ;;  %v7289_v23 = vld [vmem:[%s9240_s15 + $0x40] sm:$0xc] }
  0x58   : > { %8185 = vmatprep.subr.bf16.mxu1 %v8990_v53  ;;  %8470 = vmatpush3.bf16.msra.mxu0 %v8987_v36  ;;  %v3622_v36 = vshll.u32 %v7247_v11, 16  ;;  %v491_v37 = vrot.slane %v490_v29, 4  ;;  %v705_v11 = vsel %vm9249_vm2, %v6773_v60, %v704_v1  ;;  %v3845_v26 = vsel %vm9481_vm11, %v7294_v13, %v3844_v15  ;;  %v7288_v1 = vld [vmem:[%s9240_s15 + $0x3c] sm:$0x3]  ;;  %v681_v13 = vld [vmem:[%s9240_s15 + $0x38] sm:$0xe] }
  0x59   : > { %8471 = vmatprep.subr.bf16.mxu0 %v8989_v58  ;;  %v3615_v43 = vrot.slane %v3613_v32, 6  ;;  %v6797_v19 = vcombine.low %v705_v11, %v709_v12  ;;  %v6776_v29 = vrot.slane %v673_v22, 9  ;;  %v7317_v32 = vcombine.low %v3841_v20, %v3845_v26  ;;  %v680_v12 = vld [vmem:[%s9240_s15 + $0x34] sm:$0x1]  ;;  %v682_v15 = vld [vmem:[%s9240_s15 + $0x3c] sm:$0x1] }
  0x5a   : > { %v3624_v49 = vrot.slane %v3622_v36, 6  ;;  %v496_v51 = vsel %vm9348_vm7, %v491_v37, %v495_v25  ;;  %v8998_v37 = vld [vmem:[%s10552_s1 + $0xc8] sm:$0xff]   ;;  %v3860_v9 = vrot.slane %v7288_v1, 6  ;;  %v728_v20 = vrot.slane %v680_v12, 5  ;;  %v7290_v26 = vld [vmem:[%s9240_s15 + $0x44] sm:$0x3] }
  0x5b   : > { %8186 = vmatpush3.bf16.msra.mxu1 %v8990_v53  ;;  %v3616_v53 = vor.u32 %v3615_v43, %v3612_v21  ;;  %v6764_v57 = vcombine.low %v482_v47, %v496_v51  ;;  %v7284_v21 = vld [vmem:[%s9240_s15 + $0x2c] sm:$0x3]  ;;  %v717_v42 = vsel %vm9249_vm2, %v6776_v29, %v716_v33  ;;  %v675_v51 = vld [vmem:[%s9240_s15 + $0x20] sm:$0xe]  ;;  %v6780_v22 = vrot.slane %v681_v13, 9  ;;  %v9011_v13 = vld [vmem:[%s10552_s1 + $0x3f8] sm:$0xff]  }
  0x5c   : > { %8187 = vmatprep.subr.bf16.mxu1 %v8992_v17  ;;  %8472 = vmatpush3.bf16.msra.mxu0 %v8989_v58  ;;  %v3625_v58 = vor.u32 %v3624_v49, %v3621_v48  ;;  %v3852_v41 = vrot.slane %v7284_v21, 6  ;;  %v8999_v47 = vld [vmem:[%s10552_s1 + $0x3c8] sm:$0xff]   ;;  %v9000_v48 = vld [vmem:[%s10552_s1 + $0xd0] sm:$0xff]   ;;  %v6777_v55 = vrot.slane %v675_v51, 9  ;;  %v3864_v31 = vrot.slane %v7290_v26, 6 }
  0x5d   : > { %8473 = vmatprep.subr.bf16.mxu0 %v8991_v28  ;;  %v3617_v0 = vsel %vm9367_vm8, %v3608_v52, %v3616_v53  ;;  %8172 = vmatmul.mubr.bf16.gmra.mrb[4].mxu1 %v6764_v57  ;;  %v9001_v49 = vld [vmem:[%s10552_s1 + $0x3d0] sm:$0xff]   ;;  %v676_v52 = vld [vmem:[%s9240_s15 + $0x24] sm:$0x1]  ;;  %v677_v53 = vld [vmem:[%s9240_s15 + $0x28] sm:$0xe] }
  0x5e   : > { %v3626_v6 = vrot.slane %v3625_v58, 4  ;;  %8191 = vmatprep.mubr.bf16.mxu1 %v6797_v19  ;;  %v720_v56 = vrot.slane %v676_v52, 5  ;;  %v6778_v57 = vrot.slane %v677_v53, 9  ;;  %v724_v58 = vrot.slane %v678_v54, 5  ;;  %v7292_v30 = vld [vmem:[%s9240_s15 + $0x4c] sm:$0x3] }
  0x5f   : > { %8188 = vmatpush3.bf16.msra.mxu1 %v8992_v17  ;;  %v672_v17 = vld [vmem:[%s9240_s15 + $0x14] sm:$0x1]  ;;  %v6779_v19 = vrot.slane %v679_v10, 9  ;;  %v3868_v34 = vrot.slane %v7292_v30, 6  ;;  %v9007_v21 = vld [vmem:[%s10552_s1 + $0x3e8] sm:$0xff]  }
  0x60   : > { %8189 = vmatprep.subr.bf16.mxu1 %v8994_v45  ;;  %8474 = vmatpush3.bf16.msra.mxu0 %v8991_v28  ;;  %v3635_v18 = vsel %vm9367_vm8, %v3626_v6, %v3634_v7  ;;  %v712_v28 = vrot.slane %v672_v17, 5  ;;  %v721_v60 = vsel %vm9249_vm2, %v6777_v55, %v720_v56  ;;  %v725_v62 = vsel %vm9249_vm2, %v6778_v57, %v724_v58  ;;  %v9006_v17 = vld [vmem:[%s10552_s1 + $0xe8] sm:$0xff]   ;;  %v904_v39 = vld [vmem:[%s9240_s15] sm:$0xe]  ;;  %v9009_v54 = vld [vmem:[%s10552_s1 + $0x3f0] sm:$0xff]  }
  0x61   : > { %8475 = vmatprep.subr.bf16.mxu0 %v8993_v46  ;;  %v7268_v25 = vcombine.low %v3617_v0, %v3635_v18  ;;  %v7287_v0 = vld [vmem:[%s9240_s15 + $0x38] sm:$0xc]  ;;  %v6799_v3 = vcombine.low %v721_v60, %v725_v62  ;;  %v3856_v6 = vrot.slane %v7286_v63, 6  ;;  %v729_v29 = vsel %vm9249_vm2, %v6779_v19, %v728_v20  ;;  %v911_v10 = vld [vmem:[%s9240_s15 + $0x1c] sm:$0x3] }
  0x62   : > { %v713_v36 = vsel %vm9249_vm2, %v6775_v24, %v712_v28  ;;  %v7298_v7 = vrot.slane %v7287_v0, 10  ;;  %v7299_v28 = vrot.slane %v7289_v23, 10  ;;  %v9013_v63 = vld [vmem:[%s9240_s15 + $0x18] ss:$8 sps:$4 sm:$0xff]  }
  0x63   : > { %8190 = vmatpush3.bf16.msra.mxu1 %v8994_v45  ;;  %8460 = vmatmul.mubr.bf16.gmra.mrb[4].mxu0 %v7268_v25  ;;  %v6798_v43 = vcombine.low %v713_v36, %v717_v42  ;;  %v3853_v45 = vsel %vm9481_vm11, %v7296_v40, %v3852_v41  ;;  %v732_v25 = vrot.slane %v682_v15, 5  ;;  %v905_v40 = vld [vmem:[%s9240_s15 + $0x4] sm:$0x3]  ;;  %v907_v42 = vld [vmem:[%s9240_s15 + $0xc] sm:$0x3]  ;;  %v9010_v0 = vld [vmem:[%s10552_s1 + $0xf8] sm:$0xff]  }
  0x64   : > { %8199 = vmatprep.subr.bf16.mxu1 %v8996_v4  ;;  %8476 = vmatpush3.bf16.msra.mxu0 %v8993_v46  ;;  %v7318_v46 = vcombine.low %v3849_v44, %v3853_v45  ;;  %v3861_v18 = vsel %vm9481_vm11, %v7298_v7, %v3860_v9  ;;  %v3865_v36 = vsel %vm9481_vm11, %v7299_v28, %v3864_v31  ;;  %v927_v44 = vshll.u32 %v904_v39, 16  ;;  %v9008_v45 = vld [vmem:[%s10552_s1 + $0xf0] sm:$0xff]   ;;  %v910_v9 = vld [vmem:[%s9240_s15 + $0x18] sm:$0xe] }
  0x65   : > { %8477 = vmatprep.subr.bf16.mxu0 %v8995_v8  ;;  %8479 = vmatprep.mubr.bf16.mxu0 %v7317_v32  ;;  %v733_v33 = vsel %vm9249_vm2, %v6780_v22, %v732_v25  ;;  %v951_v53 = vshrl.u32 %v907_v42, 16  ;;  %v954_v58 = vshll.u32 %v907_v42, 16  ;;  %v909_v7 = vld [vmem:[%s9240_s15 + $0x14] sm:$0x3]  ;;  %v978_v22 = vshrl.u32 %v910_v9, 16  ;;  %v9012_v25 = vld [vmem:[%s10552_s1 + $0x100] sm:$0xff]  }
  0x66   : > { %8192 = vmatmul.mubr.bf16.vlgmr.msra.gmra.mrb[0].mxu1 %v6798_v43  ;;  %v6800_v35 = vcombine.low %v729_v29, %v733_v33  ;;  %v924_v43 = vshrl.u32 %v904_v39, 16  ;;  %v929_v51 = vrot.slane %v927_v44, 6  ;;  %v981_v23 = vshll.u32 %v910_v9, 16  ;;  %v9017_v42 = vld [vmem:[%s10552_s1 + $0x408] sm:$0xff]  }
  0x67   : > { %8200 = vmatpush3.bf16.msra.mxu1 %v8996_v4  ;;  %v7297_v4 = vrot.slane %v7285_v59, 10  ;;  %8195 = vmatprep.mubr.bf16.mxu1 %v6799_v3  ;;  %v953_v62 = vrot.slane %v951_v53, 5  ;;  %v987_v28 = vshrl.u32 %v911_v10, 16  ;;  %v980_v31 = vrot.slane %v978_v22, 5  ;;  %v915_v53 = vld [vmem:[%s9240_s15 + $0x2c] sm:$0x3] }
  0x68   : > { %8478 = vmatpush3.bf16.msra.mxu0 %v8995_v8  ;;  %8201 = vmatprep.subr.bf16.mxu1 %v8998_v37  ;;  %v9004_v8 = vld [vmem:[%s10552_s1 + $0xe0] sm:$0xff]   ;;  %v919_v22 = vld [vmem:[%s9240_s15 + $0x3c] sm:$0x3] }
  0x69   : > { %8487 = vmatprep.subr.bf16.mxu0 %v8997_v27  ;;  %v3857_v11 = vsel %vm9481_vm11, %v7297_v4, %v3856_v6  ;;  %v908_v6 = vld [vmem:[%s9240_s15 + $0x10] sm:$0xe] }
  0x6a   : > { %v7319_v24 = vcombine.low %v3857_v11, %v3861_v18  ;;  %v960_v11 = vshrl.u32 %v908_v6, 16  ;;  %v963_v12 = vshll.u32 %v908_v6, 16  ;;  %v972_v18 = vshll.u32 %v909_v7, 16 }
  0x6b   : > { %8480 = vmatmul.mubr.bf16.vlgmr.msra.gmra.mrb[0].mxu0 %v7318_v46  ;;  %8202 = vmatpush3.bf16.msra.mxu1 %v8998_v37  ;;  %v906_v37 = vld [vmem:[%s9240_s15 + $0x8] sm:$0xe] }
  0x6c   : > { %8488 = vmatpush3.bf16.msra.mxu0 %v8997_v27  ;;  %8203 = vmatprep.subr.bf16.mxu1 %v9000_v48  ;;  %v7291_v27 = vld [vmem:[%s9240_s15 + $0x48] sm:$0xc]  ;;  %v945_v52 = vshll.u32 %v906_v37, 16  ;;  %v962_v19 = vrot.slane %v960_v11, 5  ;;  %v965_v20 = vrot.slane %v963_v12, 6 }
  0x6d   : > { %8489 = vmatprep.subr.bf16.mxu0 %v8999_v47  ;;  %v7300_v32 = vrot.slane %v7291_v27, 10  ;;  %8483 = vmatprep.mubr.bf16.mxu0 %v7319_v24  ;;  %v974_v27 = vrot.slane %v972_v18, 6  ;;  %v9027_v12 = vld [vmem:[%s9240_s15 + $0x38] ss:$8 sps:$4 sm:$0xff]   ;;  %v917_v18 = vld [vmem:[%s9240_s15 + $0x34] sm:$0x3] }
  0x6e   : > { %8196 = vmatmul.mubr.bf16.gmra.mrb[4].mxu1 %v6800_v35  ;;  %v947_v60 = vrot.slane %v945_v52, 6  ;;  %v966_v30 = vor.u32 %v965_v20, %v962_v19  ;;  %v9014_v35 = vld [vmem:[%s10552_s1 + $0x400] sm:$0xff]   ;;  %v914_v52 = vld [vmem:[%s9240_s15 + $0x28] sm:$0xe]  ;;  %v918_v20 = vld [vmem:[%s9240_s15 + $0x38] sm:$0xe] }
  0x6f   : > { %8204 = vmatpush3.bf16.msra.mxu1 %v9000_v48  ;;  %v3869_v41 = vsel %vm9481_vm11, %v7300_v32, %v3868_v34  ;;  %v936_v48 = vshll.u32 %v905_v40, 16  ;;  %v983_v32 = vrot.slane %v981_v23, 6  ;;  %v989_v34 = vrot.slane %v987_v28, 5 }
  0x70   : > { %8490 = vmatpush3.bf16.msra.mxu0 %v8999_v47  ;;  %8205 = vmatprep.subr.bf16.mxu1 %v9002_v50  ;;  %v7320_v46 = vcombine.low %v3865_v36, %v3869_v41  ;;  %v933_v47 = vshrl.u32 %v905_v40, 16  ;;  %v967_v36 = vrot.slane %v966_v30, 4  ;;  %v9015_v40 = vld [vmem:[%s9240_s15 + $0x28] ss:$8 sps:$4 sm:$0xff]   ;;  %v1044_v28 = vshll.u32 %v917_v18, 16 }
  0x71   : > { %8491 = vmatprep.subr.bf16.mxu0 %v9001_v49  ;;  %v938_v56 = vrot.slane %v936_v48, 6  ;;  %v984_v39 = vor.u32 %v983_v32, %v980_v31  ;;  %v9019_v48 = vld [vmem:[%s10552_s1 + $0x410] sm:$0xff]   ;;  %v1050_v32 = vshrl.u32 %v918_v20, 16 }
  0x72   : > { %v935_v55 = vrot.slane %v933_v47, 5  ;;  %v9016_v47 = vld [vmem:[%s10552_s1 + $0x108] sm:$0xff]  }
  0x73   : > { %8206 = vmatpush3.bf16.msra.mxu1 %v9002_v50  ;;  %v926_v50 = vrot.slane %v924_v43, 5  ;;  %8484 = vmatmul.mubr.bf16.gmra.mrb[4].mxu0 %v7320_v46 }
  0x74   : > { %8492 = vmatpush3.bf16.msra.mxu0 %v9001_v49  ;;  %8207 = vmatprep.subr.bf16.mxu1 %v9004_v8  ;;  %v942_v49 = vshrl.u32 %v906_v37, 16  ;;  %v939_v1 = vor.u32 %v938_v56, %v935_v55  ;;  %v985_v37 = vrot.slane %v984_v39, 4  ;;  %v1046_v39 = vrot.slane %v1044_v28, 6 }
  0x75   : > { %8493 = vmatprep.subr.bf16.mxu0 %v9003_v2  ;;  %v930_v59 = vor.u32 %v929_v51, %v926_v50  ;;  %8503 = vmatprep.mubr.bf16.mxu0 %v9013_v63  ;;  %v913_v50 = vld [vmem:[%s9240_s15 + $0x24] sm:$0x3]  ;;  %v9018_v51 = vld [vmem:[%s10552_s1 + $0x110] sm:$0xff]   ;;  %v1023_v63 = vshrl.u32 %v915_v53, 16 }
  0x76   : > { %v944_v57 = vrot.slane %v942_v49, 5  ;;  %v912_v49 = vld [vmem:[%s9240_s15 + $0x20] sm:$0xe]  ;;  %v1005_v56 = vshrl.u32 %v913_v50, 16 }
  0x77   : > { %8208 = vmatpush3.bf16.msra.mxu1 %v9004_v8  ;;  %v931_v3 = vrot.slane %v930_v59, 4  ;;  %v999_v55 = vshll.u32 %v912_v49, 16  ;;  %v1017_v59 = vshll.u32 %v914_v52, 16 }
  0x78   : > { %8494 = vmatpush3.bf16.msra.mxu0 %v9003_v2  ;;  %8209 = vmatprep.subr.bf16.mxu1 %v9006_v17  ;;  %v956_v2 = vrot.slane %v954_v58, 6  ;;  %v948_v4 = vor.u32 %v947_v60, %v944_v57  ;;  %v1008_v57 = vshll.u32 %v913_v50, 16  ;;  %v1014_v58 = vshrl.u32 %v914_v52, 16  ;;  %v1237_v50 = vld [vmem:[%s9240_s15] sm:$0xc] }
  0x79   : > { %8495 = vmatprep.subr.bf16.mxu0 %v9005_v16  ;;  %v940_v15 = vsel %vm9367_vm8, %v931_v3, %v939_v1  ;;  %v9021_v1 = vld [vmem:[%s10552_s1 + $0x418] sm:$0xff]   ;;  %v1019_v6 = vrot.slane %v1017_v59, 6 }
  0x7a   : > { %v957_v8 = vor.u32 %v956_v2, %v953_v62  ;;  %v1001_v62 = vrot.slane %v999_v55, 6  ;;  %v1007_v2 = vrot.slane %v1005_v56, 5  ;;  %v1010_v3 = vrot.slane %v1008_v57, 6 }
  0x7b   : > { %8210 = vmatpush3.bf16.msra.mxu1 %v9006_v17  ;;  %v969_v17 = vshrl.u32 %v909_v7, 16  ;;  %v6837_v55 = vrot.slane %v1237_v50, 10 }
  0x7c   : > { %8496 = vmatpush3.bf16.msra.mxu0 %v9005_v16  ;;  %8211 = vmatprep.subr.bf16.mxu1 %v9008_v45  ;;  %v949_v16 = vrot.slane %v948_v4, 4  ;;  %v1016_v4 = vrot.slane %v1014_v58, 5 }
  0x7d   : > { %8497 = vmatprep.subr.bf16.mxu0 %v9007_v21  ;;  %v971_v26 = vrot.slane %v969_v17, 5  ;;  %v916_v17 = vld [vmem:[%s9240_s15 + $0x30] sm:$0xe] }
  0x7e   : > { %v958_v24 = vsel %vm9367_vm8, %v949_v16, %v957_v8  ;;  %v1025_v8 = vrot.slane %v1023_v63, 5  ;;  %v1020_v11 = vor.u32 %v1019_v6, %v1016_v4  ;;  %v1032_v23 = vshrl.u32 %v916_v17, 16  ;;  %v7366_v4 = vld [vmem:[%s9240_s15 + $0x1c] sm:$0x1]  ;;  %v7367_v6 = vld [vmem:[%s9240_s15 + $0x20] sm:$0xf] }
  0x7f   : > { %8212 = vmatpush3.bf16.msra.mxu1 %v9008_v45  ;;  %v6825_v29 = vcombine.low %v940_v15, %v958_v24  ;;  %v975_v33 = vor.u32 %v974_v27, %v971_v26  ;;  %v9023_v24 = vld [vmem:[%s10552_s1 + $0x420] sm:$0xff]   ;;  %v1035_v26 = vshll.u32 %v916_v17, 16  ;;  %v1041_v27 = vshrl.u32 %v917_v18, 16  ;;  %v1241_v18 = vld [vmem:[%s9240_s15 + $0x10] sm:$0xc] }
  0x80   : > { %8498 = vmatpush3.bf16.msra.mxu0 %v9007_v21  ;;  %8213 = vmatprep.subr.bf16.mxu1 %v9010_v0  ;;  %v990_v21 = vshll.u32 %v911_v10, 16  ;;  %v1011_v10 = vor.u32 %v1010_v3, %v1007_v2  ;;  %v1021_v19 = vrot.slane %v1020_v11, 4  ;;  %v1034_v31 = vrot.slane %v1032_v23, 5 }
  0x81   : > { %8499 = vmatprep.subr.bf16.mxu0 %v9009_v54  ;;  %8215 = vmatprep.mubr.bf16.mxu1 %v6825_v29  ;;  %v976_v43 = vsel %vm9367_vm8, %v967_v36, %v975_v33  ;;  %v9022_v29 = vld [vmem:[%s10552_s1 + $0x120] sm:$0xff]   ;;  %v1053_v33 = vshll.u32 %v918_v20, 16  ;;  %v1043_v36 = vrot.slane %v1041_v27, 5  ;;  %v4261_v17 = vshll.u32 %v7367_v6, 16 }
  0x82   : > { %v992_v41 = vrot.slane %v990_v21, 6 }
  0x83   : > { %8214 = vmatpush3.bf16.msra.mxu1 %v9010_v0  ;;  %v1026_v0 = vshll.u32 %v915_v53, 16  ;;  %v1239_v53 = vld [vmem:[%s9240_s15 + $0x8] sm:$0xc]  ;;  %v4263_v28 = vrot.slane %v4261_v17, 5 }
  0x84   : > { %8500 = vmatpush3.bf16.msra.mxu0 %v9009_v54  ;;  %8223 = vmatprep.subr.bf16.mxu1 %v9012_v25  ;;  %v993_v44 = vor.u32 %v992_v41, %v989_v34  ;;  %v996_v54 = vshrl.u32 %v912_v49, 16  ;;  %v9025_v34 = vld [vmem:[%s10552_s1 + $0x428] sm:$0xff]   ;;  %v1052_v41 = vrot.slane %v1050_v32, 5  ;;  %v6838_v59 = vrot.slane %v1239_v53, 10 }
  0x85   : > { %8501 = vmatprep.subr.bf16.mxu0 %v9011_v13  ;;  %v1028_v9 = vrot.slane %v1026_v0, 6 }
  0x86   : > { %v994_v45 = vsel %vm9367_vm8, %v985_v37, %v993_v44  ;;  %v998_v60 = vrot.slane %v996_v54, 5  ;;  %v1055_v37 = vrot.slane %v1053_v33, 6  ;;  %v9024_v44 = vld [vmem:[%s10552_s1 + $0x128] sm:$0xff]   ;;  %v9033_v33 = vld [vmem:[%s10552_s1 + $0x440] sm:$0xff]  }
  0x87   : > { %v6826_v46 = vcombine.low %v976_v43, %v994_v45  ;;  %v1029_v16 = vor.u32 %v1028_v9, %v1025_v8  ;;  %v1062_v43 = vshll.u32 %v919_v22, 16  ;;  %v1240_v54 = vld [vmem:[%s9240_s15 + $0xc] sm:$0x3] }
  0x88   : > { %8502 = vmatpush3.bf16.msra.mxu0 %v9011_v13  ;;  %v1002_v7 = vor.u32 %v1001_v62, %v998_v60  ;;  %v9020_v13 = vld [vmem:[%s10552_s1 + $0x118] sm:$0xff]   ;;  %v9026_v60 = vld [vmem:[%s10552_s1 + $0x130] sm:$0xff]   ;;  %v1278_v0 = vrot.slane %v1240_v54, 6 }
  0x89   : > { %8511 = vmatprep.subr.bf16.mxu0 %v9014_v35  ;;  %8216 = vmatmul.mubr.bf16.vlgmr.msra.gmra.mrb[0].mxu1 %v6826_v46  ;;  %v1030_v30 = vsel %vm9367_vm8, %v1021_v19, %v1029_v16  ;;  %v1047_v46 = vor.u32 %v1046_v39, %v1043_v36  ;;  %v1064_v49 = vrot.slane %v1062_v43, 6  ;;  %v9028_v62 = vld [vmem:[%s10552_s1 + $0x430] sm:$0xff]   ;;  %v4258_v16 = vshrl.u32 %v7367_v6, 16  ;;  %v9030_v19 = vld [vmem:[%s10552_s1 + $0x138] sm:$0xff]  }
  0x8a   : > { %8224 = vmatpush3.bf16.msra.mxu1 %v9012_v25  ;;  %v1003_v15 = vrot.slane %v1002_v7, 4  ;;  %v7368_v7 = vld [vmem:[%s9240_s15 + $0x24] sm:$0x1]  ;;  %v1279_v9 = vsel %vm9481_vm11, %v6838_v59, %v1278_v0 }
  0x8b   : > { %8504 = vmatmul.mubr.bf16.vlgmr.msra.gmra.mrb[0].mxu0 %v9015_v40  ;;  %8225 = vmatprep.subr.bf16.mxu1 %v9016_v47  ;;  %v9029_v40 = vld [vmem:[%s9240_s15 + $0x48] ss:$8 sps:$4 sm:$0xff]   ;;  %v4267_v23 = vshll.u32 %v7368_v7, 16  ;;  %v4260_v27 = vrot.slane %v4258_v16, 4  ;;  %v1248_v16 = vld [vmem:[%s9240_s15 + $0x2c] sm:$0x3] }
  0x8c   : > { %8512 = vmatpush3.bf16.msra.mxu0 %v9014_v35  ;;  %8507 = vmatprep.mubr.bf16.mxu0 %v9027_v12  ;;  %v1012_v25 = vsel %vm9367_vm8, %v1003_v15, %v1011_v10  ;;  %v1037_v35 = vrot.slane %v1035_v26, 6  ;;  %v9031_v12 = vld [vmem:[%s10552_s1 + $0x438] sm:$0xff]   ;;  %v4253_v15 = vshll.u32 %v7366_v4, 16 }
  0x8d   : > { %8513 = vmatprep.subr.bf16.mxu0 %v9017_v42  ;;  %v6827_v21 = vcombine.low %v1012_v25, %v1030_v30  ;;  %v6839_v25 = vrot.slane %v1241_v18, 10  ;;  %v4269_v32 = vrot.slane %v4267_v23, 5  ;;  %v4264_v36 = vor.u32 %v4263_v28, %v4260_v27  ;;  %v7376_v28 = vld [vmem:[%s9240_s15 + $0x44] sm:$0x1] }
  0x8e   : > { %8226 = vmatpush3.bf16.msra.mxu1 %v9016_v47  ;;  %v1038_v45 = vor.u32 %v1037_v35, %v1034_v31  ;;  %v1056_v47 = vor.u32 %v1055_v37, %v1052_v41  ;;  %v4255_v26 = vrot.slane %v4253_v15, 5  ;;  %v7369_v35 = vld [vmem:[%s9240_s15 + $0x28] sm:$0xf]  ;;  %v7370_v41 = vld [vmem:[%s9240_s15 + $0x2c] sm:$0x1]  ;;  %v9037_v15 = vld [vmem:[%s10552_s1 + $0x450] sm:$0xff]  }
  0x8f   : > { %8227 = vmatprep.subr.bf16.mxu1 %v9018_v51  ;;  %8219 = vmatprep.mubr.bf16.mxu1 %v6827_v21  ;;  %v7371_v37 = vld [vmem:[%s9240_s15 + $0x30] sm:$0xf] }
  0x90   : > { %8514 = vmatpush3.bf16.msra.mxu0 %v9017_v42  ;;  %v1059_v42 = vshrl.u32 %v919_v22, 16  ;;  %v1039_v52 = vrot.slane %v1038_v45, 4  ;;  %v1057_v56 = vrot.slane %v1056_v47, 4  ;;  %v4275_v45 = vshll.u32 %v7369_v35, 16 }
  0x91   : > { %8515 = vmatprep.subr.bf16.mxu0 %v9019_v48  ;;  %v4286_v47 = vshrl.u32 %v7371_v37, 16 }
  0x92   : > { %8228 = vmatpush3.bf16.msra.mxu1 %v9018_v51  ;;  %v1238_v51 = vld [vmem:[%s9240_s15 + $0x4] sm:$0x3]  ;;  %v1048_v63 = vsel %vm9367_vm8, %v1039_v52, %v1047_v46  ;;  %v4281_v46 = vshll.u32 %v7370_v41, 16  ;;  %v4289_v52 = vshll.u32 %v7371_v37, 16  ;;  %v4277_v54 = vrot.slane %v4275_v45, 5 }
  0x93   : > { %8229 = vmatprep.subr.bf16.mxu1 %v9020_v13  ;;  %8508 = vmatmul.mubr.bf16.gmra.mrb[4].mxu0 %v9029_v40  ;;  %v1274_v58 = vrot.slane %v1238_v51, 6 }
  0x94   : > { %8516 = vmatpush3.bf16.msra.mxu0 %v9019_v48  ;;  %v1061_v48 = vrot.slane %v1059_v42, 5  ;;  %v4272_v42 = vshrl.u32 %v7369_v35, 16  ;;  %v9039_v35 = vld [vmem:[%s10552_s1 + $0x458] sm:$0xff]  }
  0x95   : > { %8517 = vmatprep.subr.bf16.mxu0 %v9021_v1  ;;  %v1275_v3 = vsel %vm9481_vm11, %v6837_v55, %v1274_v58  ;;  %v4283_v55 = vrot.slane %v4281_v46, 5  ;;  %v4291_v58 = vrot.slane %v4289_v52, 5  ;;  %v1250_v46 = vld [vmem:[%s9240_s15 + $0x34] sm:$0x3] }
  0x96   : > { %8230 = vmatpush3.bf16.msra.mxu1 %v9020_v13  ;;  %v1065_v57 = vor.u32 %v1064_v49, %v1061_v48  ;;  %v6861_v13 = vcombine.low %v1275_v3, %v1279_v9  ;;  %v9032_v48 = vld [vmem:[%s10552_s1 + $0x140] sm:$0xff]   ;;  %v4265_v49 = vrot.slane %v4264_v36, 4  ;;  %v4274_v51 = vrot.slane %v4272_v42, 4  ;;  %v9034_v3 = vld [vmem:[%s10552_s1 + $0x148] sm:$0xff]  }
  0x97   : > { %8231 = vmatprep.subr.bf16.mxu1 %v9022_v29  ;;  %v9040_v36 = vld [vmem:[%s10552_s1 + $0x160] sm:$0xff]   ;;  %v1298_v52 = vrot.slane %v1250_v46, 6  ;;  %v7416_v46 = vld [vmem:[%s9240_s15 + $0x34] sm:$0x1] }
  0x98   : > { %8518 = vmatpush3.bf16.msra.mxu0 %v9021_v1  ;;  %v7365_v1 = vld [vmem:[%s9240_s15 + $0x18] sm:$0xf]  ;;  %v1066_v2 = vsel %vm9367_vm8, %v1057_v56, %v1065_v57  ;;  %v4270_v56 = vsel %vm9348_vm7, %v4265_v49, %v4269_v32  ;;  %v4288_v57 = vrot.slane %v4286_v47, 4  ;;  %v9041_v49 = vld [vmem:[%s10552_s1 + $0x460] sm:$0xff]  }
  0x99   : > { %8519 = vmatprep.subr.bf16.mxu0 %v9023_v24  ;;  %v6828_v8 = vcombine.low %v1048_v63, %v1066_v2  ;;  %v4244_v10 = vshrl.u32 %v7365_v1, 16  ;;  %v4247_v11 = vshll.u32 %v7365_v1, 16  ;;  %v4278_v63 = vor.u32 %v4277_v54, %v4274_v51  ;;  %v1251_v47 = vld [vmem:[%s9240_s15 + $0x38] sm:$0xc]  ;;  %v7377_v54 = vld [vmem:[%s9240_s15 + $0x48] sm:$0xf] }
  0x9a   : > { %8232 = vmatpush3.bf16.msra.mxu1 %v9022_v29  ;;  %v1243_v29 = vld [vmem:[%s9240_s15 + $0x18] sm:$0xc]  ;;  %v4292_v0 = vor.u32 %v4291_v58, %v4288_v57  ;;  %v7378_v57 = vld [vmem:[%s9240_s15 + $0x4c] sm:$0x1]  ;;  %v7379_v58 = vld [vmem:[%s9240_s15 + $0x50] sm:$0xf] }
  0x9b   : > { %8233 = vmatprep.subr.bf16.mxu1 %v9024_v44  ;;  %8220 = vmatmul.mubr.bf16.gmra.mrb[4].mxu1 %v6828_v8  ;;  %v4246_v20 = vrot.slane %v4244_v10, 4  ;;  %v4249_v22 = vrot.slane %v4247_v11, 5  ;;  %v6840_v21 = vrot.slane %v1243_v29, 10  ;;  %v4279_v2 = vrot.slane %v4278_v63, 4  ;;  %v9035_v8 = vld [vmem:[%s10552_s1 + $0x448] sm:$0xff]   ;;  %v9036_v10 = vld [vmem:[%s10552_s1 + $0x150] sm:$0xff]  }
  0x9c   : > { %8520 = vmatpush3.bf16.msra.mxu0 %v9023_v24  ;;  %v1242_v24 = vld [vmem:[%s9240_s15 + $0x14] sm:$0x3]  ;;  %8239 = vmatprep.mubr.bf16.mxu1 %v6861_v13  ;;  %v4293_v4 = vrot.slane %v4292_v0, 4  ;;  %v1245_v11 = vld [vmem:[%s9240_s15 + $0x20] sm:$0xc]  ;;  %v4328_v0 = vshrl.u32 %v7377_v54, 16 }
  0x9d   : > { %8521 = vmatprep.subr.bf16.mxu0 %v9025_v34  ;;  %v1282_v30 = vrot.slane %v1242_v24, 6  ;;  %v4250_v31 = vor.u32 %v4249_v22, %v4246_v20  ;;  %v4284_v6 = vsel %vm9348_vm7, %v4279_v2, %v4283_v55  ;;  %v1247_v13 = vld [vmem:[%s9240_s15 + $0x28] sm:$0xc]  ;;  %v6841_v17 = vrot.slane %v1245_v11, 10  ;;  %v9038_v20 = vld [vmem:[%s10552_s1 + $0x158] sm:$0xff]  }
  0x9e   : > { %8234 = vmatpush3.bf16.msra.mxu1 %v9024_v44  ;;  %v7372_v44 = vld [vmem:[%s9240_s15 + $0x34] sm:$0x1]  ;;  %v1294_v22 = vrot.slane %v1248_v16, 6  ;;  %v7373_v24 = vld [vmem:[%s9240_s15 + $0x38] sm:$0xf]  ;;  %v9043_v11 = vld [vmem:[%s10552_s1 + $0x468] sm:$0xff]  }
  0x9f   : > { %8235 = vmatprep.subr.bf16.mxu1 %v9026_v60  ;;  %v1283_v39 = vsel %vm9481_vm11, %v6839_v25, %v1282_v30  ;;  %v4251_v43 = vrot.slane %v4250_v31, 4  ;;  %v4295_v59 = vshll.u32 %v7372_v44, 16  ;;  %v7374_v25 = vld [vmem:[%s9240_s15 + $0x3c] sm:$0x1]  ;;  %v4300_v29 = vshrl.u32 %v7373_v24, 16  ;;  %v9044_v16 = vld [vmem:[%s10552_s1 + $0x170] sm:$0xff]  }
  0xa0   : > { %8522 = vmatpush3.bf16.msra.mxu0 %v9025_v34  ;;  %v1244_v34 = vld [vmem:[%s9240_s15 + $0x1c] sm:$0x3]  ;;  %v4303_v30 = vshll.u32 %v7373_v24, 16  ;;  %v4309_v31 = vshll.u32 %v7374_v25, 16  ;;  %v1249_v44 = vld [vmem:[%s9240_s15 + $0x30] sm:$0xc] }
  0xa1   : > { %8523 = vmatprep.subr.bf16.mxu0 %v9028_v62  ;;  %v1286_v40 = vrot.slane %v1244_v34, 6  ;;  %v4256_v53 = vsel %vm9348_vm7, %v4251_v43, %v4255_v26  ;;  %v4297_v1 = vrot.slane %v4295_v59, 5  ;;  %v7375_v26 = vld [vmem:[%s9240_s15 + $0x40] sm:$0xf]  ;;  %v6843_v51 = vrot.slane %v1249_v44, 10  ;;  %v9042_v59 = vld [vmem:[%s10552_s1 + $0x168] sm:$0xff]  }
  0xa2   : > { %8236 = vmatpush3.bf16.msra.mxu1 %v9026_v60  ;;  %v7397_v60 = vcombine.low %v4256_v53, %v4270_v56  ;;  %v4317_v34 = vshll.u32 %v7375_v26, 16  ;;  %v4311_v41 = vrot.slane %v4309_v31, 5  ;;  %v6844_v53 = vrot.slane %v1251_v47, 10  ;;  %v7380_v63 = vld [vmem:[%s9240_s15 + $0x54] sm:$0x1] }
  0xa3   : > { %v1287_v50 = vsel %vm9481_vm11, %v6840_v21, %v1286_v40  ;;  %8237 = vmatprep.subr.bf16.mxu1 %v9030_v19  ;;  %v4298_v7 = vsel %vm9348_vm7, %v4293_v4, %v4297_v1  ;;  %v4323_v21 = vshll.u32 %v7376_v28, 16  ;;  %v4305_v40 = vrot.slane %v4303_v30, 5  ;;  %v7410_v28 = vld [vmem:[%s9240_s15 + $0x1c] sm:$0x1]  ;;  %v7411_v30 = vld [vmem:[%s9240_s15 + $0x20] sm:$0xe] }
  0xa4   : > { %8524 = vmatpush3.bf16.msra.mxu0 %v9028_v62  ;;  %v6862_v62 = vcombine.low %v1283_v39, %v1287_v50  ;;  %8527 = vmatprep.mubr.bf16.mxu0 %v7397_v60  ;;  %v7398_v9 = vcombine.low %v4284_v6, %v4298_v7  ;;  %v4302_v39 = vrot.slane %v4300_v29, 4  ;;  %v4319_v42 = vrot.slane %v4317_v34, 5  ;;  %v7412_v31 = vld [vmem:[%s9240_s15 + $0x24] sm:$0x1] }
  0xa5   : > { %8525 = vmatprep.subr.bf16.mxu0 %v9031_v12  ;;  %v4325_v43 = vrot.slane %v4323_v21, 5  ;;  %v4331_v1 = vshll.u32 %v7377_v54, 16  ;;  %v4337_v4 = vshll.u32 %v7378_v57, 16  ;;  %v4342_v6 = vshrl.u32 %v7379_v58, 16  ;;  %v9050_v54 = vld [vmem:[%s10552_s1 + $0x480] sm:$0xff]  }
  0xa6   : > { %8238 = vmatpush3.bf16.msra.mxu1 %v9030_v19  ;;  %v6842_v19 = vrot.slane %v1247_v13, 10  ;;  %v4306_v45 = vor.u32 %v4305_v40, %v4302_v39  ;;  %v7426_v34 = vrot.slane %v7411_v30, 9  ;;  %v4563_v21 = vrot.slane %v7412_v31, 5  ;;  %v9047_v39 = vld [vmem:[%s10552_s1 + $0x478] sm:$0xff]   ;;  %v9049_v40 = vld [vmem:[%s10552_s1 + $0x180] sm:$0xff]  }
  0xa7   : > { %8247 = vmatprep.subr.bf16.mxu1 %v9032_v48  ;;  %v4344_v13 = vrot.slane %v4342_v6, 4  ;;  %v6909_v30 = vld [vmem:[%s9240_s15 + $0x8] sm:$0xf]  ;;  %v6910_v31 = vld [vmem:[%s9240_s15 + $0xc] sm:$0x1] }
  0xa8   : > { %8526 = vmatpush3.bf16.msra.mxu0 %v9031_v12  ;;  %v1246_v12 = vld [vmem:[%s9240_s15 + $0x24] sm:$0x3]  ;;  %v1295_v27 = vsel %vm9481_vm11, %v6842_v19, %v1294_v22  ;;  %v4307_v55 = vrot.slane %v4306_v45, 4  ;;  %v9048_v19 = vld [vmem:[%s9240_s15 + $0x8] ss:$8 sps:$4 sm:$0xff]  }
  0xa9   : > { %8535 = vmatprep.subr.bf16.mxu0 %v9033_v33  ;;  %8240 = vmatmul.mubr.bf16.vlgmr.msra.gmra.mrb[0].mxu1 %v6862_v62  ;;  %v1290_v18 = vrot.slane %v1246_v12, 6  ;;  %v1299_v62 = vsel %vm9481_vm11, %v6843_v51, %v1298_v52  ;;  %v7415_v45 = vld [vmem:[%s9240_s15 + $0x30] sm:$0xe]  ;;  %v4571_v52 = vrot.slane %v7416_v46, 5 }
  0xaa   : > { %8248 = vmatpush3.bf16.msra.mxu1 %v9032_v48  ;;  %v1252_v48 = vld [vmem:[%s9240_s15 + $0x3c] sm:$0x3]  ;;  %v4312_v2 = vsel %vm9348_vm7, %v4307_v55, %v4311_v41  ;;  %v7428_v51 = vrot.slane %v7415_v45, 9  ;;  %v9052_v55 = vld [vmem:[%s10552_s1 + $0x188] sm:$0xff]  }
  0xab   : > { %8249 = vmatprep.subr.bf16.mxu1 %v9034_v3  ;;  %8528 = vmatmul.mubr.bf16.vlgmr.msra.gmra.mrb[0].mxu0 %v7398_v9  ;;  %v1291_v23 = vsel %vm9481_vm11, %v6841_v17, %v1290_v18  ;;  %v1302_v56 = vrot.slane %v1252_v48, 6  ;;  %v4330_v9 = vrot.slane %v4328_v0, 4  ;;  %v4351_v18 = vshll.u32 %v7380_v63, 16  ;;  %v9055_v63 = vld [vmem:[%s10552_s1 + $0x490] sm:$0xff]   ;;  %v9056_v0 = vld [vmem:[%s10552_s1 + $0x198] sm:$0xff]  }
  0xac   : > { %8536 = vmatpush3.bf16.msra.mxu0 %v9033_v33  ;;  %v6863_v32 = vcombine.low %v1291_v23, %v1295_v27  ;;  %v4314_v33 = vshrl.u32 %v7375_v26, 16  ;;  %v9045_v23 = vld [vmem:[%s10552_s1 + $0x470] sm:$0xff]   ;;  %v9046_v26 = vld [vmem:[%s10552_s1 + $0x178] sm:$0xff]   ;;  %v4572_v57 = vsel %vm9249_vm2, %v7428_v51, %v4571_v52  ;;  %v7463_v51 = vld [vmem:[%s9240_s15 + $0x20] sm:$0xe] }
  0xad   : > { %8537 = vmatprep.subr.bf16.mxu0 %v9035_v8  ;;  %v4353_v25 = vrot.slane %v4351_v18, 5  ;;  %v7409_v27 = vld [vmem:[%s9240_s15 + $0x18] sm:$0xe]  ;;  %v7464_v52 = vld [vmem:[%s9240_s15 + $0x24] sm:$0x3] }
  0xae   : > { %8250 = vmatpush3.bf16.msra.mxu1 %v9034_v3  ;;  %v4316_v37 = vrot.slane %v4314_v33, 4  ;;  %8243 = vmatprep.mubr.bf16.mxu1 %v6863_v32  ;;  %v1303_v3 = vsel %vm9481_vm11, %v6844_v53, %v1302_v56  ;;  %v7425_v32 = vrot.slane %v7409_v27, 9  ;;  %v4559_v33 = vrot.slane %v7410_v28, 5  ;;  %v9059_v27 = vld [vmem:[%s10552_s1 + $0x4a0] sm:$0xff]   ;;  %v9060_v28 = vld [vmem:[%s10552_s1 + $0x1a8] sm:$0xff]  }
  0xaf   : > { %8251 = vmatprep.subr.bf16.mxu1 %v9036_v10 }
  0xb0   : > { %8538 = vmatpush3.bf16.msra.mxu0 %v9035_v8  ;;  %v4320_v50 = vor.u32 %v4319_v42, %v4316_v37  ;;  %v6864_v8 = vcombine.low %v1299_v62, %v1303_v3  ;;  %v4560_v41 = vsel %vm9249_vm2, %v7425_v32, %v4559_v33  ;;  %v4564_v37 = vsel %vm9249_vm2, %v7426_v34, %v4563_v21  ;;  %v7413_v42 = vld [vmem:[%s9240_s15 + $0x28] sm:$0xe]  ;;  %v7419_v3 = vld [vmem:[%s9240_s15 + $0x40] sm:$0xe]  ;;  %v6911_v33 = vld [vmem:[%s9240_s15 + $0x10] sm:$0xf] }
  0xb1   : > { %8539 = vmatprep.subr.bf16.mxu0 %v9037_v15  ;;  %v7427_v47 = vrot.slane %v7413_v42, 9  ;;  %v7449_v53 = vcombine.low %v4560_v41, %v4564_v37  ;;  %v9062_v62 = vld [vmem:[%s9240_s15 + $0x28] ss:$8 sps:$4 sm:$0xff]   ;;  %v6912_v34 = vld [vmem:[%s9240_s15 + $0x14] sm:$0x1]  ;;  %v1678_v21 = vshrl.u32 %v6909_v30, 16 }
  0xb2   : > { %8252 = vmatpush3.bf16.msra.mxu1 %v9036_v10  ;;  %v4321_v60 = vrot.slane %v4320_v50, 4  ;;  %v4333_v10 = vrot.slane %v4331_v1, 5  ;;  %v9051_v50 = vld [vmem:[%s9240_s15 + $0x18] ss:$8 sps:$4 sm:$0xff]   ;;  %v1701_v41 = vshll.u32 %v6912_v34, 16 }
  0xb3   : > { %8253 = vmatprep.subr.bf16.mxu1 %v9038_v20  ;;  %8244 = vmatmul.mubr.bf16.gmra.mrb[4].mxu1 %v6864_v8  ;;  %v7417_v1 = vld [vmem:[%s9240_s15 + $0x38] sm:$0xe]  ;;  %v7430_v8 = vrot.slane %v7419_v3, 9  ;;  %v1680_v37 = vrot.slane %v1678_v21, 4  ;;  %v7466_v21 = vld [vmem:[%s9240_s15 + $0x2c] sm:$0x3] }
  0xb4   : > { %8540 = vmatpush3.bf16.msra.mxu0 %v9037_v15  ;;  %v4326_v7 = vsel %vm9348_vm7, %v4321_v60, %v4325_v43  ;;  %v4345_v15 = vshll.u32 %v7379_v58, 16  ;;  %v4334_v17 = vor.u32 %v4333_v10, %v4330_v9  ;;  %8263 = vmatprep.mubr.bf16.mxu1 %v9048_v19  ;;  %v7414_v43 = vld [vmem:[%s9240_s15 + $0x2c] sm:$0x1]  ;;  %v9054_v60 = vld [vmem:[%s10552_s1 + $0x190] sm:$0xff]   ;;  %v7429_v6 = vrot.slane %v7417_v1, 9 }
  0xb5   : > { %8541 = vmatprep.subr.bf16.mxu0 %v9039_v35  ;;  %v7399_v12 = vcombine.low %v4312_v2, %v4326_v7  ;;  %v4567_v48 = vrot.slane %v7414_v43, 5  ;;  %v7418_v2 = vld [vmem:[%s9240_s15 + $0x3c] sm:$0x1]  ;;  %v7423_v19 = vld [vmem:[%s9240_s15 + $0x50] sm:$0xe]  ;;  %v9061_v43 = vld [vmem:[%s10552_s1 + $0x4a8] sm:$0xff]  }
  0xb6   : > { %8254 = vmatpush3.bf16.msra.mxu1 %v9038_v20  ;;  %v4339_v20 = vrot.slane %v4337_v4, 5  ;;  %v4347_v22 = vrot.slane %v4345_v15, 5  ;;  %v4335_v24 = vrot.slane %v4334_v17, 4  ;;  %v7420_v4 = vld [vmem:[%s9240_s15 + $0x44] sm:$0x1]  ;;  %v4575_v7 = vrot.slane %v7418_v2, 5 }
  0xb7   : > { %8255 = vmatprep.subr.bf16.mxu1 %v9040_v36  ;;  %8531 = vmatprep.mubr.bf16.mxu0 %v7399_v12  ;;  %v4568_v56 = vsel %vm9249_vm2, %v7427_v47, %v4567_v48  ;;  %v4579_v9 = vrot.slane %v7420_v4, 5  ;;  %v9058_v12 = vld [vmem:[%s10552_s1 + $0x1a0] sm:$0xff]   ;;  %v7422_v17 = vld [vmem:[%s9240_s15 + $0x4c] sm:$0x1]  ;;  %v1703_v47 = vrot.slane %v1701_v41, 5  ;;  %v9064_v4 = vld [vmem:[%s10552_s1 + $0x4b0] sm:$0xff]  }
  0xb8   : > { %8542 = vmatpush3.bf16.msra.mxu0 %v9039_v35  ;;  %v4348_v29 = vor.u32 %v4347_v22, %v4344_v13  ;;  %v4340_v35 = vsel %vm9348_vm7, %v4335_v24, %v4339_v20  ;;  %v7450_v58 = vcombine.low %v4568_v56, %v4572_v57  ;;  %v4576_v10 = vsel %vm9249_vm2, %v7429_v6, %v4575_v7  ;;  %v9065_v15 = vld [vmem:[%s9240_s15 + $0x38] ss:$8 sps:$4 sm:$0xff]   ;;  %v7424_v20 = vld [vmem:[%s9240_s15 + $0x54] sm:$0x1]  ;;  %v7467_v41 = vld [vmem:[%s9240_s15 + $0x30] sm:$0xe] }
  0xb9   : > { %8543 = vmatprep.subr.bf16.mxu0 %v9041_v49  ;;  %v4580_v13 = vsel %vm9249_vm2, %v7430_v8, %v4579_v9  ;;  %v7432_v24 = vrot.slane %v7423_v19, 9  ;;  %v7461_v48 = vld [vmem:[%s9240_s15 + $0x18] sm:$0xe] }
  0xba   : > { %8256 = vmatpush3.bf16.msra.mxu1 %v9040_v36  ;;  %v4349_v36 = vrot.slane %v4348_v29, 4  ;;  %v7451_v18 = vcombine.low %v4576_v10, %v4580_v13  ;;  %v4779_v56 = vshll.u32 %v7461_v48, 16  ;;  %v6913_v3 = vld [vmem:[%s9240_s15 + $0x18] sm:$0xf]  ;;  %v4803_v13 = vshrl.u32 %v7464_v52, 16 }
  0xbb   : > { %8257 = vmatprep.subr.bf16.mxu1 %v9042_v59  ;;  %v9066_v6 = vld [vmem:[%s10552_s1 + $0x1b8] sm:$0xff]  }
  0xbc   : > { %8544 = vmatpush3.bf16.msra.mxu0 %v9041_v49  ;;  %v4354_v44 = vsel %vm9348_vm7, %v4349_v36, %v4353_v25  ;;  %v4587_v25 = vrot.slane %v7424_v20, 5  ;;  %v1687_v36 = vshll.u32 %v6910_v31, 16  ;;  %v4781_v1 = vrot.slane %v4779_v56, 6 }
  0xbd   : > { %8545 = vmatprep.subr.bf16.mxu0 %v9043_v11  ;;  %v7400_v49 = vcombine.low %v4340_v35, %v4354_v44  ;;  %v1681_v35 = vshll.u32 %v6909_v30, 16  ;;  %v7465_v30 = vld [vmem:[%s9240_s15 + $0x28] sm:$0xe] }
  0xbe   : > { %8258 = vmatpush3.bf16.msra.mxu1 %v9042_v59  ;;  %v9053_v59 = vld [vmem:[%s10552_s1 + $0x488] sm:$0xff]   ;;  %v4588_v29 = vsel %vm9249_vm2, %v7432_v24, %v4587_v25  ;;  %v1689_v44 = vrot.slane %v1687_v36, 5  ;;  %v9067_v24 = vld [vmem:[%s10552_s1 + $0x4b8] sm:$0xff]   ;;  %v9890_v25 = vld [vmem:[%s10552_s1 + $0x1c0] sm:$0xff]  }
  0xbf   : > { %8259 = vmatprep.subr.bf16.mxu1 %v9044_v16  ;;  %8532 = vmatmul.mubr.bf16.gmra.mrb[4].mxu0 %v7400_v49  ;;  %v1683_v42 = vrot.slane %v1681_v35, 5 }
  0xc0   : > { %8546 = vmatpush3.bf16.msra.mxu0 %v9043_v11  ;;  %8551 = vmatprep.mubr.bf16.mxu0 %v7449_v53  ;;  %v9057_v11 = vld [vmem:[%s10552_s1 + $0x498] sm:$0xff]   ;;  %v9063_v53 = vld [vmem:[%s10552_s1 + $0x1b0] sm:$0xff]  }
  0xc1   : > { %8547 = vmatprep.subr.bf16.mxu0 %v9045_v23  ;;  %v1684_v49 = vor.u32 %v1683_v42, %v1680_v37  ;;  %v7468_v37 = vld [vmem:[%s9240_s15 + $0x34] sm:$0x3] }
  0xc2   : > { %8260 = vmatpush3.bf16.msra.mxu1 %v9044_v16  ;;  %v7421_v16 = vld [vmem:[%s9240_s15 + $0x48] sm:$0xe] }
  0xc3   : > { %8261 = vmatprep.subr.bf16.mxu1 %v9046_v26  ;;  %v7431_v22 = vrot.slane %v7421_v16, 9  ;;  %v6914_v16 = vld [vmem:[%s9240_s15 + $0x1c] sm:$0x1] }
  0xc4   : > { %8548 = vmatpush3.bf16.msra.mxu0 %v9045_v23  ;;  %v4583_v23 = vrot.slane %v7422_v17, 5  ;;  %v6915_v17 = vld [vmem:[%s9240_s15 + $0x20] sm:$0xf] }
  0xc5   : > { %8549 = vmatprep.subr.bf16.mxu0 %v9047_v39  ;;  %v1720_v34 = vshrl.u32 %v6915_v17, 16 }
  0xc6   : > { %8262 = vmatpush3.bf16.msra.mxu1 %v9046_v26  ;;  %v4584_v26 = vsel %vm9249_vm2, %v7431_v22, %v4583_v23  ;;  %v6916_v22 = vld [vmem:[%s9240_s15 + $0x24] sm:$0x1]  ;;  %v1706_v23 = vshrl.u32 %v6913_v3, 16 }
  0xc7   : > { %8271 = vmatprep.subr.bf16.mxu1 %v9049_v40  ;;  %v7452_v32 = vcombine.low %v4584_v26, %v4588_v29  ;;  %v1709_v29 = vshll.u32 %v6913_v3, 16 }
  0xc8   : > { %8550 = vmatpush3.bf16.msra.mxu0 %v9047_v39  ;;  %v1692_v39 = vshrl.u32 %v6911_v33, 16 }
  0xc9   : > { %8264 = vmatmul.mubr.bf16.vlgmr.msra.gmra.mrb[0].mxu1 %v9051_v50  ;;  %8559 = vmatprep.subr.bf16.mxu0 %v9050_v54  ;;  %v7462_v50 = vld [vmem:[%s9240_s15 + $0x1c] sm:$0x3] }
  0xca   : > { %8272 = vmatpush3.bf16.msra.mxu1 %v9049_v40  ;;  %8267 = vmatprep.mubr.bf16.mxu1 %v9062_v62  ;;  %v1695_v40 = vshll.u32 %v6911_v33, 16  ;;  %v1694_v45 = vrot.slane %v1692_v39, 4  ;;  %v4785_v57 = vshrl.u32 %v7462_v50, 16  ;;  %v4797_v62 = vshll.u32 %v7463_v51, 16 }
  0xcb   : > { %8273 = vmatprep.subr.bf16.mxu1 %v9052_v55  ;;  %8552 = vmatmul.mubr.bf16.vlgmr.msra.gmra.mrb[0].mxu0 %v7450_v58  ;;  %v1685_v58 = vrot.slane %v1684_v49, 4  ;;  %v1715_v33 = vshll.u32 %v6914_v16, 16  ;;  %v1711_v39 = vrot.slane %v1709_v29, 5  ;;  %v4815_v49 = vshll.u32 %v7465_v30, 16  ;;  %v9070_v16 = vld [vmem:[%s10552_s1 + $0x1c8] sm:$0xff]  }
  0xcc   : > { %8560 = vmatpush3.bf16.msra.mxu0 %v9050_v54  ;;  %8555 = vmatprep.mubr.bf16.mxu0 %v7451_v18  ;;  %v1697_v46 = vrot.slane %v1695_v40, 5  ;;  %v4787_v2 = vrot.slane %v4785_v57, 5  ;;  %v4799_v10 = vrot.slane %v4797_v62, 6  ;;  %v1723_v40 = vshll.u32 %v6915_v17, 16  ;;  %v9071_v29 = vld [vmem:[%s10552_s1 + $0x4c8] sm:$0xff]  }
  0xcd   : > { %8561 = vmatprep.subr.bf16.mxu0 %v9053_v59  ;;  %v1690_v7 = vsel %vm9348_vm7, %v1685_v58, %v1689_v44  ;;  %v1717_v42 = vrot.slane %v1715_v33, 5  ;;  %v1722_v44 = vrot.slane %v1720_v34, 4  ;;  %v4817_v57 = vrot.slane %v4815_v49, 6 }
  0xce   : > { %8274 = vmatpush3.bf16.msra.mxu1 %v9052_v55  ;;  %v1698_v54 = vor.u32 %v1697_v46, %v1694_v45  ;;  %v4776_v55 = vshrl.u32 %v7461_v48, 16  ;;  %v4812_v45 = vshrl.u32 %v7465_v30, 16  ;;  %v1725_v48 = vrot.slane %v1723_v40, 5 }
  0xcf   : > { %8275 = vmatprep.subr.bf16.mxu1 %v9054_v60  ;;  %v4824_v58 = vshll.u32 %v7466_v21, 16  ;;  %v4833_v62 = vshll.u32 %v7467_v41, 16 }
  0xd0   : > { %8562 = vmatpush3.bf16.msra.mxu0 %v9053_v59  ;;  %v4788_v59 = vshll.u32 %v7462_v50, 16  ;;  %v1726_v56 = vor.u32 %v1725_v48, %v1722_v44  ;;  %v7472_v48 = vld [vmem:[%s9240_s15 + $0x44] sm:$0x3] }
  0xd1   : > { %8563 = vmatprep.subr.bf16.mxu0 %v9055_v63  ;;  %8268 = vmatmul.mubr.bf16.gmra.mrb[4].mxu1 %v9065_v15  ;;  %v4806_v15 = vshll.u32 %v7464_v52, 16  ;;  %v4814_v52 = vrot.slane %v4812_v45, 5  ;;  %v4826_v3 = vrot.slane %v4824_v58, 6 }
  0xd2   : > { %8276 = vmatpush3.bf16.msra.mxu1 %v9054_v60  ;;  %v4794_v60 = vshrl.u32 %v7463_v51, 16  ;;  %v4790_v8 = vrot.slane %v4788_v59, 6 }
  0xd3   : > { %8277 = vmatprep.subr.bf16.mxu1 %v9056_v0  ;;  %8556 = vmatmul.mubr.bf16.gmra.mrb[4].mxu0 %v7452_v32  ;;  %v1708_v32 = vrot.slane %v1706_v23, 4 }
  0xd4   : > { %8564 = vmatpush3.bf16.msra.mxu0 %v9055_v63  ;;  %v1699_v63 = vrot.slane %v1698_v54, 4  ;;  %v4796_v9 = vrot.slane %v4794_v60, 5  ;;  %v4791_v19 = vor.u32 %v4790_v8, %v4787_v2  ;;  %v9069_v54 = vld [vmem:[%s10552_s1 + $0x4c0] sm:$0xff]   ;;  %v4830_v60 = vshrl.u32 %v7467_v41, 16  ;;  %v7469_v41 = vld [vmem:[%s9240_s15 + $0x38] sm:$0xe] }
  0xd5   : > { %8565 = vmatprep.subr.bf16.mxu0 %v9057_v11  ;;  %v4818_v2 = vor.u32 %v4817_v57, %v4814_v52  ;;  %v4842_v8 = vshll.u32 %v7468_v37, 16  ;;  %v4848_v45 = vshrl.u32 %v7469_v41, 16  ;;  %v4851_v49 = vshll.u32 %v7469_v41, 16 }
  0xd6   : > { %8278 = vmatpush3.bf16.msra.mxu1 %v9056_v0  ;;  %v4778_v0 = vrot.slane %v4776_v55, 5  ;;  %v4800_v20 = vor.u32 %v4799_v10, %v4796_v9 }
  0xd7   : > { %8279 = vmatprep.subr.bf16.mxu1 %v9058_v12  ;;  %v4819_v10 = vrot.slane %v4818_v2, 4  ;;  %v4853_v58 = vrot.slane %v4851_v49, 6  ;;  %v6921_v2 = vld [vmem:[%s9240_s15 + $0x38] sm:$0xf] }
  0xd8   : > { %8566 = vmatpush3.bf16.msra.mxu0 %v9057_v11  ;;  %v1704_v11 = vsel %vm9348_vm7, %v1699_v63, %v1703_v47  ;;  %v4801_v31 = vrot.slane %v4800_v20, 4  ;;  %v1712_v47 = vor.u32 %v1711_v39, %v1708_v32  ;;  %v4839_v63 = vshrl.u32 %v7468_v37, 16  ;;  %v9072_v20 = vld [vmem:[%s10552_s1 + $0x1d0] sm:$0xff]  }
  0xd9   : > { %8567 = vmatprep.subr.bf16.mxu0 %v9059_v27  ;;  %v6941_v18 = vcombine.low %v1690_v7, %v1704_v11 }
  0xda   : > { %8280 = vmatpush3.bf16.msra.mxu1 %v9058_v12  ;;  %v4782_v12 = vor.u32 %v4781_v1, %v4778_v0  ;;  %v1713_v55 = vrot.slane %v1712_v47, 4  ;;  %v1727_v1 = vrot.slane %v1726_v56, 4  ;;  %v4841_v7 = vrot.slane %v4839_v63, 5  ;;  %v7471_v47 = vld [vmem:[%s9240_s15 + $0x40] sm:$0xe]  ;;  %v9075_v56 = vld [vmem:[%s10552_s1 + $0x4d8] sm:$0xff]  }
  0xdb   : > { %8281 = vmatprep.subr.bf16.mxu1 %v9060_v28  ;;  %8287 = vmatprep.mubr.bf16.mxu1 %v6941_v18 }
  0xdc   : > { %8568 = vmatpush3.bf16.msra.mxu0 %v9059_v27  ;;  %v4783_v26 = vrot.slane %v4782_v12, 4  ;;  %v4805_v27 = vrot.slane %v4803_v13, 5  ;;  %v1718_v0 = vsel %vm9348_vm7, %v1713_v55, %v1717_v42  ;;  %v4866_v55 = vshrl.u32 %v7471_v47, 16 }
  0xdd   : > { %8569 = vmatprep.subr.bf16.mxu0 %v9061_v43 }
  0xde   : > { %8282 = vmatpush3.bf16.msra.mxu1 %v9060_v28  ;;  %v4808_v28 = vrot.slane %v4806_v15, 6  ;;  %v4792_v35 = vsel %vm9367_vm8, %v4783_v26, %v4791_v19  ;;  %v4844_v15 = vrot.slane %v4842_v8, 6  ;;  %v6919_v26 = vld [vmem:[%s9240_s15 + $0x30] sm:$0xf]  ;;  %v6922_v8 = vld [vmem:[%s9240_s15 + $0x3c] sm:$0x1] }
  0xdf   : > { %8283 = vmatprep.subr.bf16.mxu1 %v9063_v53  ;;  %v1748_v32 = vshrl.u32 %v6919_v26, 16  ;;  %v1751_v33 = vshll.u32 %v6919_v26, 16  ;;  %v1765_v26 = vshll.u32 %v6921_v2, 16 }
  0xe0   : > { %8570 = vmatpush3.bf16.msra.mxu0 %v9061_v43  ;;  %v4809_v36 = vor.u32 %v4808_v28, %v4805_v27  ;;  %v1729_v43 = vshll.u32 %v6916_v22, 16  ;;  %v4845_v19 = vor.u32 %v4844_v15, %v4841_v7  ;;  %v6917_v22 = vld [vmem:[%s9240_s15 + $0x28] sm:$0xf]  ;;  %v6920_v27 = vld [vmem:[%s9240_s15 + $0x34] sm:$0x1]  ;;  %v4878_v7 = vshll.u32 %v7472_v48, 16 }
  0xe1   : > { %8571 = vmatprep.subr.bf16.mxu0 %v9064_v4  ;;  %v1734_v30 = vshrl.u32 %v6917_v22, 16  ;;  %v1757_v34 = vshll.u32 %v6920_v27, 16  ;;  %v1750_v37 = vrot.slane %v1748_v32, 4  ;;  %v1753_v42 = vrot.slane %v1751_v33, 5  ;;  %v7475_v33 = vld [vmem:[%s9240_s15 + $0x50] sm:$0xe] }
  0xe2   : > { %8284 = vmatpush3.bf16.msra.mxu1 %v9063_v53  ;;  %v4810_v46 = vsel %vm9367_vm8, %v4801_v31, %v4809_v36  ;;  %v1731_v51 = vrot.slane %v1729_v43, 5  ;;  %v4821_v53 = vshrl.u32 %v7466_v21, 16  ;;  %v9073_v21 = vld [vmem:[%s10552_s1 + $0x4d0] sm:$0xff]   ;;  %v7470_v43 = vld [vmem:[%s9240_s15 + $0x3c] sm:$0x3]  ;;  %v1762_v15 = vshrl.u32 %v6921_v2, 16 }
  0xe3   : > { %8285 = vmatprep.subr.bf16.mxu1 %v9066_v6  ;;  %v7493_v50 = vcombine.low %v4792_v35, %v4810_v46  ;;  %v9074_v35 = vld [vmem:[%s10552_s1 + $0x1d8] sm:$0xff]   ;;  %v1736_v36 = vrot.slane %v1734_v30, 4  ;;  %v1759_v44 = vrot.slane %v1757_v34, 5  ;;  %v1754_v52 = vor.u32 %v1753_v42, %v1750_v37  ;;  %v9080_v42 = vld [vmem:[%s10552_s1 + $0x1f0] sm:$0xff]  }
  0xe4   : > { %8572 = vmatpush3.bf16.msra.mxu0 %v9064_v4  ;;  %v4823_v59 = vrot.slane %v4821_v53, 5  ;;  %v4832_v4 = vrot.slane %v4830_v60, 5  ;;  %v1732_v9 = vsel %vm9348_vm7, %v1727_v1, %v1731_v51  ;;  %v9076_v51 = vld [vmem:[%s10552_s1 + $0x1e0] sm:$0xff]   ;;  %v4850_v53 = vrot.slane %v4848_v45, 5 }
  0xe5   : > { %8573 = vmatprep.subr.bf16.mxu0 %v9067_v24  ;;  %8575 = vmatprep.mubr.bf16.mxu0 %v7493_v50  ;;  %v6942_v12 = vcombine.low %v1718_v0, %v1732_v9  ;;  %v4857_v50 = vshrl.u32 %v7470_v43, 16  ;;  %v4869_v60 = vshll.u32 %v7471_v47, 16  ;;  %v4868_v0 = vrot.slane %v4866_v55, 5  ;;  %v6923_v9 = vld [vmem:[%s9240_s15 + $0x40] sm:$0xf] }
  0xe6   : > { %8286 = vmatpush3.bf16.msra.mxu1 %v9066_v6  ;;  %v4835_v6 = vrot.slane %v4833_v62, 6  ;;  %v4827_v11 = vor.u32 %v4826_v3, %v4823_v59  ;;  %v1755_v62 = vrot.slane %v1754_v52, 4  ;;  %v4875_v1 = vshrl.u32 %v7472_v48, 16  ;;  %v9079_v48 = vld [vmem:[%s10552_s1 + $0x4e8] sm:$0xff]  }
  0xe7   : > { %8295 = vmatprep.subr.bf16.mxu1 %v9890_v25  ;;  %v4859_v59 = vrot.slane %v4857_v50, 5  ;;  %v1771_v27 = vshll.u32 %v6922_v8, 16  ;;  %v1779_v32 = vshll.u32 %v6923_v9, 16  ;;  %v1767_v34 = vrot.slane %v1765_v26, 5  ;;  %v9082_v8 = vld [vmem:[%s10552_s1 + $0x1f8] sm:$0xff]  }
  0xe8   : > { %8574 = vmatpush3.bf16.msra.mxu0 %v9067_v24  ;;  %v4836_v13 = vor.u32 %v4835_v6, %v4832_v4  ;;  %v4828_v17 = vsel %vm9367_vm8, %v4819_v10, %v4827_v11  ;;  %v6918_v24 = vld [vmem:[%s9240_s15 + $0x2c] sm:$0x1]  ;;  %v4854_v4 = vor.u32 %v4853_v58, %v4850_v53  ;;  %v4871_v6 = vrot.slane %v4869_v60, 6  ;;  %v6953_v53 = vld [vmem:[%s9240_s15 + $0x8] sm:$0xe] }
  0xe9   : > { %8583 = vmatprep.subr.bf16.mxu0 %v9069_v54  ;;  %8288 = vmatmul.mubr.bf16.vlgmr.msra.gmra.mrb[0].mxu1 %v6942_v12  ;;  %v1743_v31 = vshll.u32 %v6918_v24, 16  ;;  %v9078_v10 = vld [vmem:[%s10552_s1 + $0x1e8] sm:$0xff]   ;;  %v1760_v11 = vsel %vm9348_vm7, %v1755_v62, %v1759_v44  ;;  %v1764_v24 = vrot.slane %v1762_v15, 4  ;;  %v6956_v60 = vld [vmem:[%s9240_s15 + $0x14] sm:$0x1] }
  0xea   : > { %v4837_v18 = vrot.slane %v4836_v13, 4  ;;  %8296 = vmatpush3.bf16.msra.mxu1 %v9890_v25  ;;  %v1737_v25 = vshll.u32 %v6917_v22, 16  ;;  %v4877_v13 = vrot.slane %v4875_v1, 5  ;;  %v6924_v22 = vld [vmem:[%s9240_s15 + $0x44] sm:$0x1]  ;;  %v9081_v62 = vld [vmem:[%s10552_s1 + $0x4f0] sm:$0xff]  }
  0xeb   : > { %8297 = vmatprep.subr.bf16.mxu1 %v9070_v16  ;;  %v1745_v40 = vrot.slane %v1743_v31, 5  ;;  %v6954_v58 = vld [vmem:[%s9240_s15 + $0xc] sm:$0x1]  ;;  %v7506_v15 = vld [vmem:[%s9240_s15 + $0x1c] sm:$0x3] }
  0xec   : > { %v4846_v23 = vsel %vm9367_vm8, %v4837_v18, %v4845_v19  ;;  %v1739_v39 = vrot.slane %v1737_v25, 5  ;;  %v4855_v18 = vrot.slane %v4854_v4, 4  ;;  %v4872_v19 = vor.u32 %v4871_v6, %v4868_v0 }
  0xed   : > { %v7494_v28 = vcombine.low %v4828_v17, %v4846_v23  ;;  %v7473_v23 = vld [vmem:[%s9240_s15 + $0x48] sm:$0xe] }
  0xee   : > { %8298 = vmatpush3.bf16.msra.mxu1 %v9070_v16  ;;  %v1740_v46 = vor.u32 %v1739_v39, %v1736_v36  ;;  %v9077_v16 = vld [vmem:[%s10552_s1 + $0x4e0] sm:$0xff]   ;;  %v4873_v25 = vrot.slane %v4872_v19, 4  ;;  %v4884_v41 = vshrl.u32 %v7473_v23, 16  ;;  %v4887_v37 = vshll.u32 %v7473_v23, 16 }
  0xef   : > { %8576 = vmatmul.mubr.bf16.vlgmr.msra.gmra.mrb[0].mxu0 %v7494_v28  ;;  %8299 = vmatprep.subr.bf16.mxu1 %v9072_v20  ;;  %v1776_v28 = vshrl.u32 %v6923_v9, 16  ;;  %v6969_v19 = vrot.slane %v6953_v53, 9 }
  0xf0   : > { %8584 = vmatpush3.bf16.msra.mxu0 %v9069_v54  ;;  %v4860_v54 = vshll.u32 %v7470_v43, 16  ;;  %v1741_v57 = vrot.slane %v1740_v46, 4  ;;  %v1768_v43 = vor.u32 %v1767_v34, %v1764_v24  ;;  %v7476_v46 = vld [vmem:[%s9240_s15 + $0x54] sm:$0x3]  ;;  %v4886_v50 = vrot.slane %v4884_v41, 5  ;;  %v9084_v41 = vld [vmem:[%s10552_s1 + $0x200] sm:$0xff]  }
  0xf1   : > { %8585 = vmatprep.subr.bf16.mxu0 %v9071_v29  ;;  %v1778_v36 = vrot.slane %v1776_v28, 4  ;;  %v4911_v2 = vshrl.u32 %v7476_v46, 16  ;;  %v1993_v24 = vrot.slane %v6954_v58, 5 }
  0xf2   : > { %8300 = vmatpush3.bf16.msra.mxu1 %v9072_v20  ;;  %v4862_v63 = vrot.slane %v4860_v54, 6  ;;  %v1746_v3 = vsel %vm9348_vm7, %v1741_v57, %v1745_v40  ;;  %v4880_v20 = vrot.slane %v4878_v7, 6  ;;  %v1781_v40 = vrot.slane %v1779_v32, 5 }
  0xf3   : > { %8301 = vmatprep.subr.bf16.mxu1 %v9074_v35  ;;  %v6943_v17 = vcombine.low %v1746_v3, %v1760_v11  ;;  %v1769_v54 = vrot.slane %v1768_v43, 4  ;;  %v4905_v57 = vshll.u32 %v7475_v33, 16  ;;  %v4914_v7 = vshll.u32 %v7476_v46, 16 }
  0xf4   : > { %8586 = vmatpush3.bf16.msra.mxu0 %v9071_v29  ;;  %v4863_v12 = vor.u32 %v4862_v63, %v4859_v59  ;;  %v7474_v29 = vld [vmem:[%s9240_s15 + $0x4c] sm:$0x3]  ;;  %v4881_v31 = vor.u32 %v4880_v20, %v4877_v13  ;;  %v1782_v49 = vor.u32 %v1781_v40, %v1778_v36  ;;  %v6955_v59 = vld [vmem:[%s9240_s15 + $0x10] sm:$0xe]  ;;  %v7505_v13 = vld [vmem:[%s9240_s15 + $0x18] sm:$0xc]  ;;  %v1994_v32 = vsel %vm9249_vm2, %v6969_v19, %v1993_v24 }
  0xf5   : > { %8587 = vmatprep.subr.bf16.mxu0 %v9073_v21  ;;  %8291 = vmatprep.mubr.bf16.mxu1 %v6943_v17  ;;  %v4893_v47 = vshrl.u32 %v7474_v29, 16  ;;  %v4896_v52 = vshll.u32 %v7474_v29, 16  ;;  %v4907_v6 = vrot.slane %v4905_v57, 6  ;;  %v7507_v20 = vld [vmem:[%s9240_s15 + $0x20] sm:$0xc]  ;;  %v6970_v26 = vrot.slane %v6955_v59, 9 }
  0xf6   : > { %8302 = vmatpush3.bf16.msra.mxu1 %v9074_v35  ;;  %v4864_v30 = vsel %vm9367_vm8, %v4855_v18, %v4863_v12  ;;  %v1773_v35 = vrot.slane %v1771_v27, 5  ;;  %v4882_v39 = vsel %vm9367_vm8, %v4873_v25, %v4881_v31  ;;  %v1783_v63 = vrot.slane %v1782_v49, 4  ;;  %v6957_v36 = vld [vmem:[%s9240_s15 + $0x18] sm:$0xe]  ;;  %v7516_v24 = vld [vmem:[%s9240_s15 + $0x44] sm:$0x3] }
  0xf7   : > { %8303 = vmatprep.subr.bf16.mxu1 %v9076_v51  ;;  %v7495_v44 = vcombine.low %v4864_v30, %v4882_v39  ;;  %v4895_v55 = vrot.slane %v4893_v47, 5  ;;  %v4898_v1 = vrot.slane %v4896_v52, 6  ;;  %v4913_v12 = vrot.slane %v4911_v2, 5  ;;  %v9083_v30 = vld [vmem:[%s10552_s1 + $0x4f8] sm:$0xff]   ;;  %v9085_v47 = vld [vmem:[%s10552_s1 + $0x500] sm:$0xff]  }
  0xf8   : > { %8588 = vmatpush3.bf16.msra.mxu0 %v9073_v21  ;;  %v1785_v21 = vshll.u32 %v6924_v22, 16  ;;  %v1774_v3 = vsel %vm9348_vm7, %v1769_v54, %v1773_v35  ;;  %v4916_v18 = vrot.slane %v4914_v7, 6  ;;  %v7508_v22 = vld [vmem:[%s9240_s15 + $0x24] sm:$0x3]  ;;  %v1997_v27 = vrot.slane %v6956_v60, 5  ;;  %v9089_v7 = vld [vmem:[%s10552_s1 + $0x510] sm:$0xff]  }
  0xf9   : > { %8589 = vmatprep.subr.bf16.mxu0 %v9075_v56  ;;  %8579 = vmatprep.mubr.bf16.mxu0 %v7495_v44  ;;  %v4899_v11 = vor.u32 %v4898_v1, %v4895_v55  ;;  %v7521_v25 = vrot.slane %v7505_v13, 10  ;;  %v5123_v31 = vrot.slane %v7506_v15, 6  ;;  %v7522_v34 = vrot.slane %v7507_v20, 10  ;;  %v6960_v44 = vld [vmem:[%s9240_s15 + $0x24] sm:$0x1] }
  0xfa   : > { %8304 = vmatpush3.bf16.msra.mxu1 %v9076_v51  ;;  %v1787_v45 = vrot.slane %v1785_v21, 5  ;;  %v4889_v51 = vrot.slane %v4887_v37, 6  ;;  %v4917_v29 = vor.u32 %v4916_v18, %v4913_v12  ;;  %v5127_v35 = vrot.slane %v7508_v22, 6  ;;  %v6958_v21 = vld [vmem:[%s9240_s15 + $0x1c] sm:$0x1] }
  0xfb   : > { %8305 = vmatprep.subr.bf16.mxu1 %v9078_v10  ;;  %v5124_v37 = vsel %vm9481_vm11, %v7521_v25, %v5123_v31  ;;  %v6971_v43 = vrot.slane %v6957_v36, 9  ;;  %v2005_v53 = vrot.slane %v6960_v44, 5  ;;  %v7511_v54 = vld [vmem:[%s9240_s15 + $0x30] sm:$0xc]  ;;  %v7512_v55 = vld [vmem:[%s9240_s15 + $0x34] sm:$0x3] }
  0xfc   : > { %8590 = vmatpush3.bf16.msra.mxu0 %v9075_v56  ;;  %v4902_v56 = vshrl.u32 %v7475_v33, 16  ;;  %v4890_v0 = vor.u32 %v4889_v51, %v4886_v50  ;;  %v1788_v9 = vsel %vm9348_vm7, %v1783_v63, %v1787_v45  ;;  %v1998_v33 = vsel %vm9249_vm2, %v6970_v26, %v1997_v27  ;;  %v7509_v50 = vld [vmem:[%s9240_s15 + $0x28] sm:$0xc]  ;;  %v7510_v51 = vld [vmem:[%s9240_s15 + $0x2c] sm:$0x3]  ;;  %v9091_v26 = vld [vmem:[%s10552_s1 + $0x518] sm:$0xff]  }
  0xfd   : > { %8591 = vmatprep.subr.bf16.mxu0 %v9077_v16  ;;  %v6993_v40 = vcombine.low %v1994_v32, %v1998_v33  ;;  %v5128_v46 = vsel %vm9481_vm11, %v7522_v34, %v5127_v35  ;;  %v5131_v58 = vrot.slane %v7510_v51, 6  ;;  %v7524_v59 = vrot.slane %v7511_v54, 10  ;;  %v9086_v63 = vld [vmem:[%s10552_s1 + $0x208] sm:$0xff]   ;;  %v6964_v12 = vld [vmem:[%s9240_s15 + $0x34] sm:$0x1]  ;;  %v9092_v25 = vld [vmem:[%s10552_s1 + $0x220] sm:$0xff]  }
  0xfe   : > { %8306 = vmatpush3.bf16.msra.mxu1 %v9078_v10  ;;  %v4904_v4 = vrot.slane %v4902_v56, 5  ;;  %v4891_v10 = vrot.slane %v4890_v0, 4  ;;  %v7545_v52 = vcombine.low %v5124_v37, %v5128_v46  ;;  %v7523_v56 = vrot.slane %v7509_v50, 10  ;;  %v7513_v18 = vld [vmem:[%s9240_s15 + $0x38] sm:$0xc] }
  0xff   : > { %8307 = vmatprep.subr.bf16.mxu1 %v9080_v42  ;;  %v5135_v60 = vrot.slane %v7512_v55, 6  ;;  %v7514_v22 = vld [vmem:[%s9240_s15 + $0x3c] sm:$0x3]  ;;  %v5143_v31 = vrot.slane %v7516_v24, 6  ;;  %v6965_v32 = vld [vmem:[%s9240_s15 + $0x38] sm:$0xe] }
 0x100   : > { %8592 = vmatpush3.bf16.msra.mxu0 %v9077_v16  ;;  %v6944_v16 = vcombine.low %v1774_v3, %v1788_v9  ;;  %v4908_v17 = vor.u32 %v4907_v6, %v4904_v4  ;;  %v4900_v23 = vsel %vm9367_vm8, %v4891_v10, %v4899_v11  ;;  %v5132_v1 = vsel %vm9481_vm11, %v7523_v56, %v5131_v58  ;;  %v9087_v4 = vld [vmem:[%s10552_s1 + $0x508] sm:$0xff]   ;;  %v9088_v6 = vld [vmem:[%s10552_s1 + $0x210] sm:$0xff]   ;;  %v6966_v34 = vld [vmem:[%s9240_s15 + $0x3c] sm:$0x1] }
 0x101   : > { %8593 = vmatprep.subr.bf16.mxu0 %v9079_v48  ;;  %v5136_v2 = vsel %vm9481_vm11, %v7524_v59, %v5135_v60  ;;  %v6961_v9 = vld [vmem:[%s9240_s15 + $0x28] sm:$0xe]  ;;  %v6962_v10 = vld [vmem:[%s9240_s15 + $0x2c] sm:$0x1]  ;;  %v6963_v11 = vld [vmem:[%s9240_s15 + $0x30] sm:$0xe] }
 0x102   : > { %8308 = vmatpush3.bf16.msra.mxu1 %v9080_v42  ;;  %v4909_v28 = vrot.slane %v4908_v17, 4  ;;  %v6959_v42 = vld [vmem:[%s9240_s15 + $0x20] sm:$0xe]  ;;  %v7546_v3 = vcombine.low %v5132_v1, %v5136_v2  ;;  %v6973_v13 = vrot.slane %v6961_v9, 9  ;;  %v2009_v15 = vrot.slane %v6962_v10, 5  ;;  %v9095_v55 = vld [vmem:[%s10552_s1 + $0x528] sm:$0xff]  }
 0x103   : > { %8292 = vmatmul.mubr.bf16.gmra.mrb[4].mxu1 %v6944_v16  ;;  %8309 = vmatprep.subr.bf16.mxu1 %v9082_v8  ;;  %v6972_v49 = vrot.slane %v6959_v42, 9  ;;  %v6974_v16 = vrot.slane %v6963_v11, 9  ;;  %v2013_v17 = vrot.slane %v6964_v12, 5  ;;  %v6967_v35 = vld [vmem:[%s9240_s15 + $0x40] sm:$0xe]  ;;  %v2017_v37 = vrot.slane %v6966_v34, 5 }
 0x104   : > { %8594 = vmatpush3.bf16.msra.mxu0 %v9079_v48  ;;  %v4918_v39 = vsel %vm9367_vm8, %v4909_v28, %v4917_v29  ;;  %v2001_v48 = vrot.slane %v6958_v21, 5  ;;  %8311 = vmatprep.mubr.bf16.mxu1 %v6993_v40  ;;  %v2010_v19 = vsel %vm9249_vm2, %v6973_v13, %v2009_v15  ;;  %v7525_v28 = vrot.slane %v7513_v18, 10  ;;  %v6968_v36 = vld [vmem:[%s9240_s15 + $0x44] sm:$0x1]  ;;  %v7517_v44 = vld [vmem:[%s9240_s15 + $0x48] sm:$0xc] }
 0x105   : > { %8595 = vmatprep.subr.bf16.mxu0 %v9081_v62  ;;  %v7496_v45 = vcombine.low %v4900_v23, %v4918_v39  ;;  %v2014_v20 = vsel %vm9249_vm2, %v6974_v16, %v2013_v17  ;;  %v7515_v23 = vld [vmem:[%s9240_s15 + $0x40] sm:$0xc]  ;;  %v5139_v29 = vrot.slane %v7514_v22, 6  ;;  %v9094_v39 = vld [vmem:[%s10552_s1 + $0x228] sm:$0xff]   ;;  %v6976_v42 = vrot.slane %v6967_v35, 9  ;;  %v9096_v2 = vld [vmem:[%s10552_s1 + $0x230] sm:$0xff]  }
 0x106   : > { %8310 = vmatpush3.bf16.msra.mxu1 %v9082_v8  ;;  %v2002_v57 = vsel %vm9249_vm2, %v6971_v43, %v2001_v48  ;;  %v9090_v8 = vld [vmem:[%s10552_s1 + $0x218] sm:$0xff]   ;;  %v6995_v27 = vcombine.low %v2010_v19, %v2014_v20  ;;  %v9093_v21 = vld [vmem:[%s10552_s1 + $0x520] sm:$0xff]   ;;  %v7518_v46 = vld [vmem:[%s9240_s15 + $0x4c] sm:$0x3]  ;;  %v7527_v48 = vrot.slane %v7517_v44, 10 }
 0x107   : > { %8580 = vmatmul.mubr.bf16.gmra.mrb[4].mxu0 %v7496_v45  ;;  %8319 = vmatprep.subr.bf16.mxu1 %v9084_v41  ;;  %v5140_v33 = vsel %vm9481_vm11, %v7525_v28, %v5139_v29  ;;  %v2021_v45 = vrot.slane %v6968_v36, 5  ;;  %v7520_v50 = vld [vmem:[%s9240_s15 + $0x54] sm:$0x3]  ;;  %v5147_v51 = vrot.slane %v7518_v46, 6  ;;  %v7005_v58 = vld [vmem:[%s9240_s15 + $0x8] sm:$0xe] }
 0x108   : > { %8596 = vmatpush3.bf16.msra.mxu0 %v9081_v62  ;;  %8599 = vmatprep.mubr.bf16.mxu0 %v7545_v52  ;;  %v2006_v62 = vsel %vm9249_vm2, %v6972_v49, %v2005_v53  ;;  %v5151_v54 = vrot.slane %v7520_v50, 6  ;;  %v7006_v59 = vld [vmem:[%s9240_s15 + $0xc] sm:$0x3]  ;;  %v2213_v1 = vshll.u32 %v7005_v58, 16  ;;  %v9097_v12 = vld [vmem:[%s10552_s1 + $0x530] sm:$0xff]   ;;  %v9099_v35 = vld [vmem:[%s10552_s1 + $0x538] sm:$0xff]  }
 0x109   : > { %8597 = vmatprep.subr.bf16.mxu0 %v9083_v30  ;;  %v6994_v0 = vcombine.low %v2002_v57, %v2006_v62  ;;  %v2022_v53 = vsel %vm9249_vm2, %v6976_v42, %v2021_v45  ;;  %v5148_v57 = vsel %vm9481_vm11, %v7527_v48, %v5147_v51  ;;  %v7008_v62 = vld [vmem:[%s9240_s15 + $0x14] sm:$0x3]  ;;  %v9101_v22 = vld [vmem:[%s9240_s15 + $0x20] ss:$8 sps:$4 sm:$0xff]   ;;  %v7009_v29 = vld [vmem:[%s9240_s15 + $0x18] sm:$0xe] }
 0x10a   : > { %v2215_v9 = vrot.slane %v2213_v1, 6  ;;  %v2237_v11 = vshrl.u32 %v7008_v62, 16  ;;  %v2240_v17 = vshll.u32 %v7008_v62, 16  ;;  %v2249_v34 = vshll.u32 %v7009_v29, 16  ;;  %v9100_v45 = vld [vmem:[%s10552_s1 + $0x240] sm:$0xff]   ;;  %v9105_v62 = vld [vmem:[%s10552_s1 + $0x548] sm:$0xff]  }
 0x10b   : > { %8312 = vmatmul.mubr.bf16.vlgmr.msra.gmra.mrb[0].mxu1 %v6994_v0  ;;  %v2210_v0 = vshrl.u32 %v7005_v58, 16 }
 0x10c   : > { %8598 = vmatpush3.bf16.msra.mxu0 %v9083_v30  ;;  %8320 = vmatpush3.bf16.msra.mxu1 %v9084_v41  ;;  %v7526_v30 = vrot.slane %v7515_v23, 10  ;;  %v6975_v41 = vrot.slane %v6965_v32, 9  ;;  %v2239_v20 = vrot.slane %v2237_v11, 5  ;;  %v9098_v23 = vld [vmem:[%s10552_s1 + $0x238] sm:$0xff]   ;;  %v7012_v32 = vld [vmem:[%s9240_s15 + $0x24] sm:$0x3] }
 0x10d   : > { %8607 = vmatprep.subr.bf16.mxu0 %v9085_v47  ;;  %8321 = vmatprep.subr.bf16.mxu1 %v9086_v63  ;;  %v2273_v48 = vshrl.u32 %v7012_v32, 16  ;;  %v7016_v11 = vld [vmem:[%s9240_s15 + $0x34] sm:$0x3] }
 0x10e   : > { %8315 = vmatprep.mubr.bf16.mxu1 %v6995_v27  ;;  %v5144_v40 = vsel %vm9481_vm11, %v7526_v30, %v5143_v31  ;;  %v2018_v49 = vsel %vm9249_vm2, %v6975_v41, %v2017_v37  ;;  %v7010_v30 = vld [vmem:[%s9240_s15 + $0x1c] sm:$0x3]  ;;  %v7011_v31 = vld [vmem:[%s9240_s15 + $0x20] sm:$0xe]  ;;  %v2251_v37 = vrot.slane %v2249_v34, 6 }
 0x10f   : > { %8600 = vmatmul.mubr.bf16.vlgmr.msra.gmra.mrb[0].mxu0 %v7546_v3  ;;  %v7547_v43 = vcombine.low %v5140_v33, %v5144_v40  ;;  %v6996_v56 = vcombine.low %v2018_v49, %v2022_v53  ;;  %v2246_v33 = vshrl.u32 %v7009_v29, 16  ;;  %v2258_v40 = vshll.u32 %v7010_v30, 16  ;;  %v9115_v34 = vld [vmem:[%s9240_s15 + $0x40] ss:$8 sps:$4 sm:$0xff]  }
 0x110   : > { %8608 = vmatpush3.bf16.msra.mxu0 %v9085_v47  ;;  %8322 = vmatpush3.bf16.msra.mxu1 %v9086_v63  ;;  %v7519_v47 = vld [vmem:[%s9240_s15 + $0x50] sm:$0xc]  ;;  %v2264_v42 = vshrl.u32 %v7011_v31, 16  ;;  %v2267_v44 = vshll.u32 %v7011_v31, 16 }
 0x111   : > { %8609 = vmatprep.subr.bf16.mxu0 %v9087_v4  ;;  %8323 = vmatprep.subr.bf16.mxu1 %v9088_v6  ;;  %v7528_v52 = vrot.slane %v7519_v47, 10  ;;  %v7007_v63 = vld [vmem:[%s9240_s15 + $0x10] sm:$0xe]  ;;  %v2248_v41 = vrot.slane %v2246_v33, 5  ;;  %v2260_v47 = vrot.slane %v2258_v40, 6 }
 0x112   : > { %8603 = vmatprep.mubr.bf16.mxu0 %v7547_v43  ;;  %v2231_v10 = vshll.u32 %v7007_v63, 16  ;;  %v2266_v51 = vrot.slane %v2264_v42, 5  ;;  %v7018_v40 = vld [vmem:[%s9240_s15 + $0x3c] sm:$0x3]  ;;  %v7020_v42 = vld [vmem:[%s9240_s15 + $0x44] sm:$0x3] }
 0x113   : > { %v5152_v60 = vsel %vm9481_vm11, %v7528_v52, %v5151_v54  ;;  %8316 = vmatmul.mubr.bf16.gmra.mrb[4].mxu1 %v6996_v56  ;;  %v2252_v50 = vor.u32 %v2251_v37, %v2248_v41  ;;  %v2269_v52 = vrot.slane %v2267_v44, 6  ;;  %v2275_v54 = vrot.slane %v2273_v48, 5  ;;  %v9102_v56 = vld [vmem:[%s10552_s1 + $0x540] sm:$0xff]  }
 0x114   : > { %8610 = vmatpush3.bf16.msra.mxu0 %v9087_v4  ;;  %8324 = vmatpush3.bf16.msra.mxu1 %v9088_v6  ;;  %v7548_v3 = vcombine.low %v5148_v57, %v5152_v60  ;;  %v2219_v4 = vshrl.u32 %v7006_v59, 16  ;;  %v2222_v6 = vshll.u32 %v7006_v59, 16  ;;  %v2233_v19 = vrot.slane %v2231_v10, 6  ;;  %v9103_v59 = vld [vmem:[%s9240_s15 + $0x30] ss:$8 sps:$4 sm:$0xff]  }
 0x115   : > { %8611 = vmatprep.subr.bf16.mxu0 %v9089_v7  ;;  %8325 = vmatprep.subr.bf16.mxu1 %v9090_v8  ;;  %v2253_v57 = vrot.slane %v2252_v50, 4  ;;  %v2270_v58 = vor.u32 %v2269_v52, %v2266_v51  ;;  %v7015_v10 = vld [vmem:[%s9240_s15 + $0x30] sm:$0xe]  ;;  %v7019_v37 = vld [vmem:[%s9240_s15 + $0x40] sm:$0xe]  ;;  %v2330_v48 = vshll.u32 %v7018_v40, 16 }
 0x116   : > { %v2221_v13 = vrot.slane %v2219_v4, 5  ;;  %v2224_v15 = vrot.slane %v2222_v6, 6  ;;  %v9104_v4 = vld [vmem:[%s10552_s1 + $0x248] sm:$0xff]   ;;  %v9107_v6 = vld [vmem:[%s10552_s1 + $0x550] sm:$0xff]   ;;  %v2336_v52 = vshrl.u32 %v7019_v37, 16 }
 0x117   : > { %8604 = vmatmul.mubr.bf16.gmra.mrb[4].mxu0 %v7548_v3 }
 0x118   : > { %8612 = vmatpush3.bf16.msra.mxu0 %v9089_v7  ;;  %8326 = vmatpush3.bf16.msra.mxu1 %v9090_v8  ;;  %v2228_v7 = vshrl.u32 %v7007_v63, 16  ;;  %v2212_v8 = vrot.slane %v2210_v0, 5  ;;  %v2225_v24 = vor.u32 %v2224_v15, %v2221_v13  ;;  %v2271_v63 = vrot.slane %v2270_v58, 4 }
 0x119   : > { %8613 = vmatprep.subr.bf16.mxu0 %v9091_v26  ;;  %8327 = vmatprep.subr.bf16.mxu1 %v9092_v25  ;;  %v2332_v58 = vrot.slane %v2330_v48, 6 }
 0x11a   : > { %v2230_v16 = vrot.slane %v2228_v7, 5  ;;  %v2216_v18 = vor.u32 %v2215_v9, %v2212_v8  ;;  %8623 = vmatprep.mubr.bf16.mxu0 %v9101_v22  ;;  %v7013_v7 = vld [vmem:[%s9240_s15 + $0x28] sm:$0xe]  ;;  %v7014_v8 = vld [vmem:[%s9240_s15 + $0x2c] sm:$0x3]  ;;  %v9106_v9 = vld [vmem:[%s10552_s1 + $0x250] sm:$0xff]  }
 0x11b   : > { %v2285_v13 = vshll.u32 %v7013_v7, 16  ;;  %v2291_v15 = vshrl.u32 %v7014_v8, 16  ;;  %v2309_v22 = vshrl.u32 %v7016_v11, 16 }
 0x11c   : > { %8614 = vmatpush3.bf16.msra.mxu0 %v9091_v26  ;;  %8328 = vmatpush3.bf16.msra.mxu1 %v9092_v25  ;;  %v2242_v26 = vrot.slane %v2240_v17, 6  ;;  %v2217_v27 = vrot.slane %v2216_v18, 4  ;;  %v2234_v28 = vor.u32 %v2233_v19, %v2230_v16  ;;  %v2294_v16 = vshll.u32 %v7014_v8, 16  ;;  %v7049_v8 = vld [vmem:[%s9240_s15 + $0x8] sm:$0xc] }
 0x11d   : > { %8615 = vmatprep.subr.bf16.mxu0 %v9093_v21  ;;  %8329 = vmatprep.subr.bf16.mxu1 %v9094_v39  ;;  %v2300_v17 = vshrl.u32 %v7015_v10, 16  ;;  %v2303_v18 = vshll.u32 %v7015_v10, 16 }
 0x11e   : > { %v2243_v25 = vor.u32 %v2242_v26, %v2239_v20  ;;  %v2226_v36 = vsel %vm9367_vm8, %v2217_v27, %v2225_v24  ;;  %v2287_v20 = vrot.slane %v2285_v13, 6  ;;  %v9109_v24 = vld [vmem:[%s10552_s1 + $0x558] sm:$0xff]   ;;  %v2293_v26 = vrot.slane %v2291_v15, 5 }
 0x11f   : > { %v2296_v27 = vrot.slane %v2294_v16, 6  ;;  %v2305_v29 = vrot.slane %v2303_v18, 6  ;;  %v7065_v13 = vrot.slane %v7049_v8, 10 }
 0x120   : > { %8616 = vmatpush3.bf16.msra.mxu0 %v9093_v21  ;;  %8330 = vmatpush3.bf16.msra.mxu1 %v9094_v39  ;;  %v2235_v21 = vrot.slane %v2234_v28, 4  ;;  %v2255_v39 = vshrl.u32 %v7010_v30, 16  ;;  %v2302_v28 = vrot.slane %v2300_v17, 5 }
 0x121   : > { %8617 = vmatprep.subr.bf16.mxu0 %v9095_v55  ;;  %8331 = vmatprep.subr.bf16.mxu1 %v9096_v2 }
 0x122   : > { %v2244_v43 = vsel %vm9367_vm8, %v2235_v21, %v2243_v25  ;;  %v2257_v46 = vrot.slane %v2255_v39, 5  ;;  %v2311_v25 = vrot.slane %v2309_v22, 5  ;;  %v2306_v33 = vor.u32 %v2305_v29, %v2302_v28  ;;  %v7017_v39 = vld [vmem:[%s9240_s15 + $0x38] sm:$0xe]  ;;  %v7594_v28 = vld [vmem:[%s9240_s15 + $0x24] sm:$0x1] }
 0x123   : > { %v7037_v49 = vcombine.low %v2226_v36, %v2244_v43  ;;  %v2318_v44 = vshrl.u32 %v7017_v39, 16  ;;  %v9111_v43 = vld [vmem:[%s10552_s1 + $0x560] sm:$0xff]   ;;  %v7595_v29 = vld [vmem:[%s9240_s15 + $0x28] sm:$0xf] }
 0x124   : > { %8618 = vmatpush3.bf16.msra.mxu0 %v9095_v55  ;;  %8332 = vmatpush3.bf16.msra.mxu1 %v9096_v2  ;;  %v2261_v53 = vor.u32 %v2260_v47, %v2257_v46  ;;  %v2276_v55 = vshll.u32 %v7012_v32, 16  ;;  %v2297_v32 = vor.u32 %v2296_v27, %v2293_v26  ;;  %v2307_v41 = vrot.slane %v2306_v33, 4 }
 0x125   : > { %8619 = vmatprep.subr.bf16.mxu0 %v9097_v12  ;;  %8333 = vmatprep.subr.bf16.mxu1 %v9098_v23  ;;  %v2321_v46 = vshll.u32 %v7017_v39, 16  ;;  %v2327_v47 = vshrl.u32 %v7018_v40, 16  ;;  %v2320_v51 = vrot.slane %v2318_v44, 5  ;;  %v5544_v39 = vshll.u32 %v7595_v29, 16  ;;  %v7053_v40 = vld [vmem:[%s9240_s15 + $0x18] sm:$0xc] }
 0x126   : > { %8335 = vmatprep.mubr.bf16.mxu1 %v7037_v49  ;;  %v2278_v60 = vrot.slane %v2276_v55, 6  ;;  %v2262_v0 = vsel %vm9367_vm8, %v2253_v57, %v2261_v53  ;;  %v9110_v49 = vld [vmem:[%s10552_s1 + $0x260] sm:$0xff]   ;;  %v2339_v53 = vshll.u32 %v7019_v37, 16 }
 0x127   : > { %v2329_v57 = vrot.slane %v2327_v47, 5  ;;  %v5546_v48 = vrot.slane %v5544_v39, 5 }
 0x128   : > { %8620 = vmatpush3.bf16.msra.mxu0 %v9097_v12  ;;  %8334 = vmatpush3.bf16.msra.mxu1 %v9098_v23  ;;  %v2279_v1 = vor.u32 %v2278_v60, %v2275_v54  ;;  %v2282_v12 = vshrl.u32 %v7013_v7, 16  ;;  %v2312_v23 = vshll.u32 %v7016_v11, 16  ;;  %v9113_v54 = vld [vmem:[%s10552_s1 + $0x568] sm:$0xff]   ;;  %v2338_v60 = vrot.slane %v2336_v52, 5  ;;  %v7051_v11 = vld [vmem:[%s9240_s15 + $0x10] sm:$0xc] }
 0x129   : > { %8621 = vmatprep.subr.bf16.mxu0 %v9099_v35  ;;  %8343 = vmatprep.subr.bf16.mxu1 %v9100_v45  ;;  %v7066_v18 = vrot.slane %v7051_v11, 10 }
 0x12a   : > { %v2280_v2 = vsel %vm9367_vm8, %v2271_v63, %v2279_v1  ;;  %v2284_v19 = vrot.slane %v2282_v12, 5  ;;  %v2314_v31 = vrot.slane %v2312_v23, 6  ;;  %v2341_v63 = vrot.slane %v2339_v53, 6  ;;  %v9112_v1 = vld [vmem:[%s10552_s1 + $0x268] sm:$0xff]   ;;  %v7052_v12 = vld [vmem:[%s9240_s15 + $0x14] sm:$0x3] }
 0x12b   : > { %v7038_v3 = vcombine.low %v2262_v0, %v2280_v2  ;;  %v2348_v0 = vshll.u32 %v7020_v42, 16  ;;  %v2561_v23 = vrot.slane %v7052_v12, 6  ;;  %v9121_v53 = vld [vmem:[%s10552_s1 + $0x580] sm:$0xff]  }
 0x12c   : > { %8622 = vmatpush3.bf16.msra.mxu0 %v9099_v35  ;;  %v2288_v30 = vor.u32 %v2287_v20, %v2284_v19  ;;  %v9108_v35 = vld [vmem:[%s10552_s1 + $0x258] sm:$0xff]   ;;  %v2315_v21 = vor.u32 %v2314_v31, %v2311_v25  ;;  %v9114_v19 = vld [vmem:[%s10552_s1 + $0x270] sm:$0xff]  }
 0x12d   : > { %8631 = vmatprep.subr.bf16.mxu0 %v9102_v56  ;;  %8336 = vmatmul.mubr.bf16.vlgmr.msra.gmra.mrb[0].mxu1 %v7038_v3  ;;  %v2333_v3 = vor.u32 %v2332_v58, %v2329_v57  ;;  %v2350_v7 = vrot.slane %v2348_v0, 6  ;;  %v9116_v20 = vld [vmem:[%s10552_s1 + $0x570] sm:$0xff]   ;;  %v2562_v31 = vsel %vm9481_vm11, %v7066_v18, %v2561_v23 }
 0x12e   : > { %8344 = vmatpush3.bf16.msra.mxu1 %v9100_v45  ;;  %v2289_v36 = vrot.slane %v2288_v30, 4  ;;  %v2316_v50 = vsel %vm9367_vm8, %v2307_v41, %v2315_v21  ;;  %v7596_v30 = vld [vmem:[%s9240_s15 + $0x2c] sm:$0x1]  ;;  %v5541_v21 = vshrl.u32 %v7595_v29, 16  ;;  %v9118_v41 = vld [vmem:[%s10552_s1 + $0x278] sm:$0xff]  }
 0x12f   : > { %8624 = vmatmul.mubr.bf16.vlgmr.msra.gmra.mrb[0].mxu0 %v9103_v59  ;;  %8345 = vmatprep.subr.bf16.mxu1 %v9104_v4  ;;  %v9117_v59 = vld [vmem:[%s9240_s15 + $0x50] ss:$8 sps:$4 sm:$0xff]   ;;  %v5550_v44 = vshll.u32 %v7596_v30, 16 }
 0x130   : > { %8632 = vmatpush3.bf16.msra.mxu0 %v9102_v56  ;;  %8627 = vmatprep.mubr.bf16.mxu0 %v9115_v34  ;;  %v2298_v45 = vsel %vm9367_vm8, %v2289_v36, %v2297_v32  ;;  %v2323_v56 = vrot.slane %v2321_v46, 6  ;;  %v9119_v34 = vld [vmem:[%s10552_s1 + $0x578] sm:$0xff]   ;;  %v5536_v36 = vshll.u32 %v7594_v28, 16  ;;  %v5543_v47 = vrot.slane %v5541_v21, 4  ;;  %v7060_v21 = vld [vmem:[%s9240_s15 + $0x34] sm:$0x3] }
 0x131   : > { %8633 = vmatprep.subr.bf16.mxu0 %v9105_v62  ;;  %v7039_v55 = vcombine.low %v2298_v45, %v2316_v50  ;;  %v7067_v45 = vrot.slane %v7053_v40, 10  ;;  %v5552_v52 = vrot.slane %v5550_v44, 5 }
 0x132   : > { %8346 = vmatpush3.bf16.msra.mxu1 %v9104_v4  ;;  %v2324_v2 = vor.u32 %v2323_v56, %v2320_v51  ;;  %v2342_v4 = vor.u32 %v2341_v63, %v2338_v60  ;;  %v5538_v46 = vrot.slane %v5536_v36, 5  ;;  %v7597_v56 = vld [vmem:[%s9240_s15 + $0x30] sm:$0xf]  ;;  %v5547_v57 = vor.u32 %v5546_v48, %v5543_v47  ;;  %v7598_v60 = vld [vmem:[%s9240_s15 + $0x34] sm:$0x1] }
 0x133   : > { %8347 = vmatprep.subr.bf16.mxu1 %v9106_v9  ;;  %8339 = vmatprep.mubr.bf16.mxu1 %v7039_v55  ;;  %v7599_v63 = vld [vmem:[%s9240_s15 + $0x38] sm:$0xf]  ;;  %v9125_v36 = vld [vmem:[%s10552_s1 + $0x590] sm:$0xff]   ;;  %v7604_v48 = vld [vmem:[%s9240_s15 + $0x4c] sm:$0x1] }
 0x134   : > { %8634 = vmatpush3.bf16.msra.mxu0 %v9105_v62  ;;  %v2345_v62 = vshrl.u32 %v7020_v42, 16  ;;  %v2325_v10 = vrot.slane %v2324_v2, 4  ;;  %v2343_v15 = vrot.slane %v2342_v4, 4  ;;  %v5558_v2 = vshll.u32 %v7597_v56, 16 }
 0x135   : > { %8635 = vmatprep.subr.bf16.mxu0 %v9107_v6  ;;  %v5569_v4 = vshrl.u32 %v7599_v63, 16 }
 0x136   : > { %8348 = vmatpush3.bf16.msra.mxu1 %v9106_v9  ;;  %v7050_v9 = vld [vmem:[%s9240_s15 + $0xc] sm:$0x3]  ;;  %v2334_v22 = vsel %vm9367_vm8, %v2325_v10, %v2333_v3  ;;  %v5564_v3 = vshll.u32 %v7598_v60, 16  ;;  %v5572_v10 = vshll.u32 %v7599_v63, 16  ;;  %v5560_v12 = vrot.slane %v5558_v2, 5 }
 0x137   : > { %8349 = vmatprep.subr.bf16.mxu1 %v9108_v35  ;;  %8628 = vmatmul.mubr.bf16.gmra.mrb[4].mxu0 %v9117_v59  ;;  %v2557_v17 = vrot.slane %v7050_v9, 6 }
 0x138   : > { %8636 = vmatpush3.bf16.msra.mxu0 %v9107_v6  ;;  %v2347_v6 = vrot.slane %v2345_v62, 5  ;;  %v5555_v62 = vshrl.u32 %v7597_v56, 16  ;;  %v9127_v56 = vld [vmem:[%s10552_s1 + $0x598] sm:$0xff]  }
 0x139   : > { %8637 = vmatprep.subr.bf16.mxu0 %v9109_v24  ;;  %v2558_v27 = vsel %vm9481_vm11, %v7065_v13, %v2557_v17  ;;  %v5566_v13 = vrot.slane %v5564_v3, 5  ;;  %v5574_v17 = vrot.slane %v5572_v10, 5  ;;  %v7062_v3 = vld [vmem:[%s9240_s15 + $0x3c] sm:$0x3] }
 0x13a   : > { %8350 = vmatpush3.bf16.msra.mxu1 %v9108_v35  ;;  %v2351_v16 = vor.u32 %v2350_v7, %v2347_v6  ;;  %v7089_v35 = vcombine.low %v2558_v27, %v2562_v31  ;;  %v9120_v6 = vld [vmem:[%s10552_s1 + $0x280] sm:$0xff]   ;;  %v5548_v7 = vrot.slane %v5547_v57, 4  ;;  %v5557_v9 = vrot.slane %v5555_v62, 4  ;;  %v9122_v27 = vld [vmem:[%s10552_s1 + $0x288] sm:$0xff]  }
 0x13b   : > { %8351 = vmatprep.subr.bf16.mxu1 %v9110_v49  ;;  %v9128_v57 = vld [vmem:[%s10552_s1 + $0x2a0] sm:$0xff]   ;;  %v2581_v10 = vrot.slane %v7062_v3, 6  ;;  %v7644_v3 = vld [vmem:[%s9240_s15 + $0x3c] sm:$0x1] }
 0x13c   : > { %8638 = vmatpush3.bf16.msra.mxu0 %v9109_v24  ;;  %v7593_v24 = vld [vmem:[%s9240_s15 + $0x20] sm:$0xf]  ;;  %v2352_v26 = vsel %vm9367_vm8, %v2343_v15, %v2351_v16  ;;  %v5553_v15 = vsel %vm9348_vm7, %v5548_v7, %v5552_v52  ;;  %v5571_v16 = vrot.slane %v5569_v4, 4 }
 0x13d   : > { %8639 = vmatprep.subr.bf16.mxu0 %v9111_v43  ;;  %v7040_v25 = vcombine.low %v2334_v22, %v2352_v26  ;;  %v5527_v32 = vshrl.u32 %v7593_v24, 16  ;;  %v5530_v33 = vshll.u32 %v7593_v24, 16  ;;  %v5561_v22 = vor.u32 %v5560_v12, %v5557_v9  ;;  %v7063_v4 = vld [vmem:[%s9240_s15 + $0x40] sm:$0xc]  ;;  %v7605_v12 = vld [vmem:[%s9240_s15 + $0x50] sm:$0xf] }
 0x13e   : > { %8352 = vmatpush3.bf16.msra.mxu1 %v9110_v49  ;;  %v7055_v49 = vld [vmem:[%s9240_s15 + $0x20] sm:$0xc]  ;;  %v5575_v23 = vor.u32 %v5574_v17, %v5571_v16  ;;  %v7606_v16 = vld [vmem:[%s9240_s15 + $0x54] sm:$0x1]  ;;  %v7607_v17 = vld [vmem:[%s9240_s15 + $0x58] sm:$0xf] }
 0x13f   : > { %8353 = vmatprep.subr.bf16.mxu1 %v9112_v1  ;;  %8340 = vmatmul.mubr.bf16.gmra.mrb[4].mxu1 %v7040_v25  ;;  %v5529_v37 = vrot.slane %v5527_v32, 4  ;;  %v5532_v42 = vrot.slane %v5530_v33, 5  ;;  %v7068_v55 = vrot.slane %v7055_v49, 10  ;;  %v5562_v26 = vrot.slane %v5561_v22, 4  ;;  %v9123_v25 = vld [vmem:[%s10552_s1 + $0x588] sm:$0xff]   ;;  %v9124_v32 = vld [vmem:[%s10552_s1 + $0x290] sm:$0xff]  }
 0x140   : > { %8640 = vmatpush3.bf16.msra.mxu0 %v9111_v43  ;;  %v7054_v43 = vld [vmem:[%s9240_s15 + $0x1c] sm:$0x3]  ;;  %8359 = vmatprep.mubr.bf16.mxu1 %v7089_v35  ;;  %v5576_v28 = vrot.slane %v5575_v23, 4  ;;  %v7057_v33 = vld [vmem:[%s9240_s15 + $0x28] sm:$0xc]  ;;  %v9129_v7 = vld [vmem:[%s10552_s1 + $0x5a0] sm:$0xff]  }
 0x141   : > { %8641 = vmatprep.subr.bf16.mxu0 %v9113_v54  ;;  %v2565_v50 = vrot.slane %v7054_v43, 6  ;;  %v5533_v51 = vor.u32 %v5532_v42, %v5529_v37  ;;  %v5567_v29 = vsel %vm9348_vm7, %v5562_v26, %v5566_v13  ;;  %v7059_v35 = vld [vmem:[%s9240_s15 + $0x30] sm:$0xc]  ;;  %v7069_v39 = vrot.slane %v7057_v33, 10  ;;  %v9126_v37 = vld [vmem:[%s10552_s1 + $0x298] sm:$0xff]   ;;  %v9131_v33 = vld [vmem:[%s10552_s1 + $0x5a8] sm:$0xff]  }
 0x142   : > { %8354 = vmatpush3.bf16.msra.mxu1 %v9112_v1  ;;  %v7600_v1 = vld [vmem:[%s9240_s15 + $0x3c] sm:$0x1]  ;;  %v2577_v42 = vrot.slane %v7060_v21, 6  ;;  %v7601_v43 = vld [vmem:[%s9240_s15 + $0x40] sm:$0xf]  ;;  %v5611_v23 = vshrl.u32 %v7605_v12, 16 }
 0x143   : > { %8355 = vmatprep.subr.bf16.mxu1 %v9114_v19  ;;  %v2566_v58 = vsel %vm9481_vm11, %v7067_v45, %v2565_v50  ;;  %v5534_v0 = vrot.slane %v5533_v51, 4  ;;  %v5578_v18 = vshll.u32 %v7600_v1, 16  ;;  %v7602_v45 = vld [vmem:[%s9240_s15 + $0x44] sm:$0x1]  ;;  %v5583_v49 = vshrl.u32 %v7601_v43, 16  ;;  %v9132_v21 = vld [vmem:[%s10552_s1 + $0x2b0] sm:$0xff]  }
 0x144   : > { %8642 = vmatpush3.bf16.msra.mxu0 %v9113_v54  ;;  %v7056_v54 = vld [vmem:[%s9240_s15 + $0x24] sm:$0x3]  ;;  %v5586_v50 = vshll.u32 %v7601_v43, 16  ;;  %v5592_v51 = vshll.u32 %v7602_v45, 16  ;;  %v7061_v1 = vld [vmem:[%s9240_s15 + $0x38] sm:$0xc] }
 0x145   : > { %8643 = vmatprep.subr.bf16.mxu0 %v9116_v20  ;;  %v2569_v59 = vrot.slane %v7056_v54, 6  ;;  %v5539_v11 = vsel %vm9348_vm7, %v5534_v0, %v5538_v46  ;;  %v5580_v24 = vrot.slane %v5578_v18, 5  ;;  %v7603_v46 = vld [vmem:[%s9240_s15 + $0x48] sm:$0xf]  ;;  %v7071_v9 = vrot.slane %v7061_v1, 10 }
 0x146   : > { %8356 = vmatpush3.bf16.msra.mxu1 %v9114_v19  ;;  %v7625_v19 = vcombine.low %v5539_v11, %v5553_v15  ;;  %v5600_v54 = vshll.u32 %v7603_v46, 16  ;;  %v5594_v60 = vrot.slane %v5592_v51, 5  ;;  %v7072_v11 = vrot.slane %v7063_v4, 10  ;;  %v9130_v18 = vld [vmem:[%s10552_s1 + $0x2a8] sm:$0xff]   ;;  %v7608_v22 = vld [vmem:[%s9240_s15 + $0x5c] sm:$0x1] }
 0x147   : > { %v2570_v8 = vsel %vm9481_vm11, %v7068_v55, %v2569_v59  ;;  %8357 = vmatprep.subr.bf16.mxu1 %v9118_v41  ;;  %v5581_v30 = vsel %vm9348_vm7, %v5576_v28, %v5580_v24  ;;  %v5606_v55 = vshll.u32 %v7604_v48, 16  ;;  %v5588_v59 = vrot.slane %v5586_v50, 5  ;;  %v7638_v48 = vld [vmem:[%s9240_s15 + $0x24] sm:$0x1]  ;;  %v7639_v50 = vld [vmem:[%s9240_s15 + $0x28] sm:$0xe] }
 0x148   : > { %8644 = vmatpush3.bf16.msra.mxu0 %v9116_v20  ;;  %v7090_v20 = vcombine.low %v2566_v58, %v2570_v8  ;;  %8647 = vmatprep.mubr.bf16.mxu0 %v7625_v19  ;;  %v7626_v31 = vcombine.low %v5567_v29, %v5581_v30  ;;  %v5585_v58 = vrot.slane %v5583_v49, 4  ;;  %v5602_v62 = vrot.slane %v5600_v54, 5  ;;  %v7640_v51 = vld [vmem:[%s9240_s15 + $0x2c] sm:$0x1] }
 0x149   : > { %8645 = vmatprep.subr.bf16.mxu0 %v9119_v34  ;;  %v5608_v0 = vrot.slane %v5606_v55, 5  ;;  %v5614_v24 = vshll.u32 %v7605_v12, 16  ;;  %v5620_v28 = vshll.u32 %v7606_v16, 16  ;;  %v5625_v29 = vshrl.u32 %v7607_v17, 16  ;;  %v9138_v12 = vld [vmem:[%s10552_s1 + $0x5c0] sm:$0xff]  }
 0x14a   : > { %8358 = vmatpush3.bf16.msra.mxu1 %v9118_v41  ;;  %v7070_v41 = vrot.slane %v7059_v35, 10  ;;  %v5589_v2 = vor.u32 %v5588_v59, %v5585_v58  ;;  %v7654_v54 = vrot.slane %v7639_v50, 9  ;;  %v5846_v55 = vrot.slane %v7640_v51, 5  ;;  %v9135_v58 = vld [vmem:[%s10552_s1 + $0x5b8] sm:$0xff]   ;;  %v9137_v59 = vld [vmem:[%s10552_s1 + $0x2c0] sm:$0xff]  }
 0x14b   : > { %8367 = vmatprep.subr.bf16.mxu1 %v9120_v6  ;;  %v5627_v35 = vrot.slane %v5625_v29, 4  ;;  %v7137_v51 = vld [vmem:[%s9240_s15 + $0x10] sm:$0xf] }
 0x14c   : > { %8646 = vmatpush3.bf16.msra.mxu0 %v9119_v34  ;;  %v7058_v34 = vld [vmem:[%s9240_s15 + $0x2c] sm:$0x3]  ;;  %v2578_v47 = vsel %vm9481_vm11, %v7070_v41, %v2577_v42  ;;  %v5590_v13 = vrot.slane %v5589_v2, 4  ;;  %v9136_v41 = vld [vmem:[%s9240_s15 + $0x10] ss:$8 sps:$4 sm:$0xff]   ;;  %v2961_v14 = vshrl.u32 %v7137_v51, 16 }
 0x14d   : > { %8655 = vmatprep.subr.bf16.mxu0 %v9121_v53  ;;  %8360 = vmatmul.mubr.bf16.vlgmr.msra.gmra.mrb[0].mxu1 %v7090_v20  ;;  %v2573_v40 = vrot.slane %v7058_v34, 6  ;;  %v2582_v20 = vsel %vm9481_vm11, %v7071_v9, %v2581_v10  ;;  %v7643_v2 = vld [vmem:[%s9240_s15 + $0x38] sm:$0xe]  ;;  %v5854_v10 = vrot.slane %v7644_v3, 5 }
 0x14e   : > { %8368 = vmatpush3.bf16.msra.mxu1 %v9120_v6  ;;  %v7064_v6 = vld [vmem:[%s9240_s15 + $0x44] sm:$0x3]  ;;  %v5595_v26 = vsel %vm9348_vm7, %v5590_v13, %v5594_v60  ;;  %v7656_v9 = vrot.slane %v7643_v2, 9  ;;  %v9140_v13 = vld [vmem:[%s10552_s1 + $0x2c8] sm:$0xff]  }
 0x14f   : > { %8369 = vmatprep.subr.bf16.mxu1 %v9122_v27  ;;  %8648 = vmatmul.mubr.bf16.vlgmr.msra.gmra.mrb[0].mxu0 %v7626_v31  ;;  %v2574_v44 = vsel %vm9481_vm11, %v7069_v39, %v2573_v40  ;;  %v2585_v15 = vrot.slane %v7064_v6, 6  ;;  %v5613_v31 = vrot.slane %v5611_v23, 4  ;;  %v5634_v40 = vshll.u32 %v7608_v22, 16  ;;  %v7645_v22 = vld [vmem:[%s9240_s15 + $0x40] sm:$0xe] }
 0x150   : > { %8656 = vmatpush3.bf16.msra.mxu0 %v9121_v53  ;;  %v7091_v52 = vcombine.low %v2574_v44, %v2578_v47  ;;  %v5597_v53 = vshrl.u32 %v7603_v46, 16  ;;  %v9133_v44 = vld [vmem:[%s10552_s1 + $0x5b0] sm:$0xff]   ;;  %v9134_v46 = vld [vmem:[%s10552_s1 + $0x2b8] sm:$0xff]   ;;  %v7637_v47 = vld [vmem:[%s9240_s15 + $0x20] sm:$0xe]  ;;  %v5855_v16 = vsel %vm9249_vm2, %v7656_v9, %v5854_v10  ;;  %v7657_v29 = vrot.slane %v7645_v22, 9 }
 0x151   : > { %8657 = vmatprep.subr.bf16.mxu0 %v9123_v25  ;;  %v5636_v45 = vrot.slane %v5634_v40, 5  ;;  %v7646_v23 = vld [vmem:[%s9240_s15 + $0x44] sm:$0x1]  ;;  %v7651_v40 = vld [vmem:[%s9240_s15 + $0x58] sm:$0xe] }
 0x152   : > { %8370 = vmatpush3.bf16.msra.mxu1 %v9122_v27  ;;  %v5599_v63 = vrot.slane %v5597_v53, 4  ;;  %8363 = vmatprep.mubr.bf16.mxu1 %v7091_v52  ;;  %v2586_v27 = vsel %vm9481_vm11, %v7072_v11, %v2585_v15  ;;  %v7653_v52 = vrot.slane %v7637_v47, 9  ;;  %v5842_v53 = vrot.slane %v7638_v48, 5  ;;  %v9147_v48 = vld [vmem:[%s10552_s1 + $0x5e0] sm:$0xff]  }
 0x153   : > { %8371 = vmatprep.subr.bf16.mxu1 %v9124_v32 }
 0x154   : > { %8658 = vmatpush3.bf16.msra.mxu0 %v9123_v25  ;;  %v5603_v8 = vor.u32 %v5602_v62, %v5599_v63  ;;  %v7092_v25 = vcombine.low %v2582_v20, %v2586_v27  ;;  %v5843_v60 = vsel %vm9249_vm2, %v7653_v52, %v5842_v53  ;;  %v5847_v63 = vsel %vm9249_vm2, %v7654_v54, %v5846_v55  ;;  %v7641_v62 = vld [vmem:[%s9240_s15 + $0x30] sm:$0xe]  ;;  %v7647_v27 = vld [vmem:[%s9240_s15 + $0x48] sm:$0xe]  ;;  %v7138_v52 = vld [vmem:[%s9240_s15 + $0x14] sm:$0x1] }
 0x155   : > { %8659 = vmatprep.subr.bf16.mxu0 %v9125_v36  ;;  %v7655_v4 = vrot.slane %v7641_v62, 9  ;;  %v7677_v11 = vcombine.low %v5843_v60, %v5847_v63  ;;  %v9150_v20 = vld [vmem:[%s9240_s15 + $0x30] ss:$8 sps:$4 sm:$0xff]   ;;  %v7140_v54 = vld [vmem:[%s9240_s15 + $0x1c] sm:$0x1]  ;;  %v2964_v55 = vshll.u32 %v7137_v51, 16 }
 0x156   : > { %8372 = vmatpush3.bf16.msra.mxu1 %v9124_v32  ;;  %v5604_v19 = vrot.slane %v5603_v8, 4  ;;  %v5616_v32 = vrot.slane %v5614_v24, 5  ;;  %v9139_v8 = vld [vmem:[%s9240_s15 + $0x20] ss:$8 sps:$4 sm:$0xff]   ;;  %v9143_v24 = vld [vmem:[%s10552_s1 + $0x5d0] sm:$0xff]   ;;  %v2963_v63 = vrot.slane %v2961_v14, 4 }
 0x157   : > { %8373 = vmatprep.subr.bf16.mxu1 %v9126_v37  ;;  %8364 = vmatmul.mubr.bf16.gmra.mrb[4].mxu1 %v7092_v25  ;;  %v7658_v25 = vrot.slane %v7647_v27, 9  ;;  %v7139_v53 = vld [vmem:[%s9240_s15 + $0x18] sm:$0xf]  ;;  %v7689_v60 = vld [vmem:[%s9240_s15 + $0x20] sm:$0xe]  ;;  %v2966_v62 = vrot.slane %v2964_v55, 5 }
 0x158   : > { %8660 = vmatpush3.bf16.msra.mxu0 %v9125_v36  ;;  %v5609_v30 = vsel %vm9348_vm7, %v5604_v19, %v5608_v0  ;;  %v5628_v36 = vshll.u32 %v7607_v17, 16  ;;  %v5617_v39 = vor.u32 %v5616_v32, %v5613_v31  ;;  %8383 = vmatprep.mubr.bf16.mxu1 %v9136_v41  ;;  %v7642_v0 = vld [vmem:[%s9240_s15 + $0x34] sm:$0x1]  ;;  %v7652_v41 = vld [vmem:[%s9240_s15 + $0x5c] sm:$0x1]  ;;  %v6059_v9 = vshrl.u32 %v7689_v60, 16 }
 0x159   : > { %8661 = vmatprep.subr.bf16.mxu0 %v9127_v56  ;;  %v7627_v34 = vcombine.low %v5595_v26, %v5609_v30  ;;  %v5850_v6 = vrot.slane %v7642_v0, 5  ;;  %v9142_v19 = vld [vmem:[%s10552_s1 + $0x2d0] sm:$0xff]   ;;  %v9144_v26 = vld [vmem:[%s10552_s1 + $0x2d8] sm:$0xff]   ;;  %v5858_v30 = vrot.slane %v7646_v23, 5  ;;  %v7690_v0 = vld [vmem:[%s9240_s15 + $0x24] sm:$0x3] }
 0x15a   : > { %8374 = vmatpush3.bf16.msra.mxu1 %v9126_v37  ;;  %v5622_v37 = vrot.slane %v5620_v28, 5  ;;  %v5630_v42 = vrot.slane %v5628_v36, 5  ;;  %v5618_v43 = vrot.slane %v5617_v39, 4  ;;  %v7648_v28 = vld [vmem:[%s9240_s15 + $0x4c] sm:$0x1]  ;;  %v6062_v10 = vshll.u32 %v7689_v60, 16 }
 0x15b   : > { %8375 = vmatprep.subr.bf16.mxu1 %v9128_v57  ;;  %8651 = vmatprep.mubr.bf16.mxu0 %v7627_v34  ;;  %v5851_v15 = vsel %vm9249_vm2, %v7655_v4, %v5850_v6  ;;  %v5862_v31 = vrot.slane %v7648_v28, 5  ;;  %v5859_v32 = vsel %vm9249_vm2, %v7657_v29, %v5858_v30  ;;  %v7650_v36 = vld [vmem:[%s9240_s15 + $0x54] sm:$0x1] }
 0x15c   : > { %8662 = vmatpush3.bf16.msra.mxu0 %v9127_v56  ;;  %v5631_v49 = vor.u32 %v5630_v42, %v5627_v35  ;;  %v5623_v56 = vsel %vm9348_vm7, %v5618_v43, %v5622_v37  ;;  %v7678_v17 = vcombine.low %v5851_v15, %v5855_v16  ;;  %v7649_v35 = vld [vmem:[%s9240_s15 + $0x50] sm:$0xe]  ;;  %v5866_v42 = vrot.slane %v7650_v36, 5  ;;  %v7692_v15 = vld [vmem:[%s9240_s15 + $0x2c] sm:$0x3]  ;;  %v9154_v36 = vld [vmem:[%s10552_s1 + $0x2f8] sm:$0xff]  }
 0x15d   : > { %8663 = vmatprep.subr.bf16.mxu0 %v9129_v7  ;;  %v5863_v34 = vsel %vm9249_vm2, %v7658_v25, %v5862_v31  ;;  %v7659_v37 = vrot.slane %v7649_v35, 9  ;;  %v5870_v43 = vrot.slane %v7652_v41, 5  ;;  %v6071_v16 = vshll.u32 %v7690_v0, 16  ;;  %v7143_v35 = vld [vmem:[%s9240_s15 + $0x28] sm:$0xf] }
 0x15e   : > { %8376 = vmatpush3.bf16.msra.mxu1 %v9128_v57  ;;  %v5632_v57 = vrot.slane %v5631_v49, 4  ;;  %v7679_v39 = vcombine.low %v5859_v32, %v5863_v34  ;;  %v9148_v49 = vld [vmem:[%s10552_s1 + $0x2e8] sm:$0xff]   ;;  %v6064_v22 = vrot.slane %v6062_v10, 6  ;;  %v6086_v32 = vshrl.u32 %v7692_v15, 16  ;;  %v7142_v34 = vld [vmem:[%s9240_s15 + $0x24] sm:$0x1] }
 0x15f   : > { %8377 = vmatprep.subr.bf16.mxu1 %v9130_v18  ;;  %v6073_v28 = vrot.slane %v6071_v16, 6  ;;  %v7144_v41 = vld [vmem:[%s9240_s15 + $0x2c] sm:$0x1]  ;;  %v2998_v51 = vshll.u32 %v7142_v34, 16  ;;  %v3003_v14 = vshrl.u32 %v7143_v35, 16  ;;  %v3006_v55 = vshll.u32 %v7143_v35, 16 }
 0x160   : > { %8664 = vmatpush3.bf16.msra.mxu0 %v9129_v7  ;;  %v5637_v1 = vsel %vm9348_vm7, %v5632_v57, %v5636_v45  ;;  %v9146_v45 = vld [vmem:[%s10552_s1 + $0x2e0] sm:$0xff]   ;;  %v2975_v57 = vshrl.u32 %v7139_v53, 16 }
 0x161   : > { %8665 = vmatprep.subr.bf16.mxu0 %v9131_v33  ;;  %v7628_v7 = vcombine.low %v5623_v56, %v5637_v1  ;;  %v2970_v56 = vshll.u32 %v7138_v52, 16  ;;  %v7691_v1 = vld [vmem:[%s9240_s15 + $0x28] sm:$0xe]  ;;  %v7694_v52 = vld [vmem:[%s9240_s15 + $0x34] sm:$0x3] }
 0x162   : > { %8378 = vmatpush3.bf16.msra.mxu1 %v9130_v18  ;;  %v9141_v18 = vld [vmem:[%s10552_s1 + $0x5c8] sm:$0xff]   ;;  %v2977_v3 = vrot.slane %v2975_v57, 4  ;;  %v3000_v57 = vrot.slane %v2998_v51, 5 }
 0x163   : > { %8379 = vmatprep.subr.bf16.mxu1 %v9132_v21  ;;  %8652 = vmatmul.mubr.bf16.gmra.mrb[4].mxu0 %v7628_v7  ;;  %v2972_v2 = vrot.slane %v2970_v56, 5  ;;  %v9149_v7 = vld [vmem:[%s10552_s1 + $0x5e8] sm:$0xff]  }
 0x164   : > { %8666 = vmatpush3.bf16.msra.mxu0 %v9131_v33  ;;  %8671 = vmatprep.mubr.bf16.mxu0 %v7677_v11  ;;  %v9151_v33 = vld [vmem:[%s9240_s15 + $0x40] ss:$8 sps:$4 sm:$0xff]   ;;  %v6068_v11 = vshrl.u32 %v7690_v0, 16  ;;  %v3008_v0 = vrot.slane %v3006_v55, 5 }
 0x165   : > { %8667 = vmatprep.subr.bf16.mxu0 %v9133_v44 }
 0x166   : > { %8380 = vmatpush3.bf16.msra.mxu1 %v9132_v21  ;;  %v9145_v21 = vld [vmem:[%s10552_s1 + $0x5d8] sm:$0xff]   ;;  %v6070_v23 = vrot.slane %v6068_v11, 5  ;;  %v6104_v11 = vshrl.u32 %v7694_v52, 16 }
 0x167   : > { %8381 = vmatprep.subr.bf16.mxu1 %v9134_v46 }
 0x168   : > { %8668 = vmatpush3.bf16.msra.mxu0 %v9133_v44  ;;  %v7660_v44 = vrot.slane %v7651_v40, 9 }
 0x169   : > { %8669 = vmatprep.subr.bf16.mxu0 %v9135_v58 }
 0x16a   : > { %8382 = vmatpush3.bf16.msra.mxu1 %v9134_v46  ;;  %v5867_v46 = vsel %vm9249_vm2, %v7659_v37, %v5866_v42  ;;  %v5871_v47 = vsel %vm9249_vm2, %v7660_v44, %v5870_v43  ;;  %v7693_v42 = vld [vmem:[%s9240_s15 + $0x30] sm:$0xe] }
 0x16b   : > { %8391 = vmatprep.subr.bf16.mxu1 %v9137_v59  ;;  %v7680_v50 = vcombine.low %v5867_v46, %v5871_v47  ;;  %v9155_v47 = vld [vmem:[%s10552_s1 + $0x5f8] sm:$0xff]   ;;  %v6095_v60 = vshrl.u32 %v7693_v42, 16 }
 0x16c   : > { %8670 = vmatpush3.bf16.msra.mxu0 %v9135_v58  ;;  %v2978_v58 = vshll.u32 %v7139_v53, 16 }
 0x16d   : > { %8384 = vmatmul.mubr.bf16.vlgmr.msra.gmra.mrb[0].mxu1 %v9139_v8  ;;  %8679 = vmatprep.subr.bf16.mxu0 %v9138_v12  ;;  %v2967_v8 = vor.u32 %v2966_v62, %v2963_v63  ;;  %v3005_v62 = vrot.slane %v3003_v14, 4 }
 0x16e   : > { %8392 = vmatpush3.bf16.msra.mxu1 %v9137_v59  ;;  %8387 = vmatprep.mubr.bf16.mxu1 %v9150_v20  ;;  %v2984_v59 = vshll.u32 %v7140_v54, 16  ;;  %v2980_v4 = vrot.slane %v2978_v58, 5  ;;  %v6061_v20 = vrot.slane %v6059_v9, 5  ;;  %v3012_v58 = vshll.u32 %v7144_v41, 16 }
 0x16f   : > { %8393 = vmatprep.subr.bf16.mxu1 %v9140_v13  ;;  %8672 = vmatmul.mubr.bf16.vlgmr.msra.gmra.mrb[0].mxu0 %v7678_v17  ;;  %v6077_v17 = vshrl.u32 %v7691_v1, 16  ;;  %v3009_v9 = vor.u32 %v3008_v0, %v3005_v62 }
 0x170   : > { %8680 = vmatpush3.bf16.msra.mxu0 %v9138_v12  ;;  %8675 = vmatprep.mubr.bf16.mxu0 %v7679_v39  ;;  %v2986_v6 = vrot.slane %v2984_v59, 5  ;;  %v9152_v12 = vld [vmem:[%s10552_s1 + $0x2f0] sm:$0xff]   ;;  %v6065_v31 = vor.u32 %v6064_v22, %v6061_v20  ;;  %v6074_v39 = vor.u32 %v6073_v28, %v6070_v23  ;;  %v7695_v59 = vld [vmem:[%s9240_s15 + $0x38] sm:$0xe]  ;;  %v6106_v22 = vrot.slane %v6104_v11, 5 }
 0x171   : > { %8681 = vmatprep.subr.bf16.mxu0 %v9141_v18  ;;  %v6079_v29 = vrot.slane %v6077_v17, 5  ;;  %v6116_v16 = vshll.u32 %v7695_v59, 16 }
 0x172   : > { %8394 = vmatpush3.bf16.msra.mxu1 %v9140_v13  ;;  %v2981_v13 = vor.u32 %v2980_v4, %v2977_v3  ;;  %v6066_v43 = vrot.slane %v6065_v31, 4  ;;  %v10406_v3 = vld [vmem:[%s10552_s1 + $0x600] sm:$0xff]  }
 0x173   : > { %8395 = vmatprep.subr.bf16.mxu1 %v9142_v19  ;;  %v6118_v28 = vrot.slane %v6116_v16, 6 }
 0x174   : > { %8682 = vmatpush3.bf16.msra.mxu0 %v9141_v18  ;;  %v6080_v18 = vshll.u32 %v7691_v1, 16  ;;  %v2982_v27 = vrot.slane %v2981_v13, 4  ;;  %v6075_v53 = vsel %vm9367_vm8, %v6066_v43, %v6074_v39  ;;  %v7696_v1 = vld [vmem:[%s9240_s15 + $0x3c] sm:$0x3]  ;;  %v7697_v43 = vld [vmem:[%s9240_s15 + $0x40] sm:$0xe] }
 0x175   : > { %8388 = vmatmul.mubr.bf16.gmra.mrb[4].mxu1 %v9151_v33  ;;  %8683 = vmatprep.subr.bf16.mxu0 %v9143_v24  ;;  %v6089_v33 = vshll.u32 %v7692_v15, 16  ;;  %v6113_v15 = vshrl.u32 %v7695_v59, 16  ;;  %v6122_v17 = vshrl.u32 %v7696_v1, 16  ;;  %v10434_v59 = vld [vmem:[%s10552_s1 + $0x610] sm:$0xff]  }
 0x176   : > { %8396 = vmatpush3.bf16.msra.mxu1 %v9142_v19  ;;  %v2968_v19 = vrot.slane %v2967_v8, 4  ;;  %v6082_v30 = vrot.slane %v6080_v18, 6  ;;  %v6097_v8 = vrot.slane %v6095_v60, 5  ;;  %v7145_v18 = vld [vmem:[%s9240_s15 + $0x30] sm:$0xf] }
 0x177   : > { %8397 = vmatprep.subr.bf16.mxu1 %v9144_v26  ;;  %8676 = vmatmul.mubr.bf16.gmra.mrb[4].mxu0 %v7680_v50  ;;  %v6091_v46 = vrot.slane %v6089_v33, 6  ;;  %v6125_v33 = vshll.u32 %v7696_v1, 16  ;;  %v3017_v39 = vshrl.u32 %v7145_v18, 16  ;;  %v7149_v1 = vld [vmem:[%s9240_s15 + $0x40] sm:$0xf] }
 0x178   : > { %8684 = vmatpush3.bf16.msra.mxu0 %v9143_v24  ;;  %v7141_v24 = vld [vmem:[%s9240_s15 + $0x20] sm:$0xf]  ;;  %v2973_v25 = vsel %vm9348_vm7, %v2968_v19, %v2972_v2  ;;  %v6083_v40 = vor.u32 %v6082_v30, %v6079_v29  ;;  %v6098_v2 = vshll.u32 %v7693_v42, 16  ;;  %v3010_v19 = vrot.slane %v3009_v9, 4  ;;  %v7147_v30 = vld [vmem:[%s9240_s15 + $0x38] sm:$0xf] }
 0x179   : > { %8685 = vmatprep.subr.bf16.mxu0 %v9145_v21  ;;  %v2989_v37 = vshrl.u32 %v7141_v24, 16  ;;  %v2992_v50 = vshll.u32 %v7141_v24, 16  ;;  %v7146_v24 = vld [vmem:[%s9240_s15 + $0x34] sm:$0x1]  ;;  %v6124_v29 = vrot.slane %v6122_v17, 5 }
 0x17a   : > { %8398 = vmatpush3.bf16.msra.mxu1 %v9144_v26  ;;  %v9153_v26 = vld [vmem:[%s10552_s1 + $0x5f0] sm:$0xff]   ;;  %v6100_v10 = vrot.slane %v6098_v2, 6  ;;  %v3026_v42 = vshll.u32 %v7146_v24, 16 }
 0x17b   : > { %8399 = vmatprep.subr.bf16.mxu1 %v9146_v45  ;;  %v2994_v56 = vrot.slane %v2992_v50, 5 }
 0x17c   : > { %8686 = vmatpush3.bf16.msra.mxu0 %v9145_v21  ;;  %v2987_v21 = vsel %vm9348_vm7, %v2982_v27, %v2986_v6  ;;  %v6101_v20 = vor.u32 %v6100_v10, %v6097_v8  ;;  %v6115_v27 = vrot.slane %v6113_v15, 5  ;;  %v3028_v51 = vrot.slane %v3026_v42, 5 }
 0x17d   : > { %8687 = vmatprep.subr.bf16.mxu0 %v9147_v48  ;;  %v7169_v44 = vcombine.low %v2973_v25, %v2987_v21  ;;  %v7148_v21 = vld [vmem:[%s9240_s15 + $0x3c] sm:$0x1] }
 0x17e   : > { %8400 = vmatpush3.bf16.msra.mxu1 %v9146_v45  ;;  %v6088_v45 = vrot.slane %v6086_v32, 5  ;;  %v6102_v31 = vrot.slane %v6101_v20, 4  ;;  %v6119_v35 = vor.u32 %v6118_v28, %v6115_v27 }
 0x17f   : > { %8401 = vmatprep.subr.bf16.mxu1 %v9148_v49  ;;  %8407 = vmatprep.mubr.bf16.mxu1 %v7169_v44  ;;  %v3031_v44 = vshrl.u32 %v7147_v30, 16 }
 0x180   : > { %8688 = vmatpush3.bf16.msra.mxu0 %v9147_v48  ;;  %v6084_v48 = vrot.slane %v6083_v40, 4  ;;  %v6092_v54 = vor.u32 %v6091_v46, %v6088_v45  ;;  %v3020_v40 = vshll.u32 %v7145_v18, 16  ;;  %v6120_v45 = vrot.slane %v6119_v35, 4 }
 0x181   : > { %8689 = vmatprep.subr.bf16.mxu0 %v9149_v7  ;;  %v3019_v46 = vrot.slane %v3017_v39, 4 }
 0x182   : > { %8402 = vmatpush3.bf16.msra.mxu1 %v9148_v49  ;;  %v2991_v49 = vrot.slane %v2989_v37, 4  ;;  %v6093_v63 = vsel %vm9367_vm8, %v6084_v48, %v6092_v54  ;;  %v6127_v37 = vrot.slane %v6125_v33, 6  ;;  %v3034_v48 = vshll.u32 %v7147_v30, 16  ;;  %v7699_v54 = vld [vmem:[%s9240_s15 + $0x48] sm:$0xe] }
 0x183   : > { %8403 = vmatprep.subr.bf16.mxu1 %v9152_v12  ;;  %v7721_v4 = vcombine.low %v6075_v53, %v6093_v63  ;;  %v3040_v53 = vshll.u32 %v7148_v21, 16  ;;  %v6149_v11 = vshrl.u32 %v7699_v54, 16  ;;  %v6152_v17 = vshll.u32 %v7699_v54, 16 }
 0x184   : > { %8690 = vmatpush3.bf16.msra.mxu0 %v9149_v7  ;;  %v2995_v6 = vor.u32 %v2994_v56, %v2991_v49  ;;  %v3014_v7 = vrot.slane %v3012_v58, 5  ;;  %v7698_v49 = vld [vmem:[%s9240_s15 + $0x44] sm:$0x3]  ;;  %v6128_v50 = vor.u32 %v6127_v37, %v6124_v29  ;;  %v3036_v55 = vrot.slane %v3034_v48, 5  ;;  %v7700_v56 = vld [vmem:[%s9240_s15 + $0x4c] sm:$0x3] }
 0x185   : > { %8691 = vmatprep.subr.bf16.mxu0 %v9153_v26  ;;  %8695 = vmatprep.mubr.bf16.mxu0 %v7721_v4  ;;  %v6134_v58 = vshll.u32 %v7697_v43, 16  ;;  %v3042_v63 = vrot.slane %v3040_v53, 5  ;;  %v6140_v62 = vshrl.u32 %v7698_v49, 16  ;;  %v6143_v0 = vshll.u32 %v7698_v49, 16 }
 0x186   : > { %8404 = vmatpush3.bf16.msra.mxu1 %v9152_v12  ;;  %v6107_v12 = vshll.u32 %v7694_v52, 16  ;;  %v2996_v13 = vrot.slane %v2995_v6, 4  ;;  %v3015_v25 = vsel %vm9348_vm7, %v3010_v19, %v3014_v7  ;;  %v3033_v52 = vrot.slane %v3031_v44, 4  ;;  %v10448_v19 = vld [vmem:[%s10552_s1 + $0x618] sm:$0xff]  }
 0x187   : > { %8405 = vmatprep.subr.bf16.mxu1 %v9154_v36  ;;  %v6129_v60 = vsel %vm9367_vm8, %v6120_v45, %v6128_v50  ;;  %v6136_v8 = vrot.slane %v6134_v58, 6  ;;  %v6142_v9 = vrot.slane %v6140_v62, 5  ;;  %v6145_v10 = vrot.slane %v6143_v0, 6  ;;  %v7733_v0 = vld [vmem:[%s9240_s15 + $0x20] sm:$0xc] }
 0x188   : > { %8692 = vmatpush3.bf16.msra.mxu0 %v9153_v26  ;;  %v6109_v23 = vrot.slane %v6107_v12, 6  ;;  %v3001_v26 = vsel %vm9348_vm7, %v2996_v13, %v3000_v57  ;;  %v6131_v57 = vshrl.u32 %v7697_v43, 16  ;;  %v3037_v6 = vor.u32 %v3036_v55, %v3033_v52  ;;  %v7150_v12 = vld [vmem:[%s9240_s15 + $0x44] sm:$0x1]  ;;  %v7151_v13 = vld [vmem:[%s9240_s15 + $0x48] sm:$0xf] }
 0x189   : > { %8693 = vmatprep.subr.bf16.mxu0 %v9155_v47  ;;  %v7170_v34 = vcombine.low %v3001_v26, %v3015_v25  ;;  %v6158_v18 = vshrl.u32 %v7700_v56, 16  ;;  %v6161_v24 = vshll.u32 %v7700_v56, 16  ;;  %v7152_v26 = vld [vmem:[%s9240_s15 + $0x4c] sm:$0x1]  ;;  %v6154_v28 = vrot.slane %v6152_v17, 6 }
 0x18a   : > { %8406 = vmatpush3.bf16.msra.mxu1 %v9154_v36  ;;  %v6110_v32 = vor.u32 %v6109_v23, %v6106_v22  ;;  %v10420_v36 = vld [vmem:[%s10552_s1 + $0x608] sm:$0xff]   ;;  %v6133_v7 = vrot.slane %v6131_v57, 5  ;;  %v3038_v16 = vrot.slane %v3037_v6, 4  ;;  %v6146_v22 = vor.u32 %v6145_v10, %v6142_v9  ;;  %v7701_v25 = vld [vmem:[%s9240_s15 + $0x50] sm:$0xe] }
 0x18b   : > { %8727 = vmatprep.subr.bf16.mxu1 %v10406_v3  ;;  %v6151_v23 = vrot.slane %v6149_v11, 5  ;;  %v6160_v29 = vrot.slane %v6158_v18, 5  ;;  %v3045_v30 = vshrl.u32 %v7149_v1, 16  ;;  %v6163_v33 = vrot.slane %v6161_v24, 6  ;;  %v10477_v57 = vld [vmem:[%s10552_s1 + $0x628] sm:$0xff]  }
 0x18c   : > { %8694 = vmatpush3.bf16.msra.mxu0 %v9155_v47  ;;  %v6111_v41 = vsel %vm9367_vm8, %v6102_v31, %v6110_v32  ;;  %v3022_v47 = vrot.slane %v3020_v40, 5  ;;  %v6137_v20 = vor.u32 %v6136_v8, %v6133_v7  ;;  %v3043_v27 = vsel %vm9348_vm7, %v3038_v16, %v3042_v63  ;;  %v7735_v8 = vld [vmem:[%s9240_s15 + $0x28] sm:$0xc]  ;;  %v7736_v9 = vld [vmem:[%s9240_s15 + $0x2c] sm:$0x3] }
 0x18d   : > { %8703 = vmatprep.subr.bf16.mxu0 %v10406_v3  ;;  %8408 = vmatmul.mubr.bf16.vlgmr.msra.gmra.mrb[0].mxu1 %v7170_v34  ;;  %v7722_v2 = vcombine.low %v6111_v41, %v6129_v60  ;;  %v3048_v34 = vshll.u32 %v7149_v1, 16  ;;  %v6155_v35 = vor.u32 %v6154_v28, %v6151_v23  ;;  %v3047_v21 = vrot.slane %v3045_v30, 4  ;;  %v10462_v41 = vld [vmem:[%s10552_s1 + $0x620] sm:$0xff]   ;;  %v7743_v23 = vld [vmem:[%s9240_s15 + $0x48] sm:$0xc] }
 0x18e   : > { %8735 = vmatpush3.bf16.msra.mxu1 %v10406_v3  ;;  %v3023_v14 = vor.u32 %v3022_v47, %v3019_v46  ;;  %v6138_v32 = vrot.slane %v6137_v20, 4  ;;  %v3054_v39 = vshll.u32 %v7150_v12, 16  ;;  %v3059_v40 = vshrl.u32 %v7151_v13, 16  ;;  %v7734_v1 = vld [vmem:[%s9240_s15 + $0x24] sm:$0x3] }
 0x18f   : > { %8728 = vmatprep.subr.bf16.mxu1 %v10420_v36  ;;  %8696 = vmatmul.mubr.bf16.vlgmr.msra.gmra.mrb[0].mxu0 %v7722_v2  ;;  %v6164_v42 = vor.u32 %v6163_v33, %v6160_v29  ;;  %v3050_v44 = vrot.slane %v3048_v34, 5  ;;  %v3062_v43 = vshll.u32 %v7151_v13, 16  ;;  %v6156_v45 = vrot.slane %v6155_v35, 4  ;;  %v10491_v13 = vld [vmem:[%s10552_s1 + $0x630] sm:$0xff]   ;;  %v7744_v29 = vld [vmem:[%s9240_s15 + $0x4c] sm:$0x3] }
 0x190   : > { %v3024_v4 = vrot.slane %v3023_v14, 4  ;;  %8704 = vmatpush3.bf16.msra.mxu0 %v10406_v3  ;;  %v7702_v3 = vld [vmem:[%s9240_s15 + $0x54] sm:$0x3]  ;;  %v6147_v37 = vsel %vm9367_vm8, %v6138_v32, %v6146_v22  ;;  %v3056_v46 = vrot.slane %v3054_v39, 5  ;;  %v3061_v47 = vrot.slane %v3059_v40, 4  ;;  %v9163_v40 = vld [vmem:[%s10552_s1 + $0x638] sm:$0xff]  }
 0x191   : > { %8705 = vmatprep.subr.bf16.mxu0 %v10420_v36  ;;  %v3068_v48 = vshll.u32 %v7152_v26, 16  ;;  %v3051_v49 = vor.u32 %v3050_v44, %v3047_v21  ;;  %v3064_v50 = vrot.slane %v3062_v43, 5  ;;  %v6167_v52 = vshrl.u32 %v7701_v25, 16  ;;  %v7704_v14 = vld [vmem:[%s9240_s15 + $0x5c] sm:$0x3] }
 0x192   : > { %8736 = vmatpush3.bf16.msra.mxu1 %v10420_v36  ;;  %v3029_v15 = vsel %vm9348_vm7, %v3024_v4, %v3028_v51  ;;  %v7703_v51 = vld [vmem:[%s9240_s15 + $0x58] sm:$0xe]  ;;  %v6165_v53 = vsel %vm9367_vm8, %v6156_v45, %v6164_v42  ;;  %v6176_v55 = vshrl.u32 %v7702_v3, 16  ;;  %v6179_v56 = vshll.u32 %v7702_v3, 16  ;;  %v7742_v22 = vld [vmem:[%s9240_s15 + $0x44] sm:$0x3] }
 0x193   : > { %8729 = vmatprep.subr.bf16.mxu1 %v10434_v59  ;;  %v7171_v31 = vcombine.low %v3029_v15, %v3043_v27  ;;  %v3070_v54 = vrot.slane %v3068_v48, 5  ;;  %v7723_v58 = vcombine.low %v6147_v37, %v6165_v53  ;;  %v3052_v60 = vrot.slane %v3051_v49, 4  ;;  %v7741_v15 = vld [vmem:[%s9240_s15 + $0x40] sm:$0xc]  ;;  %v7737_v33 = vld [vmem:[%s9240_s15 + $0x30] sm:$0xc] }
 0x194   : > { %8706 = vmatpush3.bf16.msra.mxu0 %v10420_v36  ;;  %v6170_v36 = vshll.u32 %v7701_v25, 16  ;;  %v3065_v63 = vor.u32 %v3064_v50, %v3061_v47  ;;  %v6169_v62 = vrot.slane %v6167_v52, 5  ;;  %v6178_v4 = vrot.slane %v6176_v55, 5  ;;  %v7738_v21 = vld [vmem:[%s9240_s15 + $0x34] sm:$0x3] }
 0x195   : > { %8411 = vmatprep.mubr.bf16.mxu1 %v7171_v31  ;;  %8707 = vmatprep.subr.bf16.mxu0 %v10434_v59  ;;  %v6181_v6 = vrot.slane %v6179_v56, 6  ;;  %v6185_v7 = vshrl.u32 %v7703_v51, 16  ;;  %v3057_v10 = vsel %vm9348_vm7, %v3052_v60, %v3056_v46  ;;  %v6188_v12 = vshll.u32 %v7703_v51, 16  ;;  %v7739_v44 = vld [vmem:[%s9240_s15 + $0x38] sm:$0xc] }
 0x196   : > { %8737 = vmatpush3.bf16.msra.mxu1 %v10434_v59  ;;  %v6172_v2 = vrot.slane %v6170_v36, 6  ;;  %8699 = vmatprep.mubr.bf16.mxu0 %v7723_v58  ;;  %v3066_v11 = vrot.slane %v3065_v63, 4  ;;  %v6197_v20 = vshll.u32 %v7704_v14, 16  ;;  %v7749_v28 = vrot.slane %v7733_v0, 10  ;;  %v7740_v43 = vld [vmem:[%s9240_s15 + $0x3c] sm:$0x3] }
 0x197   : > { %8730 = vmatprep.subr.bf16.mxu1 %v10448_v19  ;;  %v6182_v17 = vor.u32 %v6181_v6, %v6178_v4  ;;  %v6187_v18 = vrot.slane %v6185_v7, 5  ;;  %v6190_v26 = vrot.slane %v6188_v12, 6  ;;  %v6406_v32 = vrot.slane %v7734_v1, 6  ;;  %v7745_v49 = vld [vmem:[%s9240_s15 + $0x50] sm:$0xc] }
 0x198   : > { %8708 = vmatpush3.bf16.msra.mxu0 %v10434_v59  ;;  %v6194_v59 = vshrl.u32 %v7704_v14, 16  ;;  %v6173_v16 = vor.u32 %v6172_v2, %v6169_v62  ;;  %v3071_v24 = vsel %vm9348_vm7, %v3066_v11, %v3070_v54  ;;  %v6199_v31 = vrot.slane %v6197_v20, 6  ;;  %v7746_v52 = vld [vmem:[%s9240_s15 + $0x54] sm:$0x3]  ;;  %v7747_v36 = vld [vmem:[%s9240_s15 + $0x58] sm:$0xc] }
 0x199   : > { %8709 = vmatprep.subr.bf16.mxu0 %v10448_v19  ;;  %v7172_v30 = vcombine.low %v3057_v10, %v3071_v24  ;;  %v6191_v34 = vor.u32 %v6190_v26, %v6187_v18  ;;  %v7750_v38 = vrot.slane %v7735_v8, 10  ;;  %v6410_v3 = vrot.slane %v7736_v9, 6  ;;  %v7748_v53 = vld [vmem:[%s9240_s15 + $0x5c] sm:$0x3]  ;;  %s6731_s15 = sshll.u32 %s9198_s13, 3 }
 0x19a   : > { %8738 = vmatpush3.bf16.msra.mxu1 %v10448_v19  ;;  %v6196_v27 = vrot.slane %v6194_v59, 5  ;;  %v6174_v25 = vrot.slane %v6173_v16, 4  ;;  %v7753_v35 = vrot.slane %v7741_v15, 10  ;;  %v6407_v37 = vsel %vm9481_vm11, %v7749_v28, %v6406_v32  ;;  %p167_p4 = scmp.lt.s32.totalorder %s6731_s15, 15 }
 0x19b   : > { %8731 = vmatprep.subr.bf16.mxu1 %v10462_v41  ;;  %8412 = vmatmul.mubr.bf16.gmra.mrb[4].mxu1 %v7172_v30  ;;  %v6422_v42 = vrot.slane %v7742_v22, 6  ;;  %v6192_v45 = vrot.slane %v6191_v34, 4  ;;  %v6411_v46 = vsel %vm9481_vm11, %v7750_v38, %v6410_v3  ;;  %v7754_v47 = vrot.slane %v7743_v23, 10  ;;  %v7785_v30 = vld [vmem:[%s10553_s2] ss:$0 sm:$0xff] }
 0x19c   : > { %8710 = vmatpush3.bf16.msra.mxu0 %v10448_v19  ;;  %v6183_v19 = vsel %vm9367_vm8, %v6174_v25, %v6182_v17  ;;  %v6200_v39 = vor.u32 %v6199_v31, %v6196_v27  ;;  %v6426_v48 = vrot.slane %v7744_v29, 6  ;;  %v7773_v50 = vcombine.low %v6407_v37, %v6411_v46  ;;  %s10564_s15 = smov (!%p167_p4, %s6731_s15), 15 }
 0x19d   : > { %8711 = vmatprep.subr.bf16.mxu0 %v10462_v41  ;;  %v6423_v51 = vsel %vm9481_vm11, %v7753_v35, %v6422_v42  ;;  %v7751_v14 = vrot.slane %v7737_v33, 10  ;;  %v6414_v55 = vrot.slane %v7738_v21, 6  ;;  %v7752_v60 = vrot.slane %v7739_v44, 10  ;;  %s6732_s13 = sshll.u32 %s10564_s15, 2 }
 0x19e   : > { %8739 = vmatpush3.bf16.msra.mxu1 %v10462_v41  ;;  %v6201_v54 = vsel %vm9367_vm8, %v6192_v45, %v6200_v39  ;;  %v7755_v63 = vrot.slane %v7745_v49, 10  ;;  %v6418_v62 = vrot.slane %v7740_v43, 6  ;;  %v6430_v0 = vrot.slane %v7746_v52, 6  ;;  %s170_s11 = scalar_lea.vmem %s10554_s3, %s6732_s13 }
 0x19f   : > { %8732 = vmatprep.subr.bf16.mxu1 %v10477_v57  ;;  %v7724_v56 = vcombine.low %v6183_v19, %v6201_v54  ;;  %v7756_v1 = vrot.slane %v7747_v36, 10  ;;  %v6434_v2 = vrot.slane %v7748_v53, 6 }
 0x1a0   : > { %8712 = vmatpush3.bf16.msra.mxu0 %v10462_v41  ;;  %v6427_v41 = vsel %vm9481_vm11, %v7754_v47, %v6426_v48  ;;  %v6431_v61 = vsel %vm9481_vm11, %v7755_v63, %v6430_v0  ;;  %v6419_v7 = vsel %vm9481_vm11, %v7752_v60, %v6418_v62 }
 0x1a1   : > { %8713 = vmatprep.subr.bf16.mxu0 %v10477_v57  ;;  %v7775_v58 = vcombine.low %v6423_v51, %v6427_v41  ;;  %8700 = vmatmul.mubr.bf16.gmra.mrb[4].mxu0 %v7724_v56  ;;  %v6435_v4 = vsel %vm9481_vm11, %v7756_v1, %v6434_v2 }
 0x1a2   : > { %8740 = vmatpush3.bf16.msra.mxu1 %v10477_v57  ;;  %8719 = vmatprep.mubr.bf16.mxu0 %v7773_v50  ;;  %v7776_v6 = vcombine.low %v6431_v61, %v6435_v4 }
 0x1a3   : > { %8733 = vmatprep.subr.bf16.mxu1 %v10491_v13  ;;  %8723 = vmatprep.mubr.bf16.mxu1 %v7775_v58 }
 0x1a4   : > { %8714 = vmatpush3.bf16.msra.mxu0 %v10477_v57  ;;  %v6415_v57 = vsel %vm9481_vm11, %v7751_v14, %v6414_v55 }
 0x1a5   : > { %8715 = vmatprep.subr.bf16.mxu0 %v10491_v13  ;;  %v7774_v8 = vcombine.low %v6415_v57, %v6419_v7 }
 0x1a6   : > { %8741 = vmatpush3.bf16.msra.mxu1 %v10491_v13 }
 0x1a7   : > { %8734 = vmatprep.subr.bf16.mxu1 %v9163_v40 }
 0x1a8   : > { %8716 = vmatpush3.bf16.msra.mxu0 %v10491_v13 }
 0x1a9   : > { %8717 = vmatprep.subr.bf16.mxu0 %v9163_v40 }
 0x1aa   : > { %8742 = vmatpush3.bf16.msra.mxu1 %v9163_v40 }
 0x1ac   : > { %8718 = vmatpush3.bf16.msra.mxu0 %v9163_v40 }
 0x1ad   : > { %8724 = vmatmul.mubr.bf16.vlgmr.msra.gmra.mrb[8].mxu1 %v7776_v6 }
 0x1af   : > { %8720 = vmatmul.mubr.bf16.vlgmr.msra.gmra.mrb[0].mxu0 %v7774_v8 }
 0x260   : > { %v8409_v9 = vpop.f32.mrb[0].mxu1 }
 0x261   : > { %v3195_v10 = vpop.f32.mrb[1].mxu1 }
 0x262   : > { %v8410_v11 = vpop.f32.mrb[2].mxu1 }
 0x263   : > { %v3198_v12 = vpop.f32.mrb[3].mxu1 }
 0x26e   : > { %v8413_v59 = vpop.f32.mrb[4].mxu1 }
 0x26f   : > { %v3211_v15 = vpop.f32.mrb[5].mxu1 }
 0x270   : > { %v8414_v16 = vpop.f32.mrb[6].mxu1 }
 0x271   : > { %v3214_v13 = vpop.f32.mrb[7].mxu1 }
 0x274   : > { %v8701_v17 = vpop.f32.mrb[4].mxu0 }
 0x275   : > { %v8747_v18 = vadd.f32 %v8701_v17, %v8413_v59  ;;  %v6341_v20 = vpop.f32.mrb[5].mxu0 }
 0x276   : > { %v8749_v5 = vadd.f32 %v6341_v20, %v3211_v15  ;;  %v8702_v22 = vpop.f32.mrb[6].mxu0 }
 0x277   : > { %v8751_v23 = vadd.f32 %v8702_v22, %v8414_v16  ;;  %v6344_v24 = vpop.f32.mrb[7].mxu0 }
 0x278   : > { %v8753_v26 = vadd.f32 %v6344_v24, %v3214_v13 }
 0x280   : > { %v8725_v27 = vpop.f32.mrb[8].mxu1 }
 0x281   : > { %v8748_v28 = vadd.f32 %v8747_v18, %v8725_v27  ;;  %v6575_v29 = vpop.f32.mrb[9].mxu1 }
 0x282   : > { %v8750_v25 = vadd.f32 %v8749_v5, %v6575_v29  ;;  %v8726_v31 = vpop.f32.mrb[10].mxu1  ;;  %v8721_v35 = vpop.f32.mrb[0].mxu0 }
 0x283   : > { %v8752_v32 = vadd.f32 %v8751_v23, %v8726_v31  ;;  %v6578_v33 = vpop.f32.mrb[11].mxu1  ;;  %v6627_v38 = vadd.f32 %v8748_v28, %v7785_v30  ;;  %v8743_v39 = vadd.f32 %v8721_v35, %v8409_v9  ;;  %v6559_v40 = vpop.f32.mrb[1].mxu0 }
 0x284   : > { %v8754_v34 = vadd.f32 %v8753_v26, %v6578_v33  ;;  %v6625_v21 = vadd.f32 %v8750_v25, %v7785_v30  ;;  %v8744_v42 = vadd.f32 %v6559_v40, %v3195_v10  ;;  %v8722_v44 = vpop.f32.mrb[2].mxu0 }
 0x285   : > { %v6628_v3 = vadd.f32 %v8752_v32, %v7785_v30  ;;  %v8745_v45 = vadd.f32 %v8722_v44, %v8410_v11  ;;  %v6562_v46 = vpop.f32.mrb[3].mxu0  ;;  %v6623_v48 = vadd.f32 %v8743_v39, %v7785_v30 }
 0x286   : > { %v6626_v19 = vadd.f32 %v8754_v34, %v7785_v30  ;;  %v8746_v47 = vadd.f32 %v6562_v46, %v3198_v12  ;;  %v6621_v50 = vadd.f32 %v8744_v42, %v7785_v30 }
 0x287   : > { %v7822_v37 = vpack.c.bf16 %v6628_v3, %v6627_v38  ;;  %v6624_v49 = vadd.f32 %v8745_v45, %v7785_v30 }
 0x288   : > { %v7817_v43 = vpack.c.bf16 %v6626_v19, %v6625_v21  ;;  %v6622_v51 = vadd.f32 %v8746_v47, %v7785_v30 }
 0x289   : > { %7826 = vst [vmem:[%s170_s11 + $0x18] sm:$0xff] %v7822_v37   ;;  %v7812_v52 = vpack.c.bf16 %v6624_v49, %v6623_v48 }
 0x28a   : > { %7825 = vst [vmem:[%s170_s11 + $0x10] sm:$0xff] %v7817_v43   ;;  %v7807_v36 = vpack.c.bf16 %v6622_v51, %v6621_v50 }
 0x28b   : > { %7824 = vst [vmem:[%s170_s11 + $0x8] sm:$0xff] %v7812_v52  }
 0x28c   : > { %7808 = vst [vmem:[%s170_s11] sm:$0xff] %v7807_v36  }
 0x28d PF: > { %s13_s12 = sadd.s32 1, %s9170_s12  }
 0x28e   : > { %p10_p5 = scmp.ge.s32.totalorder %s13_s12, 4  }
 0x290   :  { %12 = sbr.rel (!%p10_p5) target bundleno = 1 (0x1), region = 90 }

</bundles_post_ra>
